<compile_context>
chip_gen: v6e
topology: v6e:2x2x1
jax: 0.10.0
libtpu: 0.0.40
codegen_flags: <defaults>
</compile_context>

<pallas_src>
import jax
import jax.numpy as jnp
from jax import lax
from jax.experimental import pallas as pl
from jax.experimental.pallas import tpu as pltpu

# ---- scaled-down dims (module constants are 300/2048/1024/1280/0.5; kept small) ----
Q_DIM = 32        # q_dim         (300 in the module)
V_DIM = 256       # v_dim         (2048)
NUM_HID = 128     # num_hid       (1024)
FA_NUM_HID = 128  # fa_num_hid    (1280)
NUM_ANS = 17      # conf.data.num_ans -> logits have NUM_ANS - 1 = 16 columns
VOCAB = 50
SEQ = 8
NUM_BBOX = 8
BSZ = 2

VMEM_SPEC = pl.BlockSpec(memory_space=pltpu.MemorySpace.VMEM)


# ----------------------------- fused Pallas kernel -----------------------------

def _peterson_kernel(gx_ref, v_ref,
                     whh_f_ref, whh_b_ref, bhh_f_ref, bhh_b_ref,
                     w1v_ref, w1q_ref, b1_ref, w2_ref, b2_ref,
                     wq_ref, bq_ref, wv_ref, bv_ref,
                     wc1_ref, bc1_ref, wc2_ref, bc2_ref,
                     out_ref):
    """Whole post-embedding forward in one kernel.

    gx_ref:  [T, B, 6H]  precomputed x @ W_ih + b_ih for both directions
                         (cols 0:3H forward gates r|z|n, cols 3H:6H backward)
    v_ref:   [B, NB, V]  visual features
    whh_*:   [H, 3H]     recurrent weights (transposed PyTorch layout)
    bhh_*:   [1, 3H]
    w1v/w1q: [V, FA] / [2H, FA]  split of the attn concat-input Linear
    b1:      [1, FA], w2: [1, FA] (row), b2: [1, 1]
    wq/bq, wv/bv: projections;  wc1/bc1, wc2/bc2: classifier
    out_ref: [B, NUM_ANS-1]
    """
    T, B, G = gx_ref.shape
    H = whh_f_ref.shape[0]
    NB, V = v_ref.shape[1], v_ref.shape[2]
    FA = w1v_ref.shape[1]

    # ---------------- bidirectional GRU (only h @ W_hh on the serial path) ----------
    def gru_cell(gx, gh, h):
        r = jax.nn.sigmoid(gx[:, 0:H] + gh[:, 0:H])
        z = jax.nn.sigmoid(gx[:, H:2 * H] + gh[:, H:2 * H])
        n = jnp.tanh(gx[:, 2 * H:3 * H] + r * gh[:, 2 * H:3 * H])
        return (1.0 - z) * n + z * h

    def step(t, carry):
        h_f, h_b = carry
        # Two independent 128-K dots per step; they pipeline in the MXU.
        # TODO(synk): on v6e/v7x a block-diagonal [2H,6H] recurrent weight would pack
        # this into a single K=256 push; kept as two dots (also the v5e-preferred form).
        gh_f = jnp.dot(h_f, whh_f_ref[...],
                       preferred_element_type=jnp.float32) + bhh_f_ref[...]
        gh_b = jnp.dot(h_b, whh_b_ref[...],
                       preferred_element_type=jnp.float32) + bhh_b_ref[...]
        gx_f = gx_ref[t][:, 0:3 * H]
        gx_b = gx_ref[T - 1 - t][:, 3 * H:6 * H]
        return gru_cell(gx_f, gh_f, h_f), gru_cell(gx_b, gh_b, h_b)

    h0 = jnp.zeros((B, H), jnp.float32)
    h_f, h_b = lax.fori_loop(0, T, step, (h0, h0), unroll=True)
    q_emb = jnp.concatenate([h_f, h_b], axis=-1)               # [B, 2H]

    # ---------------- attention over bboxes + weighted pooling ----------------------
    v = v_ref[...]                                             # [B, NB, V]
    hv = jnp.dot(v.reshape(B * NB, V), w1v_ref[...],
                 preferred_element_type=jnp.float32).reshape(B, NB, FA)
    hq = jnp.dot(q_emb, w1q_ref[...],
                 preferred_element_type=jnp.float32)           # [B, FA]
    hatt = jnp.maximum(hv + hq[:, None, :] + b1_ref[...], 0.0) # [B, NB, FA]
    # 1-output-column matmul replaced by a VPU multiply + lane reduction.
    logit = jnp.sum(hatt * w2_ref[...], axis=-1) + b2_ref[...] # [B, NB]
    m = jnp.max(logit, axis=1, keepdims=True)
    e = jnp.exp(logit - m)
    score = e * pl.reciprocal(jnp.sum(e, axis=1, keepdims=True), approx=True)
    v_attn = jnp.sum(score[:, :, None] * v, axis=1)            # [B, V]

    # ---------------- projections + classifier (dropout = identity in eval) ---------
    qp = jnp.maximum(jnp.dot(q_emb, wq_ref[...],
                             preferred_element_type=jnp.float32) + bq_ref[...], 0.0)
    vp = jnp.maximum(jnp.dot(v_attn, wv_ref[...],
                             preferred_element_type=jnp.float32) + bv_ref[...], 0.0)
    qv = qp * vp
    h1 = jnp.maximum(jnp.dot(qv, wc1_ref[...],
                             preferred_element_type=jnp.float32) + bc1_ref[...], 0.0)
    # TODO(synk): nn.Dropout(0.5) is a no-op at inference; training-mode dropout not implemented.
    out_ref[...] = jnp.dot(h1, wc2_ref[...],
                           preferred_element_type=jnp.float32) + bc2_ref[...]


# ----------------------------- wrappers -----------------------------

def prep_params(p):
    """One-time layout prep: transposes / splits / bias reshapes (not per call)."""
    V = V_DIM
    return {
        "emb": p["emb"],
        # input-side GRU weights, both directions stacked on the output axis
        "wih_cat": jnp.concatenate([p["w_ih_f"].T, p["w_ih_b"].T], axis=1),   # [D, 6H]
        "bih_cat": jnp.concatenate([p["b_ih_f"], p["b_ih_b"]])[None, :],      # [1, 6H]
        # recurrent weights
        "whh_f": p["w_hh_f"].T, "whh_b": p["w_hh_b"].T,                       # [H, 3H]
        "bhh_f": p["b_hh_f"][None, :], "bhh_b": p["b_hh_b"][None, :],
        # attn_fn
        "w1v": p["w1"][:, :V].T,                                              # [V, FA]
        "w1q": p["w1"][:, V:].T,                                              # [2H, FA]
        "b1": p["b1"][None, :],
        "w2row": p["w2"],                                                     # [1, FA]
        "b2": p["b2"][None, :],                                               # [1, 1]
        # q_proj / v_proj / clf
        "wq": p["wq"].T, "bq": p["bq"][None, :],
        "wv": p["wv"].T, "bv": p["bv"][None, :],
        "wc1": p["wc1"].T, "bc1": p["bc1"][None, :],
        "wc2": p["wc2"].T, "bc2": p["bc2"][None, :],
    }


@jax.jit
def peterson_forward(pp, v_emb, img_spatial, qs, q_lens):
    del img_spatial, q_lens  # unused by the PyTorch forward as well
    B, T = qs.shape
    D = pp["emb"].shape[1]
    H = pp["whh_f"].shape[0]
    # embedding lookup (glue) + hoisted input-side GRU GEMM (single [T*B,D]x[D,6H] matmul)
    x = jnp.take(pp["emb"], qs, axis=0).astype(jnp.float32)          # [B, T, D]
    x_tb = jnp.transpose(x, (1, 0, 2))                               # time-major [T, B, D]
    gx = (x_tb.reshape(T * B, D) @ pp["wih_cat"] + pp["bih_cat"]).reshape(T, B, 6 * H)

    return pl.pallas_call(
        _peterson_kernel,
        out_shape=jax.ShapeDtypeStruct((B, NUM_ANS - 1), jnp.float32),
        in_specs=[VMEM_SPEC] * 19,
        out_specs=VMEM_SPEC,
    )(gx, v_emb,
      pp["whh_f"], pp["whh_b"], pp["bhh_f"], pp["bhh_b"],
      pp["w1v"], pp["w1q"], pp["b1"], pp["w2row"], pp["b2"],
      pp["wq"], pp["bq"], pp["wv"], pp["bv"],
      pp["wc1"], pp["bc1"], pp["wc2"], pp["bc2"])


# ----------------------------- pure-JAX reference -----------------------------

def _gru_ref_dir(x_btd, w_ih, w_hh, b_ih, b_hh, reverse):
    B, T, D = x_btd.shape
    H = w_hh.shape[1]
    x = x_btd[:, ::-1, :] if reverse else x_btd
    h = jnp.zeros((B, H), jnp.float32)
    for t in range(T):
        xt = x[:, t, :]
        gx = xt @ w_ih.T + b_ih
        gh = h @ w_hh.T + b_hh
        r = jax.nn.sigmoid(gx[:, :H] + gh[:, :H])
        z = jax.nn.sigmoid(gx[:, H:2 * H] + gh[:, H:2 * H])
        n = jnp.tanh(gx[:, 2 * H:] + r * gh[:, 2 * H:])
        h = (1.0 - z) * n + z * h
    return h


def reference_forward(p, v_emb, img_spatial, qs, q_lens):
    del img_spatial, q_lens
    q_tok = jnp.take(p["emb"], qs, axis=0)
    h_f = _gru_ref_dir(q_tok, p["w_ih_f"], p["w_hh_f"], p["b_ih_f"], p["b_hh_f"], False)
    h_b = _gru_ref_dir(q_tok, p["w_ih_b"], p["w_hh_b"], p["b_ih_b"], p["b_hh_b"], True)
    q_emb = jnp.concatenate([h_f, h_b], axis=-1)
    NB = v_emb.shape[1]
    q_rep = jnp.repeat(q_emb[:, None, :], NB, axis=1)
    qv_cat = jnp.concatenate([v_emb, q_rep], axis=2)
    hh = jax.nn.relu(qv_cat @ p["w1"].T + p["b1"])
    logit = (hh @ p["w2"].T + p["b2"])[..., 0]
    score = jax.nn.softmax(logit, axis=1)
    v_attn = jnp.einsum("bn,bnv->bv", score, v_emb)
    qp = jax.nn.relu(q_emb @ p["wq"].T + p["bq"])
    vp = jax.nn.relu(v_attn @ p["wv"].T + p["bv"])
    qve = qp * vp
    c1 = jax.nn.relu(qve @ p["wc1"].T + p["bc1"])
    return c1 @ p["wc2"].T + p["bc2"]


# ----------------------------- params & main -----------------------------

def init_params(key):
    H, D, V, FA = NUM_HID, Q_DIM, V_DIM, FA_NUM_HID
    ks = jax.random.split(key, 20)

    def w(k, shape, fan_in):
        return (jax.random.normal(k, shape, jnp.float32) / jnp.sqrt(float(fan_in)))

    emb = jax.random.normal(ks[0], (VOCAB, D), jnp.float32)
    emb = emb.at[0].set(0.0)  # padding_idx=0
    p = {
        "emb": emb,
        # GRU (PyTorch layout: weight_ih [3H, D], weight_hh [3H, H]; gates r|z|n)
        "w_ih_f": w(ks[1], (3 * H, D), D), "w_hh_f": w(ks[2], (3 * H, H), H),
        "b_ih_f": w(ks[3], (3 * H,), H),   "b_hh_f": w(ks[4], (3 * H,), H),
        "w_ih_b": w(ks[5], (3 * H, D), D), "w_hh_b": w(ks[6], (3 * H, H), H),
        "b_ih_b": w(ks[7], (3 * H,), H),   "b_hh_b": w(ks[8], (3 * H,), H),
        # attn_fn: Linear(V + 2H -> FA) + ReLU, Linear(FA -> 1)
        "w1": w(ks[9], (FA, V + 2 * H), V + 2 * H), "b1": w(ks[10], (FA,), FA),
        "w2": w(ks[11], (1, FA), FA),               "b2": w(ks[12], (1,), FA),
        # q_proj / v_proj
        "wq": w(ks[13], (H, 2 * H), 2 * H), "bq": w(ks[14], (H,), H),
        "wv": w(ks[15], (H, V), V),         "bv": w(ks[16], (H,), H),
        # clf
        "wc1": w(ks[17], (H, H), H),               "bc1": jnp.zeros((H,), jnp.float32),
        "wc2": w(ks[18], (NUM_ANS - 1, H), H),     "bc2": jnp.zeros((NUM_ANS - 1,), jnp.float32),
    }
    return p


if __name__ == "__main__":
    key = jax.random.PRNGKey(0)
    kp, kv, kq, ks, kl = jax.random.split(key, 5)

    params = init_params(kp)
    prepped = prep_params(params)

    v_emb = jax.random.normal(kv, (BSZ, NUM_BBOX, V_DIM), jnp.float32)
    img_spatial = jax.random.normal(ks, (BSZ, NUM_BBOX, 4), jnp.float32)   # unused
    qs = jax.random.randint(kq, (BSZ, SEQ), 1, VOCAB, dtype=jnp.int32)
    q_lens = jnp.full((BSZ,), SEQ, jnp.int32)                              # unused

    logits = peterson_forward(prepped, v_emb, img_spatial, qs, q_lens)
    logits = jax.block_until_ready(logits)

    ref = jax.block_until_ready(reference_forward(params, v_emb, img_spatial, qs, q_lens))

    assert logits.shape == (BSZ, NUM_ANS - 1), logits.shape
    assert bool(jnp.all(jnp.isfinite(logits)))
    err = float(jnp.max(jnp.abs(logits - ref)))
    scale = float(jnp.max(jnp.abs(ref))) + 1e-6
    assert err <= 0.03 * scale + 1e-4, f"mismatch: max abs err {err}, ref scale {scale}"

    print("KERNEL_OK")
</pallas_src>

<mosaic_0001>
module attributes {stable_mosaic.version = 11 : i64} {
  func.func @_peterson_kernel(%arg0: memref<8x2x768xf32, #tpu.memory_space<vmem>>, %arg1: memref<2x8x256xf32, #tpu.memory_space<vmem>>, %arg2: memref<128x384xf32, #tpu.memory_space<vmem>>, %arg3: memref<128x384xf32, #tpu.memory_space<vmem>>, %arg4: memref<1x384xf32, #tpu.memory_space<vmem>>, %arg5: memref<1x384xf32, #tpu.memory_space<vmem>>, %arg6: memref<256x128xf32, #tpu.memory_space<vmem>>, %arg7: memref<256x128xf32, #tpu.memory_space<vmem>>, %arg8: memref<1x128xf32, #tpu.memory_space<vmem>>, %arg9: memref<1x128xf32, #tpu.memory_space<vmem>>, %arg10: memref<1x1xf32, #tpu.memory_space<vmem>>, %arg11: memref<256x128xf32, #tpu.memory_space<vmem>>, %arg12: memref<1x128xf32, #tpu.memory_space<vmem>>, %arg13: memref<256x128xf32, #tpu.memory_space<vmem>>, %arg14: memref<1x128xf32, #tpu.memory_space<vmem>>, %arg15: memref<128x128xf32, #tpu.memory_space<vmem>>, %arg16: memref<1x128xf32, #tpu.memory_space<vmem>>, %arg17: memref<128x16xf32, #tpu.memory_space<vmem>>, %arg18: memref<1x16xf32, #tpu.memory_space<vmem>>, %arg19: memref<2x16xf32, #tpu.memory_space<vmem>>) attributes {dimension_semantics = [], scalar_prefetch = 0 : i64, scratch_operands = 0 : i64, tpu.core_type = #tpu.core_type<tc>} {
    %cst = arith.constant 0.000000e+00 : f32
    %0 = vector.broadcast %cst : f32 to vector<2x128xf32>
    %c0_i32 = arith.constant 0 : i32
    %c0 = arith.constant 0 : index
    %c0_0 = arith.constant 0 : index
    %1 = vector.load %arg2[%c0, %c0_0] : memref<128x384xf32, #tpu.memory_space<vmem>>, vector<128x384xf32>
    %cst_1 = arith.constant dense<0.000000e+00> : vector<2x384xf32>
    %2 = tpu.matmul %0, %1, %cst_1 {dimension_numbers = #tpu.dot_dimension_numbers<[1], [0], [0], [1], [0, 0, 1, 1], [], []>} : vector<2x128xf32>, vector<128x384xf32>, vector<2x384xf32> -> vector<2x384xf32>
    %c0_2 = arith.constant 0 : index
    %c0_3 = arith.constant 0 : index
    %3 = vector.load %arg4[%c0_2, %c0_3] : memref<1x384xf32, #tpu.memory_space<vmem>>, vector<1x384xf32>
    %4 = vector.broadcast %3 : vector<1x384xf32> to vector<2x384xf32>
    %5 = arith.addf %2, %4 : vector<2x384xf32>
    %c0_4 = arith.constant 0 : index
    %c0_5 = arith.constant 0 : index
    %6 = vector.load %arg3[%c0_4, %c0_5] : memref<128x384xf32, #tpu.memory_space<vmem>>, vector<128x384xf32>
    %cst_6 = arith.constant dense<0.000000e+00> : vector<2x384xf32>
    %7 = tpu.matmul %0, %6, %cst_6 {dimension_numbers = #tpu.dot_dimension_numbers<[1], [0], [0], [1], [0, 0, 1, 1], [], []>} : vector<2x128xf32>, vector<128x384xf32>, vector<2x384xf32> -> vector<2x384xf32>
    %c0_7 = arith.constant 0 : index
    %c0_8 = arith.constant 0 : index
    %8 = vector.load %arg5[%c0_7, %c0_8] : memref<1x384xf32, #tpu.memory_space<vmem>>, vector<1x384xf32>
    %9 = vector.broadcast %8 : vector<1x384xf32> to vector<2x384xf32>
    %10 = arith.addf %7, %9 : vector<2x384xf32>
    %11 = arith.index_cast %c0_i32 : i32 to index
    %c0_9 = arith.constant 0 : index
    %c0_10 = arith.constant 0 : index
    %12 = vector.load %arg0[%11, %c0_9, %c0_10] : memref<8x2x768xf32, #tpu.memory_space<vmem>>, vector<1x2x768xf32>
    %13 = vector.shape_cast %12 : vector<1x2x768xf32> to vector<2x768xf32>
    %14 = vector.extract_strided_slice %13 {offsets = [0, 0], sizes = [2, 384], strides = [1, 1]} : vector<2x768xf32> to vector<2x384xf32>
    %c7_i32 = arith.constant 7 : i32
    %15 = arith.subi %c7_i32, %c0_i32 : i32
    %16 = arith.index_cast %15 : i32 to index
    %c0_11 = arith.constant 0 : index
    %c0_12 = arith.constant 0 : index
    %17 = vector.load %arg0[%16, %c0_11, %c0_12] : memref<8x2x768xf32, #tpu.memory_space<vmem>>, vector<1x2x768xf32>
    %18 = vector.shape_cast %17 : vector<1x2x768xf32> to vector<2x768xf32>
    %19 = vector.extract_strided_slice %18 {offsets = [0, 384], sizes = [2, 384], strides = [1, 1]} : vector<2x768xf32> to vector<2x384xf32>
    %20 = vector.extract_strided_slice %14 {offsets = [0, 0], sizes = [2, 128], strides = [1, 1]} : vector<2x384xf32> to vector<2x128xf32>
    %21 = vector.extract_strided_slice %5 {offsets = [0, 0], sizes = [2, 128], strides = [1, 1]} : vector<2x384xf32> to vector<2x128xf32>
    %22 = arith.addf %20, %21 : vector<2x128xf32>
    %23 = arith.negf %22 : vector<2x128xf32>
    %24 = math.exp %23 : vector<2x128xf32>
    %cst_13 = arith.constant 1.000000e+00 : f32
    %25 = vector.broadcast %cst_13 : f32 to vector<2x128xf32>
    %26 = arith.addf %25, %24 : vector<2x128xf32>
    %27 = arith.divf %25, %26 : vector<2x128xf32>
    %28 = vector.extract_strided_slice %14 {offsets = [0, 128], sizes = [2, 128], strides = [1, 1]} : vector<2x384xf32> to vector<2x128xf32>
    %29 = vector.extract_strided_slice %5 {offsets = [0, 128], sizes = [2, 128], strides = [1, 1]} : vector<2x384xf32> to vector<2x128xf32>
    %30 = arith.addf %28, %29 : vector<2x128xf32>
    %31 = arith.negf %30 : vector<2x128xf32>
    %32 = math.exp %31 : vector<2x128xf32>
    %cst_14 = arith.constant 1.000000e+00 : f32
    %33 = vector.broadcast %cst_14 : f32 to vector<2x128xf32>
    %34 = arith.addf %33, %32 : vector<2x128xf32>
    %35 = arith.divf %33, %34 : vector<2x128xf32>
    %36 = vector.extract_strided_slice %14 {offsets = [0, 256], sizes = [2, 128], strides = [1, 1]} : vector<2x384xf32> to vector<2x128xf32>
    %37 = vector.extract_strided_slice %5 {offsets = [0, 256], sizes = [2, 128], strides = [1, 1]} : vector<2x384xf32> to vector<2x128xf32>
    %38 = arith.mulf %27, %37 : vector<2x128xf32>
    %39 = arith.addf %36, %38 : vector<2x128xf32>
    %40 = math.tanh %39 : vector<2x128xf32>
    %cst_15 = arith.constant 1.000000e+00 : f32
    %41 = vector.broadcast %cst_15 : f32 to vector<2x128xf32>
    %42 = arith.subf %41, %35 : vector<2x128xf32>
    %43 = arith.mulf %42, %40 : vector<2x128xf32>
    %44 = arith.mulf %35, %0 : vector<2x128xf32>
    %45 = arith.addf %43, %44 : vector<2x128xf32>
    %46 = vector.extract_strided_slice %19 {offsets = [0, 0], sizes = [2, 128], strides = [1, 1]} : vector<2x384xf32> to vector<2x128xf32>
    %47 = vector.extract_strided_slice %10 {offsets = [0, 0], sizes = [2, 128], strides = [1, 1]} : vector<2x384xf32> to vector<2x128xf32>
    %48 = arith.addf %46, %47 : vector<2x128xf32>
    %49 = arith.negf %48 : vector<2x128xf32>
    %50 = math.exp %49 : vector<2x128xf32>
    %cst_16 = arith.constant 1.000000e+00 : f32
    %51 = vector.broadcast %cst_16 : f32 to vector<2x128xf32>
    %52 = arith.addf %51, %50 : vector<2x128xf32>
    %53 = arith.divf %51, %52 : vector<2x128xf32>
    %54 = vector.extract_strided_slice %19 {offsets = [0, 128], sizes = [2, 128], strides = [1, 1]} : vector<2x384xf32> to vector<2x128xf32>
    %55 = vector.extract_strided_slice %10 {offsets = [0, 128], sizes = [2, 128], strides = [1, 1]} : vector<2x384xf32> to vector<2x128xf32>
    %56 = arith.addf %54, %55 : vector<2x128xf32>
    %57 = arith.negf %56 : vector<2x128xf32>
    %58 = math.exp %57 : vector<2x128xf32>
    %cst_17 = arith.constant 1.000000e+00 : f32
    %59 = vector.broadcast %cst_17 : f32 to vector<2x128xf32>
    %60 = arith.addf %59, %58 : vector<2x128xf32>
    %61 = arith.divf %59, %60 : vector<2x128xf32>
    %62 = vector.extract_strided_slice %19 {offsets = [0, 256], sizes = [2, 128], strides = [1, 1]} : vector<2x384xf32> to vector<2x128xf32>
    %63 = vector.extract_strided_slice %10 {offsets = [0, 256], sizes = [2, 128], strides = [1, 1]} : vector<2x384xf32> to vector<2x128xf32>
    %64 = arith.mulf %53, %63 : vector<2x128xf32>
    %65 = arith.addf %62, %64 : vector<2x128xf32>
    %66 = math.tanh %65 : vector<2x128xf32>
    %cst_18 = arith.constant 1.000000e+00 : f32
    %67 = vector.broadcast %cst_18 : f32 to vector<2x128xf32>
    %68 = arith.subf %67, %61 : vector<2x128xf32>
    %69 = arith.mulf %68, %66 : vector<2x128xf32>
    %70 = arith.mulf %61, %0 : vector<2x128xf32>
    %71 = arith.addf %69, %70 : vector<2x128xf32>
    %c1_i32 = arith.constant 1 : i32
    %c0_19 = arith.constant 0 : index
    %c0_20 = arith.constant 0 : index
    %72 = vector.load %arg2[%c0_19, %c0_20] : memref<128x384xf32, #tpu.memory_space<vmem>>, vector<128x384xf32>
    %cst_21 = arith.constant dense<0.000000e+00> : vector<2x384xf32>
    %73 = tpu.matmul %45, %72, %cst_21 {dimension_numbers = #tpu.dot_dimension_numbers<[1], [0], [0], [1], [0, 0, 1, 1], [], []>} : vector<2x128xf32>, vector<128x384xf32>, vector<2x384xf32> -> vector<2x384xf32>
    %c0_22 = arith.constant 0 : index
    %c0_23 = arith.constant 0 : index
    %74 = vector.load %arg4[%c0_22, %c0_23] : memref<1x384xf32, #tpu.memory_space<vmem>>, vector<1x384xf32>
    %75 = vector.broadcast %74 : vector<1x384xf32> to vector<2x384xf32>
    %76 = arith.addf %73, %75 : vector<2x384xf32>
    %c0_24 = arith.constant 0 : index
    %c0_25 = arith.constant 0 : index
    %77 = vector.load %arg3[%c0_24, %c0_25] : memref<128x384xf32, #tpu.memory_space<vmem>>, vector<128x384xf32>
    %cst_26 = arith.constant dense<0.000000e+00> : vector<2x384xf32>
    %78 = tpu.matmul %71, %77, %cst_26 {dimension_numbers = #tpu.dot_dimension_numbers<[1], [0], [0], [1], [0, 0, 1, 1], [], []>} : vector<2x128xf32>, vector<128x384xf32>, vector<2x384xf32> -> vector<2x384xf32>
    %c0_27 = arith.constant 0 : index
    %c0_28 = arith.constant 0 : index
    %79 = vector.load %arg5[%c0_27, %c0_28] : memref<1x384xf32, #tpu.memory_space<vmem>>, vector<1x384xf32>
    %80 = vector.broadcast %79 : vector<1x384xf32> to vector<2x384xf32>
    %81 = arith.addf %78, %80 : vector<2x384xf32>
    %82 = arith.index_cast %c1_i32 : i32 to index
    %c0_29 = arith.constant 0 : index
    %c0_30 = arith.constant 0 : index
    %83 = vector.load %arg0[%82, %c0_29, %c0_30] : memref<8x2x768xf32, #tpu.memory_space<vmem>>, vector<1x2x768xf32>
    %84 = vector.shape_cast %83 : vector<1x2x768xf32> to vector<2x768xf32>
    %85 = vector.extract_strided_slice %84 {offsets = [0, 0], sizes = [2, 384], strides = [1, 1]} : vector<2x768xf32> to vector<2x384xf32>
    %c7_i32_31 = arith.constant 7 : i32
    %86 = arith.subi %c7_i32_31, %c1_i32 : i32
    %87 = arith.index_cast %86 : i32 to index
    %c0_32 = arith.constant 0 : index
    %c0_33 = arith.constant 0 : index
    %88 = vector.load %arg0[%87, %c0_32, %c0_33] : memref<8x2x768xf32, #tpu.memory_space<vmem>>, vector<1x2x768xf32>
    %89 = vector.shape_cast %88 : vector<1x2x768xf32> to vector<2x768xf32>
    %90 = vector.extract_strided_slice %89 {offsets = [0, 384], sizes = [2, 384], strides = [1, 1]} : vector<2x768xf32> to vector<2x384xf32>
    %91 = vector.extract_strided_slice %85 {offsets = [0, 0], sizes = [2, 128], strides = [1, 1]} : vector<2x384xf32> to vector<2x128xf32>
    %92 = vector.extract_strided_slice %76 {offsets = [0, 0], sizes = [2, 128], strides = [1, 1]} : vector<2x384xf32> to vector<2x128xf32>
    %93 = arith.addf %91, %92 : vector<2x128xf32>
    %94 = arith.negf %93 : vector<2x128xf32>
    %95 = math.exp %94 : vector<2x128xf32>
    %cst_34 = arith.constant 1.000000e+00 : f32
    %96 = vector.broadcast %cst_34 : f32 to vector<2x128xf32>
    %97 = arith.addf %96, %95 : vector<2x128xf32>
    %98 = arith.divf %96, %97 : vector<2x128xf32>
    %99 = vector.extract_strided_slice %85 {offsets = [0, 128], sizes = [2, 128], strides = [1, 1]} : vector<2x384xf32> to vector<2x128xf32>
    %100 = vector.extract_strided_slice %76 {offsets = [0, 128], sizes = [2, 128], strides = [1, 1]} : vector<2x384xf32> to vector<2x128xf32>
    %101 = arith.addf %99, %100 : vector<2x128xf32>
    %102 = arith.negf %101 : vector<2x128xf32>
    %103 = math.exp %102 : vector<2x128xf32>
    %cst_35 = arith.constant 1.000000e+00 : f32
    %104 = vector.broadcast %cst_35 : f32 to vector<2x128xf32>
    %105 = arith.addf %104, %103 : vector<2x128xf32>
    %106 = arith.divf %104, %105 : vector<2x128xf32>
    %107 = vector.extract_strided_slice %85 {offsets = [0, 256], sizes = [2, 128], strides = [1, 1]} : vector<2x384xf32> to vector<2x128xf32>
    %108 = vector.extract_strided_slice %76 {offsets = [0, 256], sizes = [2, 128], strides = [1, 1]} : vector<2x384xf32> to vector<2x128xf32>
    %109 = arith.mulf %98, %108 : vector<2x128xf32>
    %110 = arith.addf %107, %109 : vector<2x128xf32>
    %111 = math.tanh %110 : vector<2x128xf32>
    %cst_36 = arith.constant 1.000000e+00 : f32
    %112 = vector.broadcast %cst_36 : f32 to vector<2x128xf32>
    %113 = arith.subf %112, %106 : vector<2x128xf32>
    %114 = arith.mulf %113, %111 : vector<2x128xf32>
    %115 = arith.mulf %106, %45 : vector<2x128xf32>
    %116 = arith.addf %114, %115 : vector<2x128xf32>
    %117 = vector.extract_strided_slice %90 {offsets = [0, 0], sizes = [2, 128], strides = [1, 1]} : vector<2x384xf32> to vector<2x128xf32>
    %118 = vector.extract_strided_slice %81 {offsets = [0, 0], sizes = [2, 128], strides = [1, 1]} : vector<2x384xf32> to vector<2x128xf32>
    %119 = arith.addf %117, %118 : vector<2x128xf32>
    %120 = arith.negf %119 : vector<2x128xf32>
    %121 = math.exp %120 : vector<2x128xf32>
    %cst_37 = arith.constant 1.000000e+00 : f32
    %122 = vector.broadcast %cst_37 : f32 to vector<2x128xf32>
    %123 = arith.addf %122, %121 : vector<2x128xf32>
    %124 = arith.divf %122, %123 : vector<2x128xf32>
    %125 = vector.extract_strided_slice %90 {offsets = [0, 128], sizes = [2, 128], strides = [1, 1]} : vector<2x384xf32> to vector<2x128xf32>
    %126 = vector.extract_strided_slice %81 {offsets = [0, 128], sizes = [2, 128], strides = [1, 1]} : vector<2x384xf32> to vector<2x128xf32>
    %127 = arith.addf %125, %126 : vector<2x128xf32>
    %128 = arith.negf %127 : vector<2x128xf32>
    %129 = math.exp %128 : vector<2x128xf32>
    %cst_38 = arith.constant 1.000000e+00 : f32
    %130 = vector.broadcast %cst_38 : f32 to vector<2x128xf32>
    %131 = arith.addf %130, %129 : vector<2x128xf32>
    %132 = arith.divf %130, %131 : vector<2x128xf32>
    %133 = vector.extract_strided_slice %90 {offsets = [0, 256], sizes = [2, 128], strides = [1, 1]} : vector<2x384xf32> to vector<2x128xf32>
    %134 = vector.extract_strided_slice %81 {offsets = [0, 256], sizes = [2, 128], strides = [1, 1]} : vector<2x384xf32> to vector<2x128xf32>
    %135 = arith.mulf %124, %134 : vector<2x128xf32>
    %136 = arith.addf %133, %135 : vector<2x128xf32>
    %137 = math.tanh %136 : vector<2x128xf32>
    %cst_39 = arith.constant 1.000000e+00 : f32
    %138 = vector.broadcast %cst_39 : f32 to vector<2x128xf32>
    %139 = arith.subf %138, %132 : vector<2x128xf32>
    %140 = arith.mulf %139, %137 : vector<2x128xf32>
    %141 = arith.mulf %132, %71 : vector<2x128xf32>
    %142 = arith.addf %140, %141 : vector<2x128xf32>
    %c2_i32 = arith.constant 2 : i32
    %c0_40 = arith.constant 0 : index
    %c0_41 = arith.constant 0 : index
    %143 = vector.load %arg2[%c0_40, %c0_41] : memref<128x384xf32, #tpu.memory_space<vmem>>, vector<128x384xf32>
    %cst_42 = arith.constant dense<0.000000e+00> : vector<2x384xf32>
    %144 = tpu.matmul %116, %143, %cst_42 {dimension_numbers = #tpu.dot_dimension_numbers<[1], [0], [0], [1], [0, 0, 1, 1], [], []>} : vector<2x128xf32>, vector<128x384xf32>, vector<2x384xf32> -> vector<2x384xf32>
    %c0_43 = arith.constant 0 : index
    %c0_44 = arith.constant 0 : index
    %145 = vector.load %arg4[%c0_43, %c0_44] : memref<1x384xf32, #tpu.memory_space<vmem>>, vector<1x384xf32>
    %146 = vector.broadcast %145 : vector<1x384xf32> to vector<2x384xf32>
    %147 = arith.addf %144, %146 : vector<2x384xf32>
    %c0_45 = arith.constant 0 : index
    %c0_46 = arith.constant 0 : index
    %148 = vector.load %arg3[%c0_45, %c0_46] : memref<128x384xf32, #tpu.memory_space<vmem>>, vector<128x384xf32>
    %cst_47 = arith.constant dense<0.000000e+00> : vector<2x384xf32>
    %149 = tpu.matmul %142, %148, %cst_47 {dimension_numbers = #tpu.dot_dimension_numbers<[1], [0], [0], [1], [0, 0, 1, 1], [], []>} : vector<2x128xf32>, vector<128x384xf32>, vector<2x384xf32> -> vector<2x384xf32>
    %c0_48 = arith.constant 0 : index
    %c0_49 = arith.constant 0 : index
    %150 = vector.load %arg5[%c0_48, %c0_49] : memref<1x384xf32, #tpu.memory_space<vmem>>, vector<1x384xf32>
    %151 = vector.broadcast %150 : vector<1x384xf32> to vector<2x384xf32>
    %152 = arith.addf %149, %151 : vector<2x384xf32>
    %153 = arith.index_cast %c2_i32 : i32 to index
    %c0_50 = arith.constant 0 : index
    %c0_51 = arith.constant 0 : index
    %154 = vector.load %arg0[%153, %c0_50, %c0_51] : memref<8x2x768xf32, #tpu.memory_space<vmem>>, vector<1x2x768xf32>
    %155 = vector.shape_cast %154 : vector<1x2x768xf32> to vector<2x768xf32>
    %156 = vector.extract_strided_slice %155 {offsets = [0, 0], sizes = [2, 384], strides = [1, 1]} : vector<2x768xf32> to vector<2x384xf32>
    %c7_i32_52 = arith.constant 7 : i32
    %157 = arith.subi %c7_i32_52, %c2_i32 : i32
    %158 = arith.index_cast %157 : i32 to index
    %c0_53 = arith.constant 0 : index
    %c0_54 = arith.constant 0 : index
    %159 = vector.load %arg0[%158, %c0_53, %c0_54] : memref<8x2x768xf32, #tpu.memory_space<vmem>>, vector<1x2x768xf32>
    %160 = vector.shape_cast %159 : vector<1x2x768xf32> to vector<2x768xf32>
    %161 = vector.extract_strided_slice %160 {offsets = [0, 384], sizes = [2, 384], strides = [1, 1]} : vector<2x768xf32> to vector<2x384xf32>
    %162 = vector.extract_strided_slice %156 {offsets = [0, 0], sizes = [2, 128], strides = [1, 1]} : vector<2x384xf32> to vector<2x128xf32>
    %163 = vector.extract_strided_slice %147 {offsets = [0, 0], sizes = [2, 128], strides = [1, 1]} : vector<2x384xf32> to vector<2x128xf32>
    %164 = arith.addf %162, %163 : vector<2x128xf32>
    %165 = arith.negf %164 : vector<2x128xf32>
    %166 = math.exp %165 : vector<2x128xf32>
    %cst_55 = arith.constant 1.000000e+00 : f32
    %167 = vector.broadcast %cst_55 : f32 to vector<2x128xf32>
    %168 = arith.addf %167, %166 : vector<2x128xf32>
    %169 = arith.divf %167, %168 : vector<2x128xf32>
    %170 = vector.extract_strided_slice %156 {offsets = [0, 128], sizes = [2, 128], strides = [1, 1]} : vector<2x384xf32> to vector<2x128xf32>
    %171 = vector.extract_strided_slice %147 {offsets = [0, 128], sizes = [2, 128], strides = [1, 1]} : vector<2x384xf32> to vector<2x128xf32>
    %172 = arith.addf %170, %171 : vector<2x128xf32>
    %173 = arith.negf %172 : vector<2x128xf32>
    %174 = math.exp %173 : vector<2x128xf32>
    %cst_56 = arith.constant 1.000000e+00 : f32
    %175 = vector.broadcast %cst_56 : f32 to vector<2x128xf32>
    %176 = arith.addf %175, %174 : vector<2x128xf32>
    %177 = arith.divf %175, %176 : vector<2x128xf32>
    %178 = vector.extract_strided_slice %156 {offsets = [0, 256], sizes = [2, 128], strides = [1, 1]} : vector<2x384xf32> to vector<2x128xf32>
    %179 = vector.extract_strided_slice %147 {offsets = [0, 256], sizes = [2, 128], strides = [1, 1]} : vector<2x384xf32> to vector<2x128xf32>
    %180 = arith.mulf %169, %179 : vector<2x128xf32>
    %181 = arith.addf %178, %180 : vector<2x128xf32>
    %182 = math.tanh %181 : vector<2x128xf32>
    %cst_57 = arith.constant 1.000000e+00 : f32
    %183 = vector.broadcast %cst_57 : f32 to vector<2x128xf32>
    %184 = arith.subf %183, %177 : vector<2x128xf32>
    %185 = arith.mulf %184, %182 : vector<2x128xf32>
    %186 = arith.mulf %177, %116 : vector<2x128xf32>
    %187 = arith.addf %185, %186 : vector<2x128xf32>
    %188 = vector.extract_strided_slice %161 {offsets = [0, 0], sizes = [2, 128], strides = [1, 1]} : vector<2x384xf32> to vector<2x128xf32>
    %189 = vector.extract_strided_slice %152 {offsets = [0, 0], sizes = [2, 128], strides = [1, 1]} : vector<2x384xf32> to vector<2x128xf32>
    %190 = arith.addf %188, %189 : vector<2x128xf32>
    %191 = arith.negf %190 : vector<2x128xf32>
    %192 = math.exp %191 : vector<2x128xf32>
    %cst_58 = arith.constant 1.000000e+00 : f32
    %193 = vector.broadcast %cst_58 : f32 to vector<2x128xf32>
    %194 = arith.addf %193, %192 : vector<2x128xf32>
    %195 = arith.divf %193, %194 : vector<2x128xf32>
    %196 = vector.extract_strided_slice %161 {offsets = [0, 128], sizes = [2, 128], strides = [1, 1]} : vector<2x384xf32> to vector<2x128xf32>
    %197 = vector.extract_strided_slice %152 {offsets = [0, 128], sizes = [2, 128], strides = [1, 1]} : vector<2x384xf32> to vector<2x128xf32>
    %198 = arith.addf %196, %197 : vector<2x128xf32>
    %199 = arith.negf %198 : vector<2x128xf32>
    %200 = math.exp %199 : vector<2x128xf32>
    %cst_59 = arith.constant 1.000000e+00 : f32
    %201 = vector.broadcast %cst_59 : f32 to vector<2x128xf32>
    %202 = arith.addf %201, %200 : vector<2x128xf32>
    %203 = arith.divf %201, %202 : vector<2x128xf32>
    %204 = vector.extract_strided_slice %161 {offsets = [0, 256], sizes = [2, 128], strides = [1, 1]} : vector<2x384xf32> to vector<2x128xf32>
    %205 = vector.extract_strided_slice %152 {offsets = [0, 256], sizes = [2, 128], strides = [1, 1]} : vector<2x384xf32> to vector<2x128xf32>
    %206 = arith.mulf %195, %205 : vector<2x128xf32>
    %207 = arith.addf %204, %206 : vector<2x128xf32>
    %208 = math.tanh %207 : vector<2x128xf32>
    %cst_60 = arith.constant 1.000000e+00 : f32
    %209 = vector.broadcast %cst_60 : f32 to vector<2x128xf32>
    %210 = arith.subf %209, %203 : vector<2x128xf32>
    %211 = arith.mulf %210, %208 : vector<2x128xf32>
    %212 = arith.mulf %203, %142 : vector<2x128xf32>
    %213 = arith.addf %211, %212 : vector<2x128xf32>
    %c3_i32 = arith.constant 3 : i32
    %c0_61 = arith.constant 0 : index
    %c0_62 = arith.constant 0 : index
    %214 = vector.load %arg2[%c0_61, %c0_62] : memref<128x384xf32, #tpu.memory_space<vmem>>, vector<128x384xf32>
    %cst_63 = arith.constant dense<0.000000e+00> : vector<2x384xf32>
    %215 = tpu.matmul %187, %214, %cst_63 {dimension_numbers = #tpu.dot_dimension_numbers<[1], [0], [0], [1], [0, 0, 1, 1], [], []>} : vector<2x128xf32>, vector<128x384xf32>, vector<2x384xf32> -> vector<2x384xf32>
    %c0_64 = arith.constant 0 : index
    %c0_65 = arith.constant 0 : index
    %216 = vector.load %arg4[%c0_64, %c0_65] : memref<1x384xf32, #tpu.memory_space<vmem>>, vector<1x384xf32>
    %217 = vector.broadcast %216 : vector<1x384xf32> to vector<2x384xf32>
    %218 = arith.addf %215, %217 : vector<2x384xf32>
    %c0_66 = arith.constant 0 : index
    %c0_67 = arith.constant 0 : index
    %219 = vector.load %arg3[%c0_66, %c0_67] : memref<128x384xf32, #tpu.memory_space<vmem>>, vector<128x384xf32>
    %cst_68 = arith.constant dense<0.000000e+00> : vector<2x384xf32>
    %220 = tpu.matmul %213, %219, %cst_68 {dimension_numbers = #tpu.dot_dimension_numbers<[1], [0], [0], [1], [0, 0, 1, 1], [], []>} : vector<2x128xf32>, vector<128x384xf32>, vector<2x384xf32> -> vector<2x384xf32>
    %c0_69 = arith.constant 0 : index
    %c0_70 = arith.constant 0 : index
    %221 = vector.load %arg5[%c0_69, %c0_70] : memref<1x384xf32, #tpu.memory_space<vmem>>, vector<1x384xf32>
    %222 = vector.broadcast %221 : vector<1x384xf32> to vector<2x384xf32>
    %223 = arith.addf %220, %222 : vector<2x384xf32>
    %224 = arith.index_cast %c3_i32 : i32 to index
    %c0_71 = arith.constant 0 : index
    %c0_72 = arith.constant 0 : index
    %225 = vector.load %arg0[%224, %c0_71, %c0_72] : memref<8x2x768xf32, #tpu.memory_space<vmem>>, vector<1x2x768xf32>
    %226 = vector.shape_cast %225 : vector<1x2x768xf32> to vector<2x768xf32>
    %227 = vector.extract_strided_slice %226 {offsets = [0, 0], sizes = [2, 384], strides = [1, 1]} : vector<2x768xf32> to vector<2x384xf32>
    %c7_i32_73 = arith.constant 7 : i32
    %228 = arith.subi %c7_i32_73, %c3_i32 : i32
    %229 = arith.index_cast %228 : i32 to index
    %c0_74 = arith.constant 0 : index
    %c0_75 = arith.constant 0 : index
    %230 = vector.load %arg0[%229, %c0_74, %c0_75] : memref<8x2x768xf32, #tpu.memory_space<vmem>>, vector<1x2x768xf32>
    %231 = vector.shape_cast %230 : vector<1x2x768xf32> to vector<2x768xf32>
    %232 = vector.extract_strided_slice %231 {offsets = [0, 384], sizes = [2, 384], strides = [1, 1]} : vector<2x768xf32> to vector<2x384xf32>
    %233 = vector.extract_strided_slice %227 {offsets = [0, 0], sizes = [2, 128], strides = [1, 1]} : vector<2x384xf32> to vector<2x128xf32>
    %234 = vector.extract_strided_slice %218 {offsets = [0, 0], sizes = [2, 128], strides = [1, 1]} : vector<2x384xf32> to vector<2x128xf32>
    %235 = arith.addf %233, %234 : vector<2x128xf32>
    %236 = arith.negf %235 : vector<2x128xf32>
    %237 = math.exp %236 : vector<2x128xf32>
    %cst_76 = arith.constant 1.000000e+00 : f32
    %238 = vector.broadcast %cst_76 : f32 to vector<2x128xf32>
    %239 = arith.addf %238, %237 : vector<2x128xf32>
    %240 = arith.divf %238, %239 : vector<2x128xf32>
    %241 = vector.extract_strided_slice %227 {offsets = [0, 128], sizes = [2, 128], strides = [1, 1]} : vector<2x384xf32> to vector<2x128xf32>
    %242 = vector.extract_strided_slice %218 {offsets = [0, 128], sizes = [2, 128], strides = [1, 1]} : vector<2x384xf32> to vector<2x128xf32>
    %243 = arith.addf %241, %242 : vector<2x128xf32>
    %244 = arith.negf %243 : vector<2x128xf32>
    %245 = math.exp %244 : vector<2x128xf32>
    %cst_77 = arith.constant 1.000000e+00 : f32
    %246 = vector.broadcast %cst_77 : f32 to vector<2x128xf32>
    %247 = arith.addf %246, %245 : vector<2x128xf32>
    %248 = arith.divf %246, %247 : vector<2x128xf32>
    %249 = vector.extract_strided_slice %227 {offsets = [0, 256], sizes = [2, 128], strides = [1, 1]} : vector<2x384xf32> to vector<2x128xf32>
    %250 = vector.extract_strided_slice %218 {offsets = [0, 256], sizes = [2, 128], strides = [1, 1]} : vector<2x384xf32> to vector<2x128xf32>
    %251 = arith.mulf %240, %250 : vector<2x128xf32>
    %252 = arith.addf %249, %251 : vector<2x128xf32>
    %253 = math.tanh %252 : vector<2x128xf32>
    %cst_78 = arith.constant 1.000000e+00 : f32
    %254 = vector.broadcast %cst_78 : f32 to vector<2x128xf32>
    %255 = arith.subf %254, %248 : vector<2x128xf32>
    %256 = arith.mulf %255, %253 : vector<2x128xf32>
    %257 = arith.mulf %248, %187 : vector<2x128xf32>
    %258 = arith.addf %256, %257 : vector<2x128xf32>
    %259 = vector.extract_strided_slice %232 {offsets = [0, 0], sizes = [2, 128], strides = [1, 1]} : vector<2x384xf32> to vector<2x128xf32>
    %260 = vector.extract_strided_slice %223 {offsets = [0, 0], sizes = [2, 128], strides = [1, 1]} : vector<2x384xf32> to vector<2x128xf32>
    %261 = arith.addf %259, %260 : vector<2x128xf32>
    %262 = arith.negf %261 : vector<2x128xf32>
    %263 = math.exp %262 : vector<2x128xf32>
    %cst_79 = arith.constant 1.000000e+00 : f32
    %264 = vector.broadcast %cst_79 : f32 to vector<2x128xf32>
    %265 = arith.addf %264, %263 : vector<2x128xf32>
    %266 = arith.divf %264, %265 : vector<2x128xf32>
    %267 = vector.extract_strided_slice %232 {offsets = [0, 128], sizes = [2, 128], strides = [1, 1]} : vector<2x384xf32> to vector<2x128xf32>
    %268 = vector.extract_strided_slice %223 {offsets = [0, 128], sizes = [2, 128], strides = [1, 1]} : vector<2x384xf32> to vector<2x128xf32>
    %269 = arith.addf %267, %268 : vector<2x128xf32>
    %270 = arith.negf %269 : vector<2x128xf32>
    %271 = math.exp %270 : vector<2x128xf32>
    %cst_80 = arith.constant 1.000000e+00 : f32
    %272 = vector.broadcast %cst_80 : f32 to vector<2x128xf32>
    %273 = arith.addf %272, %271 : vector<2x128xf32>
    %274 = arith.divf %272, %273 : vector<2x128xf32>
    %275 = vector.extract_strided_slice %232 {offsets = [0, 256], sizes = [2, 128], strides = [1, 1]} : vector<2x384xf32> to vector<2x128xf32>
    %276 = vector.extract_strided_slice %223 {offsets = [0, 256], sizes = [2, 128], strides = [1, 1]} : vector<2x384xf32> to vector<2x128xf32>
    %277 = arith.mulf %266, %276 : vector<2x128xf32>
    %278 = arith.addf %275, %277 : vector<2x128xf32>
    %279 = math.tanh %278 : vector<2x128xf32>
    %cst_81 = arith.constant 1.000000e+00 : f32
    %280 = vector.broadcast %cst_81 : f32 to vector<2x128xf32>
    %281 = arith.subf %280, %274 : vector<2x128xf32>
    %282 = arith.mulf %281, %279 : vector<2x128xf32>
    %283 = arith.mulf %274, %213 : vector<2x128xf32>
    %284 = arith.addf %282, %283 : vector<2x128xf32>
    %c4_i32 = arith.constant 4 : i32
    %c0_82 = arith.constant 0 : index
    %c0_83 = arith.constant 0 : index
    %285 = vector.load %arg2[%c0_82, %c0_83] : memref<128x384xf32, #tpu.memory_space<vmem>>, vector<128x384xf32>
    %cst_84 = arith.constant dense<0.000000e+00> : vector<2x384xf32>
    %286 = tpu.matmul %258, %285, %cst_84 {dimension_numbers = #tpu.dot_dimension_numbers<[1], [0], [0], [1], [0, 0, 1, 1], [], []>} : vector<2x128xf32>, vector<128x384xf32>, vector<2x384xf32> -> vector<2x384xf32>
    %c0_85 = arith.constant 0 : index
    %c0_86 = arith.constant 0 : index
    %287 = vector.load %arg4[%c0_85, %c0_86] : memref<1x384xf32, #tpu.memory_space<vmem>>, vector<1x384xf32>
    %288 = vector.broadcast %287 : vector<1x384xf32> to vector<2x384xf32>
    %289 = arith.addf %286, %288 : vector<2x384xf32>
    %c0_87 = arith.constant 0 : index
    %c0_88 = arith.constant 0 : index
    %290 = vector.load %arg3[%c0_87, %c0_88] : memref<128x384xf32, #tpu.memory_space<vmem>>, vector<128x384xf32>
    %cst_89 = arith.constant dense<0.000000e+00> : vector<2x384xf32>
    %291 = tpu.matmul %284, %290, %cst_89 {dimension_numbers = #tpu.dot_dimension_numbers<[1], [0], [0], [1], [0, 0, 1, 1], [], []>} : vector<2x128xf32>, vector<128x384xf32>, vector<2x384xf32> -> vector<2x384xf32>
    %c0_90 = arith.constant 0 : index
    %c0_91 = arith.constant 0 : index
    %292 = vector.load %arg5[%c0_90, %c0_91] : memref<1x384xf32, #tpu.memory_space<vmem>>, vector<1x384xf32>
    %293 = vector.broadcast %292 : vector<1x384xf32> to vector<2x384xf32>
    %294 = arith.addf %291, %293 : vector<2x384xf32>
    %295 = arith.index_cast %c4_i32 : i32 to index
    %c0_92 = arith.constant 0 : index
    %c0_93 = arith.constant 0 : index
    %296 = vector.load %arg0[%295, %c0_92, %c0_93] : memref<8x2x768xf32, #tpu.memory_space<vmem>>, vector<1x2x768xf32>
    %297 = vector.shape_cast %296 : vector<1x2x768xf32> to vector<2x768xf32>
    %298 = vector.extract_strided_slice %297 {offsets = [0, 0], sizes = [2, 384], strides = [1, 1]} : vector<2x768xf32> to vector<2x384xf32>
    %c7_i32_94 = arith.constant 7 : i32
    %299 = arith.subi %c7_i32_94, %c4_i32 : i32
    %300 = arith.index_cast %299 : i32 to index
    %c0_95 = arith.constant 0 : index
    %c0_96 = arith.constant 0 : index
    %301 = vector.load %arg0[%300, %c0_95, %c0_96] : memref<8x2x768xf32, #tpu.memory_space<vmem>>, vector<1x2x768xf32>
    %302 = vector.shape_cast %301 : vector<1x2x768xf32> to vector<2x768xf32>
    %303 = vector.extract_strided_slice %302 {offsets = [0, 384], sizes = [2, 384], strides = [1, 1]} : vector<2x768xf32> to vector<2x384xf32>
    %304 = vector.extract_strided_slice %298 {offsets = [0, 0], sizes = [2, 128], strides = [1, 1]} : vector<2x384xf32> to vector<2x128xf32>
    %305 = vector.extract_strided_slice %289 {offsets = [0, 0], sizes = [2, 128], strides = [1, 1]} : vector<2x384xf32> to vector<2x128xf32>
    %306 = arith.addf %304, %305 : vector<2x128xf32>
    %307 = arith.negf %306 : vector<2x128xf32>
    %308 = math.exp %307 : vector<2x128xf32>
    %cst_97 = arith.constant 1.000000e+00 : f32
    %309 = vector.broadcast %cst_97 : f32 to vector<2x128xf32>
    %310 = arith.addf %309, %308 : vector<2x128xf32>
    %311 = arith.divf %309, %310 : vector<2x128xf32>
    %312 = vector.extract_strided_slice %298 {offsets = [0, 128], sizes = [2, 128], strides = [1, 1]} : vector<2x384xf32> to vector<2x128xf32>
    %313 = vector.extract_strided_slice %289 {offsets = [0, 128], sizes = [2, 128], strides = [1, 1]} : vector<2x384xf32> to vector<2x128xf32>
    %314 = arith.addf %312, %313 : vector<2x128xf32>
    %315 = arith.negf %314 : vector<2x128xf32>
    %316 = math.exp %315 : vector<2x128xf32>
    %cst_98 = arith.constant 1.000000e+00 : f32
    %317 = vector.broadcast %cst_98 : f32 to vector<2x128xf32>
    %318 = arith.addf %317, %316 : vector<2x128xf32>
    %319 = arith.divf %317, %318 : vector<2x128xf32>
    %320 = vector.extract_strided_slice %298 {offsets = [0, 256], sizes = [2, 128], strides = [1, 1]} : vector<2x384xf32> to vector<2x128xf32>
    %321 = vector.extract_strided_slice %289 {offsets = [0, 256], sizes = [2, 128], strides = [1, 1]} : vector<2x384xf32> to vector<2x128xf32>
    %322 = arith.mulf %311, %321 : vector<2x128xf32>
    %323 = arith.addf %320, %322 : vector<2x128xf32>
    %324 = math.tanh %323 : vector<2x128xf32>
    %cst_99 = arith.constant 1.000000e+00 : f32
    %325 = vector.broadcast %cst_99 : f32 to vector<2x128xf32>
    %326 = arith.subf %325, %319 : vector<2x128xf32>
    %327 = arith.mulf %326, %324 : vector<2x128xf32>
    %328 = arith.mulf %319, %258 : vector<2x128xf32>
    %329 = arith.addf %327, %328 : vector<2x128xf32>
    %330 = vector.extract_strided_slice %303 {offsets = [0, 0], sizes = [2, 128], strides = [1, 1]} : vector<2x384xf32> to vector<2x128xf32>
    %331 = vector.extract_strided_slice %294 {offsets = [0, 0], sizes = [2, 128], strides = [1, 1]} : vector<2x384xf32> to vector<2x128xf32>
    %332 = arith.addf %330, %331 : vector<2x128xf32>
    %333 = arith.negf %332 : vector<2x128xf32>
    %334 = math.exp %333 : vector<2x128xf32>
    %cst_100 = arith.constant 1.000000e+00 : f32
    %335 = vector.broadcast %cst_100 : f32 to vector<2x128xf32>
    %336 = arith.addf %335, %334 : vector<2x128xf32>
    %337 = arith.divf %335, %336 : vector<2x128xf32>
    %338 = vector.extract_strided_slice %303 {offsets = [0, 128], sizes = [2, 128], strides = [1, 1]} : vector<2x384xf32> to vector<2x128xf32>
    %339 = vector.extract_strided_slice %294 {offsets = [0, 128], sizes = [2, 128], strides = [1, 1]} : vector<2x384xf32> to vector<2x128xf32>
    %340 = arith.addf %338, %339 : vector<2x128xf32>
    %341 = arith.negf %340 : vector<2x128xf32>
    %342 = math.exp %341 : vector<2x128xf32>
    %cst_101 = arith.constant 1.000000e+00 : f32
    %343 = vector.broadcast %cst_101 : f32 to vector<2x128xf32>
    %344 = arith.addf %343, %342 : vector<2x128xf32>
    %345 = arith.divf %343, %344 : vector<2x128xf32>
    %346 = vector.extract_strided_slice %303 {offsets = [0, 256], sizes = [2, 128], strides = [1, 1]} : vector<2x384xf32> to vector<2x128xf32>
    %347 = vector.extract_strided_slice %294 {offsets = [0, 256], sizes = [2, 128], strides = [1, 1]} : vector<2x384xf32> to vector<2x128xf32>
    %348 = arith.mulf %337, %347 : vector<2x128xf32>
    %349 = arith.addf %346, %348 : vector<2x128xf32>
    %350 = math.tanh %349 : vector<2x128xf32>
    %cst_102 = arith.constant 1.000000e+00 : f32
    %351 = vector.broadcast %cst_102 : f32 to vector<2x128xf32>
    %352 = arith.subf %351, %345 : vector<2x128xf32>
    %353 = arith.mulf %352, %350 : vector<2x128xf32>
    %354 = arith.mulf %345, %284 : vector<2x128xf32>
    %355 = arith.addf %353, %354 : vector<2x128xf32>
    %c5_i32 = arith.constant 5 : i32
    %c0_103 = arith.constant 0 : index
    %c0_104 = arith.constant 0 : index
    %356 = vector.load %arg2[%c0_103, %c0_104] : memref<128x384xf32, #tpu.memory_space<vmem>>, vector<128x384xf32>
    %cst_105 = arith.constant dense<0.000000e+00> : vector<2x384xf32>
    %357 = tpu.matmul %329, %356, %cst_105 {dimension_numbers = #tpu.dot_dimension_numbers<[1], [0], [0], [1], [0, 0, 1, 1], [], []>} : vector<2x128xf32>, vector<128x384xf32>, vector<2x384xf32> -> vector<2x384xf32>
    %c0_106 = arith.constant 0 : index
    %c0_107 = arith.constant 0 : index
    %358 = vector.load %arg4[%c0_106, %c0_107] : memref<1x384xf32, #tpu.memory_space<vmem>>, vector<1x384xf32>
    %359 = vector.broadcast %358 : vector<1x384xf32> to vector<2x384xf32>
    %360 = arith.addf %357, %359 : vector<2x384xf32>
    %c0_108 = arith.constant 0 : index
    %c0_109 = arith.constant 0 : index
    %361 = vector.load %arg3[%c0_108, %c0_109] : memref<128x384xf32, #tpu.memory_space<vmem>>, vector<128x384xf32>
    %cst_110 = arith.constant dense<0.000000e+00> : vector<2x384xf32>
    %362 = tpu.matmul %355, %361, %cst_110 {dimension_numbers = #tpu.dot_dimension_numbers<[1], [0], [0], [1], [0, 0, 1, 1], [], []>} : vector<2x128xf32>, vector<128x384xf32>, vector<2x384xf32> -> vector<2x384xf32>
    %c0_111 = arith.constant 0 : index
    %c0_112 = arith.constant 0 : index
    %363 = vector.load %arg5[%c0_111, %c0_112] : memref<1x384xf32, #tpu.memory_space<vmem>>, vector<1x384xf32>
    %364 = vector.broadcast %363 : vector<1x384xf32> to vector<2x384xf32>
    %365 = arith.addf %362, %364 : vector<2x384xf32>
    %366 = arith.index_cast %c5_i32 : i32 to index
    %c0_113 = arith.constant 0 : index
    %c0_114 = arith.constant 0 : index
    %367 = vector.load %arg0[%366, %c0_113, %c0_114] : memref<8x2x768xf32, #tpu.memory_space<vmem>>, vector<1x2x768xf32>
    %368 = vector.shape_cast %367 : vector<1x2x768xf32> to vector<2x768xf32>
    %369 = vector.extract_strided_slice %368 {offsets = [0, 0], sizes = [2, 384], strides = [1, 1]} : vector<2x768xf32> to vector<2x384xf32>
    %c7_i32_115 = arith.constant 7 : i32
    %370 = arith.subi %c7_i32_115, %c5_i32 : i32
    %371 = arith.index_cast %370 : i32 to index
    %c0_116 = arith.constant 0 : index
    %c0_117 = arith.constant 0 : index
    %372 = vector.load %arg0[%371, %c0_116, %c0_117] : memref<8x2x768xf32, #tpu.memory_space<vmem>>, vector<1x2x768xf32>
    %373 = vector.shape_cast %372 : vector<1x2x768xf32> to vector<2x768xf32>
    %374 = vector.extract_strided_slice %373 {offsets = [0, 384], sizes = [2, 384], strides = [1, 1]} : vector<2x768xf32> to vector<2x384xf32>
    %375 = vector.extract_strided_slice %369 {offsets = [0, 0], sizes = [2, 128], strides = [1, 1]} : vector<2x384xf32> to vector<2x128xf32>
    %376 = vector.extract_strided_slice %360 {offsets = [0, 0], sizes = [2, 128], strides = [1, 1]} : vector<2x384xf32> to vector<2x128xf32>
    %377 = arith.addf %375, %376 : vector<2x128xf32>
    %378 = arith.negf %377 : vector<2x128xf32>
    %379 = math.exp %378 : vector<2x128xf32>
    %cst_118 = arith.constant 1.000000e+00 : f32
    %380 = vector.broadcast %cst_118 : f32 to vector<2x128xf32>
    %381 = arith.addf %380, %379 : vector<2x128xf32>
    %382 = arith.divf %380, %381 : vector<2x128xf32>
    %383 = vector.extract_strided_slice %369 {offsets = [0, 128], sizes = [2, 128], strides = [1, 1]} : vector<2x384xf32> to vector<2x128xf32>
    %384 = vector.extract_strided_slice %360 {offsets = [0, 128], sizes = [2, 128], strides = [1, 1]} : vector<2x384xf32> to vector<2x128xf32>
    %385 = arith.addf %383, %384 : vector<2x128xf32>
    %386 = arith.negf %385 : vector<2x128xf32>
    %387 = math.exp %386 : vector<2x128xf32>
    %cst_119 = arith.constant 1.000000e+00 : f32
    %388 = vector.broadcast %cst_119 : f32 to vector<2x128xf32>
    %389 = arith.addf %388, %387 : vector<2x128xf32>
    %390 = arith.divf %388, %389 : vector<2x128xf32>
    %391 = vector.extract_strided_slice %369 {offsets = [0, 256], sizes = [2, 128], strides = [1, 1]} : vector<2x384xf32> to vector<2x128xf32>
    %392 = vector.extract_strided_slice %360 {offsets = [0, 256], sizes = [2, 128], strides = [1, 1]} : vector<2x384xf32> to vector<2x128xf32>
    %393 = arith.mulf %382, %392 : vector<2x128xf32>
    %394 = arith.addf %391, %393 : vector<2x128xf32>
    %395 = math.tanh %394 : vector<2x128xf32>
    %cst_120 = arith.constant 1.000000e+00 : f32
    %396 = vector.broadcast %cst_120 : f32 to vector<2x128xf32>
    %397 = arith.subf %396, %390 : vector<2x128xf32>
    %398 = arith.mulf %397, %395 : vector<2x128xf32>
    %399 = arith.mulf %390, %329 : vector<2x128xf32>
    %400 = arith.addf %398, %399 : vector<2x128xf32>
    %401 = vector.extract_strided_slice %374 {offsets = [0, 0], sizes = [2, 128], strides = [1, 1]} : vector<2x384xf32> to vector<2x128xf32>
    %402 = vector.extract_strided_slice %365 {offsets = [0, 0], sizes = [2, 128], strides = [1, 1]} : vector<2x384xf32> to vector<2x128xf32>
    %403 = arith.addf %401, %402 : vector<2x128xf32>
    %404 = arith.negf %403 : vector<2x128xf32>
    %405 = math.exp %404 : vector<2x128xf32>
    %cst_121 = arith.constant 1.000000e+00 : f32
    %406 = vector.broadcast %cst_121 : f32 to vector<2x128xf32>
    %407 = arith.addf %406, %405 : vector<2x128xf32>
    %408 = arith.divf %406, %407 : vector<2x128xf32>
    %409 = vector.extract_strided_slice %374 {offsets = [0, 128], sizes = [2, 128], strides = [1, 1]} : vector<2x384xf32> to vector<2x128xf32>
    %410 = vector.extract_strided_slice %365 {offsets = [0, 128], sizes = [2, 128], strides = [1, 1]} : vector<2x384xf32> to vector<2x128xf32>
    %411 = arith.addf %409, %410 : vector<2x128xf32>
    %412 = arith.negf %411 : vector<2x128xf32>
    %413 = math.exp %412 : vector<2x128xf32>
    %cst_122 = arith.constant 1.000000e+00 : f32
    %414 = vector.broadcast %cst_122 : f32 to vector<2x128xf32>
    %415 = arith.addf %414, %413 : vector<2x128xf32>
    %416 = arith.divf %414, %415 : vector<2x128xf32>
    %417 = vector.extract_strided_slice %374 {offsets = [0, 256], sizes = [2, 128], strides = [1, 1]} : vector<2x384xf32> to vector<2x128xf32>
    %418 = vector.extract_strided_slice %365 {offsets = [0, 256], sizes = [2, 128], strides = [1, 1]} : vector<2x384xf32> to vector<2x128xf32>
    %419 = arith.mulf %408, %418 : vector<2x128xf32>
    %420 = arith.addf %417, %419 : vector<2x128xf32>
    %421 = math.tanh %420 : vector<2x128xf32>
    %cst_123 = arith.constant 1.000000e+00 : f32
    %422 = vector.broadcast %cst_123 : f32 to vector<2x128xf32>
    %423 = arith.subf %422, %416 : vector<2x128xf32>
    %424 = arith.mulf %423, %421 : vector<2x128xf32>
    %425 = arith.mulf %416, %355 : vector<2x128xf32>
    %426 = arith.addf %424, %425 : vector<2x128xf32>
    %c6_i32 = arith.constant 6 : i32
    %c0_124 = arith.constant 0 : index
    %c0_125 = arith.constant 0 : index
    %427 = vector.load %arg2[%c0_124, %c0_125] : memref<128x384xf32, #tpu.memory_space<vmem>>, vector<128x384xf32>
    %cst_126 = arith.constant dense<0.000000e+00> : vector<2x384xf32>
    %428 = tpu.matmul %400, %427, %cst_126 {dimension_numbers = #tpu.dot_dimension_numbers<[1], [0], [0], [1], [0, 0, 1, 1], [], []>} : vector<2x128xf32>, vector<128x384xf32>, vector<2x384xf32> -> vector<2x384xf32>
    %c0_127 = arith.constant 0 : index
    %c0_128 = arith.constant 0 : index
    %429 = vector.load %arg4[%c0_127, %c0_128] : memref<1x384xf32, #tpu.memory_space<vmem>>, vector<1x384xf32>
    %430 = vector.broadcast %429 : vector<1x384xf32> to vector<2x384xf32>
    %431 = arith.addf %428, %430 : vector<2x384xf32>
    %c0_129 = arith.constant 0 : index
    %c0_130 = arith.constant 0 : index
    %432 = vector.load %arg3[%c0_129, %c0_130] : memref<128x384xf32, #tpu.memory_space<vmem>>, vector<128x384xf32>
    %cst_131 = arith.constant dense<0.000000e+00> : vector<2x384xf32>
    %433 = tpu.matmul %426, %432, %cst_131 {dimension_numbers = #tpu.dot_dimension_numbers<[1], [0], [0], [1], [0, 0, 1, 1], [], []>} : vector<2x128xf32>, vector<128x384xf32>, vector<2x384xf32> -> vector<2x384xf32>
    %c0_132 = arith.constant 0 : index
    %c0_133 = arith.constant 0 : index
    %434 = vector.load %arg5[%c0_132, %c0_133] : memref<1x384xf32, #tpu.memory_space<vmem>>, vector<1x384xf32>
    %435 = vector.broadcast %434 : vector<1x384xf32> to vector<2x384xf32>
    %436 = arith.addf %433, %435 : vector<2x384xf32>
    %437 = arith.index_cast %c6_i32 : i32 to index
    %c0_134 = arith.constant 0 : index
    %c0_135 = arith.constant 0 : index
    %438 = vector.load %arg0[%437, %c0_134, %c0_135] : memref<8x2x768xf32, #tpu.memory_space<vmem>>, vector<1x2x768xf32>
    %439 = vector.shape_cast %438 : vector<1x2x768xf32> to vector<2x768xf32>
    %440 = vector.extract_strided_slice %439 {offsets = [0, 0], sizes = [2, 384], strides = [1, 1]} : vector<2x768xf32> to vector<2x384xf32>
    %c7_i32_136 = arith.constant 7 : i32
    %441 = arith.subi %c7_i32_136, %c6_i32 : i32
    %442 = arith.index_cast %441 : i32 to index
    %c0_137 = arith.constant 0 : index
    %c0_138 = arith.constant 0 : index
    %443 = vector.load %arg0[%442, %c0_137, %c0_138] : memref<8x2x768xf32, #tpu.memory_space<vmem>>, vector<1x2x768xf32>
    %444 = vector.shape_cast %443 : vector<1x2x768xf32> to vector<2x768xf32>
    %445 = vector.extract_strided_slice %444 {offsets = [0, 384], sizes = [2, 384], strides = [1, 1]} : vector<2x768xf32> to vector<2x384xf32>
    %446 = vector.extract_strided_slice %440 {offsets = [0, 0], sizes = [2, 128], strides = [1, 1]} : vector<2x384xf32> to vector<2x128xf32>
    %447 = vector.extract_strided_slice %431 {offsets = [0, 0], sizes = [2, 128], strides = [1, 1]} : vector<2x384xf32> to vector<2x128xf32>
    %448 = arith.addf %446, %447 : vector<2x128xf32>
    %449 = arith.negf %448 : vector<2x128xf32>
    %450 = math.exp %449 : vector<2x128xf32>
    %cst_139 = arith.constant 1.000000e+00 : f32
    %451 = vector.broadcast %cst_139 : f32 to vector<2x128xf32>
    %452 = arith.addf %451, %450 : vector<2x128xf32>
    %453 = arith.divf %451, %452 : vector<2x128xf32>
    %454 = vector.extract_strided_slice %440 {offsets = [0, 128], sizes = [2, 128], strides = [1, 1]} : vector<2x384xf32> to vector<2x128xf32>
    %455 = vector.extract_strided_slice %431 {offsets = [0, 128], sizes = [2, 128], strides = [1, 1]} : vector<2x384xf32> to vector<2x128xf32>
    %456 = arith.addf %454, %455 : vector<2x128xf32>
    %457 = arith.negf %456 : vector<2x128xf32>
    %458 = math.exp %457 : vector<2x128xf32>
    %cst_140 = arith.constant 1.000000e+00 : f32
    %459 = vector.broadcast %cst_140 : f32 to vector<2x128xf32>
    %460 = arith.addf %459, %458 : vector<2x128xf32>
    %461 = arith.divf %459, %460 : vector<2x128xf32>
    %462 = vector.extract_strided_slice %440 {offsets = [0, 256], sizes = [2, 128], strides = [1, 1]} : vector<2x384xf32> to vector<2x128xf32>
    %463 = vector.extract_strided_slice %431 {offsets = [0, 256], sizes = [2, 128], strides = [1, 1]} : vector<2x384xf32> to vector<2x128xf32>
    %464 = arith.mulf %453, %463 : vector<2x128xf32>
    %465 = arith.addf %462, %464 : vector<2x128xf32>
    %466 = math.tanh %465 : vector<2x128xf32>
    %cst_141 = arith.constant 1.000000e+00 : f32
    %467 = vector.broadcast %cst_141 : f32 to vector<2x128xf32>
    %468 = arith.subf %467, %461 : vector<2x128xf32>
    %469 = arith.mulf %468, %466 : vector<2x128xf32>
    %470 = arith.mulf %461, %400 : vector<2x128xf32>
    %471 = arith.addf %469, %470 : vector<2x128xf32>
    %472 = vector.extract_strided_slice %445 {offsets = [0, 0], sizes = [2, 128], strides = [1, 1]} : vector<2x384xf32> to vector<2x128xf32>
    %473 = vector.extract_strided_slice %436 {offsets = [0, 0], sizes = [2, 128], strides = [1, 1]} : vector<2x384xf32> to vector<2x128xf32>
    %474 = arith.addf %472, %473 : vector<2x128xf32>
    %475 = arith.negf %474 : vector<2x128xf32>
    %476 = math.exp %475 : vector<2x128xf32>
    %cst_142 = arith.constant 1.000000e+00 : f32
    %477 = vector.broadcast %cst_142 : f32 to vector<2x128xf32>
    %478 = arith.addf %477, %476 : vector<2x128xf32>
    %479 = arith.divf %477, %478 : vector<2x128xf32>
    %480 = vector.extract_strided_slice %445 {offsets = [0, 128], sizes = [2, 128], strides = [1, 1]} : vector<2x384xf32> to vector<2x128xf32>
    %481 = vector.extract_strided_slice %436 {offsets = [0, 128], sizes = [2, 128], strides = [1, 1]} : vector<2x384xf32> to vector<2x128xf32>
    %482 = arith.addf %480, %481 : vector<2x128xf32>
    %483 = arith.negf %482 : vector<2x128xf32>
    %484 = math.exp %483 : vector<2x128xf32>
    %cst_143 = arith.constant 1.000000e+00 : f32
    %485 = vector.broadcast %cst_143 : f32 to vector<2x128xf32>
    %486 = arith.addf %485, %484 : vector<2x128xf32>
    %487 = arith.divf %485, %486 : vector<2x128xf32>
    %488 = vector.extract_strided_slice %445 {offsets = [0, 256], sizes = [2, 128], strides = [1, 1]} : vector<2x384xf32> to vector<2x128xf32>
    %489 = vector.extract_strided_slice %436 {offsets = [0, 256], sizes = [2, 128], strides = [1, 1]} : vector<2x384xf32> to vector<2x128xf32>
    %490 = arith.mulf %479, %489 : vector<2x128xf32>
    %491 = arith.addf %488, %490 : vector<2x128xf32>
    %492 = math.tanh %491 : vector<2x128xf32>
    %cst_144 = arith.constant 1.000000e+00 : f32
    %493 = vector.broadcast %cst_144 : f32 to vector<2x128xf32>
    %494 = arith.subf %493, %487 : vector<2x128xf32>
    %495 = arith.mulf %494, %492 : vector<2x128xf32>
    %496 = arith.mulf %487, %426 : vector<2x128xf32>
    %497 = arith.addf %495, %496 : vector<2x128xf32>
    %c7_i32_145 = arith.constant 7 : i32
    %c0_146 = arith.constant 0 : index
    %c0_147 = arith.constant 0 : index
    %498 = vector.load %arg2[%c0_146, %c0_147] : memref<128x384xf32, #tpu.memory_space<vmem>>, vector<128x384xf32>
    %cst_148 = arith.constant dense<0.000000e+00> : vector<2x384xf32>
    %499 = tpu.matmul %471, %498, %cst_148 {dimension_numbers = #tpu.dot_dimension_numbers<[1], [0], [0], [1], [0, 0, 1, 1], [], []>} : vector<2x128xf32>, vector<128x384xf32>, vector<2x384xf32> -> vector<2x384xf32>
    %c0_149 = arith.constant 0 : index
    %c0_150 = arith.constant 0 : index
    %500 = vector.load %arg4[%c0_149, %c0_150] : memref<1x384xf32, #tpu.memory_space<vmem>>, vector<1x384xf32>
    %501 = vector.broadcast %500 : vector<1x384xf32> to vector<2x384xf32>
    %502 = arith.addf %499, %501 : vector<2x384xf32>
    %c0_151 = arith.constant 0 : index
    %c0_152 = arith.constant 0 : index
    %503 = vector.load %arg3[%c0_151, %c0_152] : memref<128x384xf32, #tpu.memory_space<vmem>>, vector<128x384xf32>
    %cst_153 = arith.constant dense<0.000000e+00> : vector<2x384xf32>
    %504 = tpu.matmul %497, %503, %cst_153 {dimension_numbers = #tpu.dot_dimension_numbers<[1], [0], [0], [1], [0, 0, 1, 1], [], []>} : vector<2x128xf32>, vector<128x384xf32>, vector<2x384xf32> -> vector<2x384xf32>
    %c0_154 = arith.constant 0 : index
    %c0_155 = arith.constant 0 : index
    %505 = vector.load %arg5[%c0_154, %c0_155] : memref<1x384xf32, #tpu.memory_space<vmem>>, vector<1x384xf32>
    %506 = vector.broadcast %505 : vector<1x384xf32> to vector<2x384xf32>
    %507 = arith.addf %504, %506 : vector<2x384xf32>
    %508 = arith.index_cast %c7_i32_145 : i32 to index
    %c0_156 = arith.constant 0 : index
    %c0_157 = arith.constant 0 : index
    %509 = vector.load %arg0[%508, %c0_156, %c0_157] : memref<8x2x768xf32, #tpu.memory_space<vmem>>, vector<1x2x768xf32>
    %510 = vector.shape_cast %509 : vector<1x2x768xf32> to vector<2x768xf32>
    %511 = vector.extract_strided_slice %510 {offsets = [0, 0], sizes = [2, 384], strides = [1, 1]} : vector<2x768xf32> to vector<2x384xf32>
    %c7_i32_158 = arith.constant 7 : i32
    %512 = arith.subi %c7_i32_158, %c7_i32_145 : i32
    %513 = arith.index_cast %512 : i32 to index
    %c0_159 = arith.constant 0 : index
    %c0_160 = arith.constant 0 : index
    %514 = vector.load %arg0[%513, %c0_159, %c0_160] : memref<8x2x768xf32, #tpu.memory_space<vmem>>, vector<1x2x768xf32>
    %515 = vector.shape_cast %514 : vector<1x2x768xf32> to vector<2x768xf32>
    %516 = vector.extract_strided_slice %515 {offsets = [0, 384], sizes = [2, 384], strides = [1, 1]} : vector<2x768xf32> to vector<2x384xf32>
    %517 = vector.extract_strided_slice %511 {offsets = [0, 0], sizes = [2, 128], strides = [1, 1]} : vector<2x384xf32> to vector<2x128xf32>
    %518 = vector.extract_strided_slice %502 {offsets = [0, 0], sizes = [2, 128], strides = [1, 1]} : vector<2x384xf32> to vector<2x128xf32>
    %519 = arith.addf %517, %518 : vector<2x128xf32>
    %520 = arith.negf %519 : vector<2x128xf32>
    %521 = math.exp %520 : vector<2x128xf32>
    %cst_161 = arith.constant 1.000000e+00 : f32
    %522 = vector.broadcast %cst_161 : f32 to vector<2x128xf32>
    %523 = arith.addf %522, %521 : vector<2x128xf32>
    %524 = arith.divf %522, %523 : vector<2x128xf32>
    %525 = vector.extract_strided_slice %511 {offsets = [0, 128], sizes = [2, 128], strides = [1, 1]} : vector<2x384xf32> to vector<2x128xf32>
    %526 = vector.extract_strided_slice %502 {offsets = [0, 128], sizes = [2, 128], strides = [1, 1]} : vector<2x384xf32> to vector<2x128xf32>
    %527 = arith.addf %525, %526 : vector<2x128xf32>
    %528 = arith.negf %527 : vector<2x128xf32>
    %529 = math.exp %528 : vector<2x128xf32>
    %cst_162 = arith.constant 1.000000e+00 : f32
    %530 = vector.broadcast %cst_162 : f32 to vector<2x128xf32>
    %531 = arith.addf %530, %529 : vector<2x128xf32>
    %532 = arith.divf %530, %531 : vector<2x128xf32>
    %533 = vector.extract_strided_slice %511 {offsets = [0, 256], sizes = [2, 128], strides = [1, 1]} : vector<2x384xf32> to vector<2x128xf32>
    %534 = vector.extract_strided_slice %502 {offsets = [0, 256], sizes = [2, 128], strides = [1, 1]} : vector<2x384xf32> to vector<2x128xf32>
    %535 = arith.mulf %524, %534 : vector<2x128xf32>
    %536 = arith.addf %533, %535 : vector<2x128xf32>
    %537 = math.tanh %536 : vector<2x128xf32>
    %cst_163 = arith.constant 1.000000e+00 : f32
    %538 = vector.broadcast %cst_163 : f32 to vector<2x128xf32>
    %539 = arith.subf %538, %532 : vector<2x128xf32>
    %540 = arith.mulf %539, %537 : vector<2x128xf32>
    %541 = arith.mulf %532, %471 : vector<2x128xf32>
    %542 = arith.addf %540, %541 : vector<2x128xf32>
    %543 = vector.extract_strided_slice %516 {offsets = [0, 0], sizes = [2, 128], strides = [1, 1]} : vector<2x384xf32> to vector<2x128xf32>
    %544 = vector.extract_strided_slice %507 {offsets = [0, 0], sizes = [2, 128], strides = [1, 1]} : vector<2x384xf32> to vector<2x128xf32>
    %545 = arith.addf %543, %544 : vector<2x128xf32>
    %546 = arith.negf %545 : vector<2x128xf32>
    %547 = math.exp %546 : vector<2x128xf32>
    %cst_164 = arith.constant 1.000000e+00 : f32
    %548 = vector.broadcast %cst_164 : f32 to vector<2x128xf32>
    %549 = arith.addf %548, %547 : vector<2x128xf32>
    %550 = arith.divf %548, %549 : vector<2x128xf32>
    %551 = vector.extract_strided_slice %516 {offsets = [0, 128], sizes = [2, 128], strides = [1, 1]} : vector<2x384xf32> to vector<2x128xf32>
    %552 = vector.extract_strided_slice %507 {offsets = [0, 128], sizes = [2, 128], strides = [1, 1]} : vector<2x384xf32> to vector<2x128xf32>
    %553 = arith.addf %551, %552 : vector<2x128xf32>
    %554 = arith.negf %553 : vector<2x128xf32>
    %555 = math.exp %554 : vector<2x128xf32>
    %cst_165 = arith.constant 1.000000e+00 : f32
    %556 = vector.broadcast %cst_165 : f32 to vector<2x128xf32>
    %557 = arith.addf %556, %555 : vector<2x128xf32>
    %558 = arith.divf %556, %557 : vector<2x128xf32>
    %559 = vector.extract_strided_slice %516 {offsets = [0, 256], sizes = [2, 128], strides = [1, 1]} : vector<2x384xf32> to vector<2x128xf32>
    %560 = vector.extract_strided_slice %507 {offsets = [0, 256], sizes = [2, 128], strides = [1, 1]} : vector<2x384xf32> to vector<2x128xf32>
    %561 = arith.mulf %550, %560 : vector<2x128xf32>
    %562 = arith.addf %559, %561 : vector<2x128xf32>
    %563 = math.tanh %562 : vector<2x128xf32>
    %cst_166 = arith.constant 1.000000e+00 : f32
    %564 = vector.broadcast %cst_166 : f32 to vector<2x128xf32>
    %565 = arith.subf %564, %558 : vector<2x128xf32>
    %566 = arith.mulf %565, %563 : vector<2x128xf32>
    %567 = arith.mulf %558, %497 : vector<2x128xf32>
    %568 = arith.addf %566, %567 : vector<2x128xf32>
    %c8_i32 = arith.constant 8 : i32
    %569 = tpu.concatenate %542, %568 in 1 : vector<2x128xf32>, vector<2x128xf32> -> vector<2x256xf32>
    %c0_167 = arith.constant 0 : index
    %c0_168 = arith.constant 0 : index
    %c0_169 = arith.constant 0 : index
    %570 = vector.load %arg1[%c0_167, %c0_168, %c0_169] : memref<2x8x256xf32, #tpu.memory_space<vmem>>, vector<2x8x256xf32>
    %571 = vector.shape_cast %570 : vector<2x8x256xf32> to vector<16x256xf32>
    %c0_170 = arith.constant 0 : index
    %c0_171 = arith.constant 0 : index
    %572 = vector.load %arg6[%c0_170, %c0_171] : memref<256x128xf32, #tpu.memory_space<vmem>>, vector<256x128xf32>
    %cst_172 = arith.constant dense<0.000000e+00> : vector<16x128xf32>
    %573 = tpu.matmul %571, %572, %cst_172 {dimension_numbers = #tpu.dot_dimension_numbers<[1], [0], [0], [1], [0, 0, 1, 1], [], []>} : vector<16x256xf32>, vector<256x128xf32>, vector<16x128xf32> -> vector<16x128xf32>
    %574 = vector.shape_cast %573 : vector<16x128xf32> to vector<2x8x128xf32>
    %c0_173 = arith.constant 0 : index
    %c0_174 = arith.constant 0 : index
    %575 = vector.load %arg7[%c0_173, %c0_174] : memref<256x128xf32, #tpu.memory_space<vmem>>, vector<256x128xf32>
    %cst_175 = arith.constant dense<0.000000e+00> : vector<2x128xf32>
    %576 = tpu.matmul %569, %575, %cst_175 {dimension_numbers = #tpu.dot_dimension_numbers<[1], [0], [0], [1], [0, 0, 1, 1], [], []>} : vector<2x256xf32>, vector<256x128xf32>, vector<2x128xf32> -> vector<2x128xf32>
    %577 = vector.shape_cast %576 : vector<2x128xf32> to vector<2x1x128xf32>
    %578 = vector.broadcast %577 : vector<2x1x128xf32> to vector<2x8x128xf32>
    %579 = arith.addf %574, %578 : vector<2x8x128xf32>
    %c0_176 = arith.constant 0 : index
    %c0_177 = arith.constant 0 : index
    %580 = vector.load %arg8[%c0_176, %c0_177] : memref<1x128xf32, #tpu.memory_space<vmem>>, vector<1x128xf32>
    %581 = vector.shape_cast %580 : vector<1x128xf32> to vector<1x1x128xf32>
    %582 = vector.broadcast %581 : vector<1x1x128xf32> to vector<2x8x128xf32>
    %583 = arith.addf %579, %582 : vector<2x8x128xf32>
    %cst_178 = arith.constant 0.000000e+00 : f32
    %584 = vector.broadcast %cst_178 : f32 to vector<2x8x128xf32>
    %585 = arith.maximumf %583, %584 : vector<2x8x128xf32>
    %c0_179 = arith.constant 0 : index
    %c0_180 = arith.constant 0 : index
    %586 = vector.load %arg9[%c0_179, %c0_180] : memref<1x128xf32, #tpu.memory_space<vmem>>, vector<1x128xf32>
    %587 = vector.shape_cast %586 : vector<1x128xf32> to vector<1x1x128xf32>
    %588 = vector.broadcast %587 : vector<1x1x128xf32> to vector<2x8x128xf32>
    %589 = arith.mulf %585, %588 : vector<2x8x128xf32>
    %cst_181 = arith.constant dense<0.000000e+00> : vector<2x8xf32>
    %590 = vector.multi_reduction <add>, %589, %cst_181 [2] : vector<2x8x128xf32> to vector<2x8xf32>
    %c0_182 = arith.constant 0 : index
    %c0_183 = arith.constant 0 : index
    %591 = vector.load %arg10[%c0_182, %c0_183] : memref<1x1xf32, #tpu.memory_space<vmem>>, vector<1x1xf32>
    %592 = vector.broadcast %591 : vector<1x1xf32> to vector<2x8xf32>
    %593 = arith.addf %590, %592 : vector<2x8xf32>
    %cst_184 = arith.constant dense<0xFF800000> : vector<2xf32>
    %594 = vector.multi_reduction <maximumf>, %593, %cst_184 [1] : vector<2x8xf32> to vector<2xf32>
    %595 = vector.shape_cast %594 : vector<2xf32> to vector<2x1xf32>
    %596 = vector.broadcast %595 : vector<2x1xf32> to vector<2x8xf32>
    %597 = arith.subf %593, %596 : vector<2x8xf32>
    %598 = math.exp %597 : vector<2x8xf32>
    %cst_185 = arith.constant dense<0.000000e+00> : vector<2xf32>
    %599 = vector.multi_reduction <add>, %598, %cst_185 [1] : vector<2x8xf32> to vector<2xf32>
    %600 = vector.shape_cast %599 : vector<2xf32> to vector<2x1xf32>
    %601 = tpu.reciprocal %600 {approx = true} : vector<2x1xf32> -> vector<2x1xf32>
    %602 = vector.broadcast %601 : vector<2x1xf32> to vector<2x8xf32>
    %603 = arith.mulf %598, %602 : vector<2x8xf32>
    %604 = vector.shape_cast %603 : vector<2x8xf32> to vector<2x8x1xf32>
    %605 = vector.broadcast %604 : vector<2x8x1xf32> to vector<2x8x256xf32>
    %606 = arith.mulf %605, %570 : vector<2x8x256xf32>
    %cst_186 = arith.constant dense<0.000000e+00> : vector<2x256xf32>
    %607 = vector.multi_reduction <add>, %606, %cst_186 [1] : vector<2x8x256xf32> to vector<2x256xf32>
    %c0_187 = arith.constant 0 : index
    %c0_188 = arith.constant 0 : index
    %608 = vector.load %arg11[%c0_187, %c0_188] : memref<256x128xf32, #tpu.memory_space<vmem>>, vector<256x128xf32>
    %cst_189 = arith.constant dense<0.000000e+00> : vector<2x128xf32>
    %609 = tpu.matmul %569, %608, %cst_189 {dimension_numbers = #tpu.dot_dimension_numbers<[1], [0], [0], [1], [0, 0, 1, 1], [], []>} : vector<2x256xf32>, vector<256x128xf32>, vector<2x128xf32> -> vector<2x128xf32>
    %c0_190 = arith.constant 0 : index
    %c0_191 = arith.constant 0 : index
    %610 = vector.load %arg12[%c0_190, %c0_191] : memref<1x128xf32, #tpu.memory_space<vmem>>, vector<1x128xf32>
    %611 = vector.broadcast %610 : vector<1x128xf32> to vector<2x128xf32>
    %612 = arith.addf %609, %611 : vector<2x128xf32>
    %cst_192 = arith.constant 0.000000e+00 : f32
    %613 = vector.broadcast %cst_192 : f32 to vector<2x128xf32>
    %614 = arith.maximumf %612, %613 : vector<2x128xf32>
    %c0_193 = arith.constant 0 : index
    %c0_194 = arith.constant 0 : index
    %615 = vector.load %arg13[%c0_193, %c0_194] : memref<256x128xf32, #tpu.memory_space<vmem>>, vector<256x128xf32>
    %cst_195 = arith.constant dense<0.000000e+00> : vector<2x128xf32>
    %616 = tpu.matmul %607, %615, %cst_195 {dimension_numbers = #tpu.dot_dimension_numbers<[1], [0], [0], [1], [0, 0, 1, 1], [], []>} : vector<2x256xf32>, vector<256x128xf32>, vector<2x128xf32> -> vector<2x128xf32>
    %c0_196 = arith.constant 0 : index
    %c0_197 = arith.constant 0 : index
    %617 = vector.load %arg14[%c0_196, %c0_197] : memref<1x128xf32, #tpu.memory_space<vmem>>, vector<1x128xf32>
    %618 = vector.broadcast %617 : vector<1x128xf32> to vector<2x128xf32>
    %619 = arith.addf %616, %618 : vector<2x128xf32>
    %cst_198 = arith.constant 0.000000e+00 : f32
    %620 = vector.broadcast %cst_198 : f32 to vector<2x128xf32>
    %621 = arith.maximumf %619, %620 : vector<2x128xf32>
    %622 = arith.mulf %614, %621 : vector<2x128xf32>
    %c0_199 = arith.constant 0 : index
    %c0_200 = arith.constant 0 : index
    %623 = vector.load %arg15[%c0_199, %c0_200] : memref<128x128xf32, #tpu.memory_space<vmem>>, vector<128x128xf32>
    %cst_201 = arith.constant dense<0.000000e+00> : vector<2x128xf32>
    %624 = tpu.matmul %622, %623, %cst_201 {dimension_numbers = #tpu.dot_dimension_numbers<[1], [0], [0], [1], [0, 0, 1, 1], [], []>} : vector<2x128xf32>, vector<128x128xf32>, vector<2x128xf32> -> vector<2x128xf32>
    %c0_202 = arith.constant 0 : index
    %c0_203 = arith.constant 0 : index
    %625 = vector.load %arg16[%c0_202, %c0_203] : memref<1x128xf32, #tpu.memory_space<vmem>>, vector<1x128xf32>
    %626 = vector.broadcast %625 : vector<1x128xf32> to vector<2x128xf32>
    %627 = arith.addf %624, %626 : vector<2x128xf32>
    %cst_204 = arith.constant 0.000000e+00 : f32
    %628 = vector.broadcast %cst_204 : f32 to vector<2x128xf32>
    %629 = arith.maximumf %627, %628 : vector<2x128xf32>
    %c0_205 = arith.constant 0 : index
    %c0_206 = arith.constant 0 : index
    %630 = vector.load %arg17[%c0_205, %c0_206] : memref<128x16xf32, #tpu.memory_space<vmem>>, vector<128x16xf32>
    %cst_207 = arith.constant dense<0.000000e+00> : vector<2x16xf32>
    %631 = tpu.matmul %629, %630, %cst_207 {dimension_numbers = #tpu.dot_dimension_numbers<[1], [0], [0], [1], [0, 0, 1, 1], [], []>} : vector<2x128xf32>, vector<128x16xf32>, vector<2x16xf32> -> vector<2x16xf32>
    %c0_208 = arith.constant 0 : index
    %c0_209 = arith.constant 0 : index
    %632 = vector.load %arg18[%c0_208, %c0_209] : memref<1x16xf32, #tpu.memory_space<vmem>>, vector<1x16xf32>
    %633 = vector.broadcast %632 : vector<1x16xf32> to vector<2x16xf32>
    %634 = arith.addf %631, %633 : vector<2x16xf32>
    %c0_210 = arith.constant 0 : index
    %c0_211 = arith.constant 0 : index
    %635 = vector.load %arg19[%c0_210, %c0_211] : memref<2x16xf32, #tpu.memory_space<vmem>>, vector<2x16xf32>
    tpu.vector_store %arg19[%c0_210, %c0_211], %634 {strides = array<i32>} : memref<2x16xf32, #tpu.memory_space<vmem>>, vector<2x16xf32>,
    return
  }
}

</mosaic_0001>

<bundles_post_ra>
// kernel: peterson_forward.1
= control target key start
LH: loop header
LB: loop body
LE: loop exit
PB: predicated region body
PF: predicated region fallthrough
CT: control target
= control target key end

     0   :  { %s8716_s0 = inlined_call_operand.vmem [shape: f32[8,2,768], index: 0, kind: input, shape index: {}]   ;;  %s8717_s1 = inlined_call_operand.vmem [shape: f32[2,8,256], index: 1, kind: input, shape index: {}]   ;;  %s8718_s2 = inlined_call_operand.vmem [shape: f32[128,384], index: 2, kind: input, shape index: {}]   ;;  %s8719_s3 = inlined_call_operand.vmem [shape: f32[128,384], index: 3, kind: input, shape index: {}]   ;;  %s8720_s4 = inlined_call_operand.vmem [shape: f32[1,384], index: 4, kind: input, shape index: {}]   ;;  %s8721_s5 = inlined_call_operand.hbm [shape: f32[1,384], index: 5, kind: input, shape index: {}]   ;;  %s8722_s6 = inlined_call_operand.hbm [shape: f32[256,128], index: 6, kind: input, shape index: {}]   ;;  %s8723_s7 = inlined_call_operand.hbm [shape: f32[256,128], index: 7, kind: input, shape index: {}]   ;;  %s8724_s8 = inlined_call_operand.hbm [shape: f32[1,128], index: 8, kind: input, shape index: {}]   ;;  %s8725_s9 = inlined_call_operand.hbm [shape: f32[1,128], index: 9, kind: input, shape index: {}]   ;;  %s8726_s10 = inlined_call_operand.<no memory space> [shape: f32[1,1], index: 10, kind: input, shape index: {}]   ;;  %s8727_s11 = inlined_call_operand.hbm [shape: f32[256,128], index: 11, kind: input, shape index: {}]   ;;  %s8728_s12 = inlined_call_operand.hbm [shape: f32[1,128], index: 12, kind: input, shape index: {}]   ;;  %s8729_s13 = inlined_call_operand.hbm [shape: f32[256,128], index: 13, kind: input, shape index: {}]   ;;  %s8730_s14 = inlined_call_operand.hbm [shape: f32[1,128], index: 14, kind: input, shape index: {}]   ;;  %s8731_s15 = inlined_call_operand.hbm [shape: f32[128,128], index: 15, kind: input, shape index: {}]   ;;  %s8732_s16 = inlined_call_operand.hbm [shape: f32[1,128], index: 16, kind: input, shape index: {}]   ;;  %s8733_s17 = inlined_call_operand.vmem [shape: f32[128,16], index: 17, kind: input, shape index: {}]   ;;  %s8734_s18 = inlined_call_operand.hbm [shape: f32[1,16], index: 18, kind: input, shape index: {}]   ;;  %s8735_s19 = inlined_call_operand.hbm [shape: f32[2,16], index: 19, kind: output, shape index: {}]  }
   0x1   :  { %8999 = sst [smem:[#allocation100_spill]] %s8716_s0  ;;  %v24_v0 = vstv %s8726_s10 }
   0x2   :  { %9000 = sst [smem:[#allocation101_spill]] %s8717_s1  ;;  %25 = vst [vmem:[#allocation2] sm:$0x1] %v24_v0 }
   0x3   :  { %9001 = sst [smem:[#allocation102_spill]] %s8718_s2 }
   0x4   :  { %9002 = sst [smem:[#allocation103_spill]] %s8719_s3 }
   0x5   :  { %26 = vsyncpa [#allocation4], 0 }
   0x6   :  { %27 = vsyncpa [#allocation7], 0 }
   0x7   :  { %28 = vsyncpa [#allocation10], 0 }
   0x8   :  { %29 = vsyncpa [#allocation13], 0 }
   0x9   :  { %30 = vsyncpa [#allocation16], 0 }
   0xa   :  { %31 = vsyncpa [#allocation19], 0 }
   0xb   :  { %32 = vsyncpa [#allocation22], 0 }
   0xc   :  { %33 = vsyncpa [#allocation5], 0  ;;  %s5664_s20 = smov [#allocation6]  }
   0xd   :  { %s59_s21 = sshll.u32 %s5664_s20, 4  ;;  %s60_s21 = int_to_ptr.vmem [resolvable:$true] %s59_s21 }
   0xe   :  { %s5396_s1 = scalar_lea.vmem %s60_s21, 4096  ;;  %p5401_p1 = scmp.lt.s32.totalorder %s60_s21, %s60_s21 }
   0xf   :  { %p5397_p0 = scmp.ne.s32.totalorder %s60_s21, %s5396_s1  ;;  %p5402_p2 = scmp.lt.s32.totalorder %s5396_s1, %s5396_s1 }
  0x11   :  { %p5403_p3 = por %p5402_p2, %p5401_p1 }
  0x13   :  { %p5404_p4 = pnand %p5403_p3, %p5397_p0 }
  0x15   :  { %5407 = shalt.err (!%p5404_p4)
}
  0x16   :  { %s5665_s10 = smov 128   ;;  %s5666_s22 = smov 8  }
  0x17   :  { %65 = dma.hbm_to_vmem [thread:$0]  %s8722_s6, 4096, %s60_s21, [#allocation7], %s5665_s10, %s5665_s10, %s5666_s22  }
  0x18   :  { %s5667_s24 = smov [#allocation9]   ;;  %s5668_s3 = smov [#allocation12]  }
  0x19   :  { %s84_s25 = sshll.u32 %s5667_s24, 4  ;;  %s105_s26 = sshll.u32 %s5668_s3, 4  ;;  %s85_s25 = int_to_ptr.vmem [resolvable:$true] %s84_s25  ;;  %s106_s26 = int_to_ptr.vmem [resolvable:$true] %s105_s26 }
  0x1a   :  { %s5416_s27 = scalar_lea.vmem %s85_s25, 16  ;;  %s5420_s28 = scalar_lea.vmem %s85_s25, 32 }
  0x1b   :  { %p5417_p5 = scmp.ne.s32.totalorder %s85_s25, %s5416_s27  ;;  %p5421_p6 = scmp.lt.s32.totalorder %s85_s25, %s85_s25 }
  0x1c   :  { %p5422_p7 = scmp.lt.s32.totalorder %s5420_s28, %s5416_s27 }
  0x1e   :  { %p5423_p8 = por %p5422_p7, %p5421_p6 }
  0x20   :  { %p5424_p9 = pnand %p5423_p8, %p5417_p5 }
  0x22   :  { %5427 = shalt.err (!%p5424_p9)
}
  0x23   :  { %87 = dma.hbm_to_vmem [thread:$0]  %s8724_s8, 16, %s85_s25, [#allocation10]  }
  0x24   :  { %s5436_s30 = scalar_lea.vmem %s106_s26, 4096  ;;  %p5441_p11 = scmp.lt.s32.totalorder %s106_s26, %s106_s26 }
  0x25   :  { %p5437_p10 = scmp.ne.s32.totalorder %s106_s26, %s5436_s30  ;;  %p5442_p12 = scmp.lt.s32.totalorder %s5436_s30, %s5436_s30 }
  0x27   :  { %p5443_p13 = por %p5442_p12, %p5441_p11 }
  0x29   :  { %p5444_p0 = pnand %p5443_p13, %p5437_p10 }
  0x2b   :  { %5447 = shalt.err (!%p5444_p0)
}
  0x2c   :  { %111 = dma.hbm_to_vmem [thread:$0]  %s8727_s11, 4096, %s106_s26, [#allocation13], %s5665_s10, %s5665_s10, %s5666_s22  }
  0x2d   :  { %s5669_s21 = smov [#allocation15]   ;;  %s5670_s2 = smov [#allocation18]  }
  0x2e   :  { %s127_s1 = sshll.u32 %s5669_s21, 4  ;;  %s149_s8 = sshll.u32 %s5670_s2, 4  ;;  %s128_s1 = int_to_ptr.vmem [resolvable:$true] %s127_s1  ;;  %s150_s8 = int_to_ptr.vmem [resolvable:$true] %s149_s8 }
  0x2f   :  { %s5456_s23 = scalar_lea.vmem %s128_s1, 4096  ;;  %p5461_p2 = scmp.lt.s32.totalorder %s128_s1, %s128_s1 }
  0x30   :  { %p5457_p1 = scmp.ne.s32.totalorder %s128_s1, %s5456_s23  ;;  %p5462_p3 = scmp.lt.s32.totalorder %s5456_s23, %s5456_s23 }
  0x32   :  { %p5463_p4 = por %p5462_p3, %p5461_p2 }
  0x34   :  { %p5464_p5 = pnand %p5463_p4, %p5457_p1 }
  0x36   :  { %5467 = shalt.err (!%p5464_p5)
}
  0x37   :  { %133 = dma.hbm_to_vmem [thread:$0]  %s8729_s13, 4096, %s128_s1, [#allocation16], %s5665_s10, %s5665_s10, %s5666_s22  }
  0x38   :  { %s5476_s11 = scalar_lea.vmem %s150_s8, 2048  ;;  %p5481_p7 = scmp.lt.s32.totalorder %s150_s8, %s150_s8 }
  0x39   :  { %p5477_p6 = scmp.ne.s32.totalorder %s150_s8, %s5476_s11  ;;  %p5482_p8 = scmp.lt.s32.totalorder %s5476_s11, %s5476_s11 }
  0x3b   :  { %p5483_p9 = por %p5482_p8, %p5481_p7 }
  0x3d   :  { %p5484_p10 = pnand %p5483_p9, %p5477_p6 }
  0x3f   :  { %5487 = shalt.err (!%p5484_p10)
}
  0x40   :  { %155 = dma.hbm_to_vmem [thread:$0]  %s8731_s15, 2048, %s150_s8, [#allocation19], %s5665_s10, %s5665_s10, %s5666_s22  }
  0x41   :  { %s5671_s27 = smov [#allocation3]   ;;  %s5672_s29 = smov [#allocation8]  }
  0x42   :  { %s50_s28 = sshll.u32 %s5671_s27, 4  ;;  %s71_s13 = sshll.u32 %s5672_s29, 4  ;;  %s51_s28 = int_to_ptr.vmem [resolvable:$true] %s50_s28  ;;  %s72_s13 = int_to_ptr.vmem [resolvable:$true] %s71_s13 }
  0x43   :  { %s5496_s0 = scalar_lea.vmem %s51_s28, 48  ;;  %s5500_s30 = scalar_lea.vmem %s51_s28, 64 }
  0x44   :  { %p5497_p11 = scmp.ne.s32.totalorder %s51_s28, %s5496_s0  ;;  %p5501_p12 = scmp.lt.s32.totalorder %s51_s28, %s51_s28 }
  0x45   :  { %p5502_p13 = scmp.lt.s32.totalorder %s5500_s30, %s5496_s0 }
  0x47   :  { %p5503_p0 = por %p5502_p13, %p5501_p12 }
  0x49   :  { %p5504_p1 = pnand %p5503_p0, %p5497_p11 }
  0x4b   :  { %5507 = shalt.err (!%p5504_p1)
}
  0x4c   :  { %53 = dma.hbm_to_vmem [thread:$0]  %s8721_s5, 48, %s51_s28, [#allocation4]  }
  0x4d   :  { %s5516_s21 = scalar_lea.vmem %s72_s13, 4096  ;;  %p5521_p3 = scmp.lt.s32.totalorder %s72_s13, %s72_s13 }
  0x4e   :  { %p5517_p2 = scmp.ne.s32.totalorder %s72_s13, %s5516_s21  ;;  %p5522_p4 = scmp.lt.s32.totalorder %s5516_s21, %s5516_s21 }
  0x50   :  { %p5523_p5 = por %p5522_p4, %p5521_p3 }
  0x52   :  { %p5524_p6 = pnand %p5523_p5, %p5517_p2 }
  0x54   :  { %5527 = shalt.err (!%p5524_p6)
}
  0x55   :  { %77 = dma.hbm_to_vmem [thread:$0]  %s8723_s7, 4096, %s72_s13, [#allocation7], %s5665_s10, %s5665_s10, %s5666_s22  }
  0x56   :  { %s5673_s2 = smov [#allocation11]   ;;  %s5674_s23 = smov [#allocation14]  }
  0x57   :  { %s94_s8 = sshll.u32 %s5673_s2, 4  ;;  %s118_s5 = sshll.u32 %s5674_s23, 4  ;;  %s95_s8 = int_to_ptr.vmem [resolvable:$true] %s94_s8  ;;  %s119_s5 = int_to_ptr.vmem [resolvable:$true] %s118_s5 }
  0x58   :  { %s5536_s24 = scalar_lea.vmem %s95_s8, 16  ;;  %s5540_s25 = scalar_lea.vmem %s95_s8, 32 }
  0x59   :  { %p5537_p7 = scmp.ne.s32.totalorder %s95_s8, %s5536_s24  ;;  %p5541_p8 = scmp.lt.s32.totalorder %s95_s8, %s95_s8 }
  0x5a   :  { %p5542_p9 = scmp.lt.s32.totalorder %s5540_s25, %s5536_s24 }
  0x5c   :  { %p5543_p10 = por %p5542_p9, %p5541_p8 }
  0x5e   :  { %p5544_p11 = pnand %p5543_p10, %p5537_p7 }
  0x60   :  { %5547 = shalt.err (!%p5544_p11)
}
  0x61   :  { %97 = dma.hbm_to_vmem [thread:$0]  %s8725_s9, 16, %s95_s8, [#allocation10]  }
  0x62   :  { %s5556_s26 = scalar_lea.vmem %s119_s5, 16  ;;  %s5560_s7 = scalar_lea.vmem %s119_s5, 32 }
  0x63   :  { %p5557_p12 = scmp.ne.s32.totalorder %s119_s5, %s5556_s26  ;;  %p5561_p13 = scmp.lt.s32.totalorder %s119_s5, %s119_s5 }
  0x64   :  { %p5562_p0 = scmp.lt.s32.totalorder %s5560_s7, %s5556_s26 }
  0x66   :  { %p5563_p1 = por %p5562_p0, %p5561_p13 }
  0x68   :  { %p5564_p2 = pnand %p5563_p1, %p5557_p12 }
  0x6a   :  { %5567 = shalt.err (!%p5564_p2)
}
  0x6b   :  { %121 = dma.hbm_to_vmem [thread:$0]  %s8728_s12, 16, %s119_s5, [#allocation13]  }
  0x6c   :  { %s5675_s27 = smov [#allocation17]   ;;  %s5676_s29 = smov [#allocation20]  }
  0x6d   :  { %s140_s28 = sshll.u32 %s5675_s27, 4  ;;  %s162_s13 = sshll.u32 %s5676_s29, 4  ;;  %s141_s28 = int_to_ptr.vmem [resolvable:$true] %s140_s28  ;;  %s163_s13 = int_to_ptr.vmem [resolvable:$true] %s162_s13 }
  0x6e   :  { %s5576_s0 = scalar_lea.vmem %s141_s28, 16  ;;  %s5580_s9 = scalar_lea.vmem %s141_s28, 32 }
  0x6f   :  { %p5577_p3 = scmp.ne.s32.totalorder %s141_s28, %s5576_s0  ;;  %p5581_p4 = scmp.lt.s32.totalorder %s141_s28, %s141_s28 }
  0x70   :  { %p5582_p5 = scmp.lt.s32.totalorder %s5580_s9, %s5576_s0 }
  0x72   :  { %p5583_p6 = por %p5582_p5, %p5581_p4 }
  0x74   :  { %p5584_p7 = pnand %p5583_p6, %p5577_p3 }
  0x76   :  { %5587 = shalt.err (!%p5584_p7)
}
  0x77   :  { %143 = dma.hbm_to_vmem [thread:$0]  %s8730_s14, 16, %s141_s28, [#allocation16]  }
  0x78   :  { %s5596_s20 = scalar_lea.vmem %s163_s13, 16  ;;  %s5600_s12 = scalar_lea.vmem %s163_s13, 32 }
  0x79   :  { %p5597_p8 = scmp.ne.s32.totalorder %s163_s13, %s5596_s20  ;;  %p5601_p9 = scmp.lt.s32.totalorder %s163_s13, %s163_s13 }
  0x7a   :  { %p5602_p10 = scmp.lt.s32.totalorder %s5600_s12, %s5596_s20 }
  0x7c   :  { %p5603_p11 = por %p5602_p10, %p5601_p9 }
  0x7e   :  { %p5604_p12 = pnand %p5603_p11, %p5597_p8 }
  0x80   :  { %5607 = shalt.err (!%p5604_p12)
}
  0x81   :  { %165 = dma.hbm_to_vmem [thread:$0]  %s8732_s16, 16, %s163_s13, [#allocation19]  }
  0x82   :  { %s5677_s1 = smov [#allocation21]  }
  0x83   :  { %s174_s2 = sshll.u32 %s5677_s1, 4  ;;  %s175_s2 = int_to_ptr.vmem [resolvable:$true] %s174_s2 }
  0x84   :  { %s5616_s8 = scalar_lea.vmem %s175_s2, 16  ;;  %s5620_s23 = scalar_lea.vmem %s175_s2, 32 }
  0x85   :  { %p5617_p13 = scmp.ne.s32.totalorder %s175_s2, %s5616_s8  ;;  %p5621_p0 = scmp.lt.s32.totalorder %s175_s2, %s175_s2 }
  0x86   :  { %p5622_p1 = scmp.lt.s32.totalorder %s5620_s23, %s5616_s8 }
  0x88   :  { %p5623_p2 = por %p5622_p1, %p5621_p0 }
  0x8a   :  { %p5624_p3 = pnand %p5623_p2, %p5617_p13 }
  0x8c   :  { %5627 = shalt.err (!%p5624_p3)
}
  0x8d   :  { %177 = dma.hbm_to_vmem [thread:$0]  %s8734_s18, 16, %s175_s2, [#allocation22]  }
  0x8e   :  { %5648 = dma.done.wait [#allocation4], 48  }
  0x8f   :  { %5649 = vsyncadd [#allocation4], 4294967248 }
  0x90   :  { %5650 = dma.done.wait [#allocation7], 8192  }
  0x91   :  { %5651 = vsyncadd [#allocation7], 4294959104 }
  0x92   :  { %5652 = dma.done.wait [#allocation10], 32  }
  0x93   :  { %5653 = vsyncadd [#allocation10], 4294967264 }
  0x94   :  { %5654 = dma.done.wait [#allocation13], 4112  }
  0x95   :  { %5655 = vsyncadd [#allocation13], 4294963184 }
  0x96   :  { %5656 = dma.done.wait [#allocation16], 4112  }
  0x97   :  { %5657 = vsyncadd [#allocation16], 4294963184 }
  0x98   :  { %5658 = dma.done.wait [#allocation19], 2064  }
  0x99   :  { %5659 = vsyncadd [#allocation19], 4294965232 }
  0x9a   :  { %5660 = dma.done.wait [#allocation22], 16  }
  0x9b   :  { %5661 = vsyncadd [#allocation22], 4294967280  ;;  %v8750_v1 = vmov 0.0   ;;  %vm5679_vm0 = vmmov 0   ;;  %s9003_s24 = sld [smem:[#allocation102_spill]]  ;;  %vm3335_vm1 = vcmask 1041409  }
  0x9c   :  { %343 = vmatprep.mubr.f32.mxu0 %v8750_v1  ;;  %4373 = vmatprep.subr.mxu1 %v8750_v1  ;;  %s9022_s10 = sld [smem:[#allocation103_spill]]  ;;  %vm3338_vm2 = vcmask 58368   ;;  %s5682_s16 = smov [#allocation23]   ;;  %vm3848_vm3 = vcmask 123904  }
  0x9d   :  { %4405 = vmatprep.mubr.msk.f32.mxu1 %vm5679_vm0, %v8750_v1  ;;  %s9071_s13 = sld [smem:[#allocation100_spill]]  ;;  %s3856_s18 = sshll.u32 %s5682_s16, 4  ;;  %s3857_s18 = int_to_ptr.vmem [resolvable:$true] %s3856_s18 }
  0x9e   :  { %s9393_s0 = sld [smem:[#allocation101_spill]]  ;;  %s5628_s25 = scalar_lea.vmem %s3857_s18, 32 }
  0x9f   :  { %p5629_p4 = scmp.ne.s32.totalorder %s3857_s18, %s5628_s25  ;;  %p5633_p5 = scmp.lt.s32.totalorder %s3857_s18, %s3857_s18 }
  0xa0   :  { %p5634_p6 = scmp.lt.s32.totalorder %s5628_s25, %s5628_s25 }
  0xa1   :  { %v5844_v2 = vld [vmem:[%s9003_s24 + $0x170] sm:$0xff]  ;;  %v5849_v3 = vld [vmem:[%s9003_s24 + $0x168] sm:$0xff]  ;;  %v5854_v4 = vld [vmem:[%s9003_s24 + $0x158] sm:$0xff] }
  0xa2   :  { %9004 = vst [vmem:[#allocation32_spill] sm:$0xff] %v5849_v3  ;;  %279 = vmatprep.subr.mxu0 %v5844_v2  ;;  %v5860_v5 = vld [vmem:[%s9003_s24 + $0x150] sm:$0xff]  ;;  %v5866_v6 = vld [vmem:[%s9003_s24 + $0x140] sm:$0xff]  ;;  %v5872_v7 = vld [vmem:[%s9003_s24 + $0x138] sm:$0xff]  ;;  %p5635_p7 = por %p5634_p6, %p5633_p5 }
  0xa3   :  { %9005 = vst [vmem:[#allocation33_spill] sm:$0xff] %v5860_v5  ;;  %280 = vmatpush1.msra.mxu0 %v5849_v3  ;;  %v5878_v8 = vld [vmem:[%s9003_s24 + $0x128] sm:$0xff]  ;;  %v5884_v9 = vld [vmem:[%s9003_s24 + $0x120] sm:$0xff]  ;;  %v5890_v10 = vld [vmem:[%s9003_s24 + $0x110] sm:$0xff] }
  0xa4   :  { %281 = vmatprep.subr.mxu0 %v5854_v4  ;;  %v5896_v11 = vld [vmem:[%s9003_s24 + $0x108] sm:$0xff]  ;;  %v5902_v12 = vld [vmem:[%s9003_s24 + $0xf8] sm:$0xff]  ;;  %v5908_v13 = vld [vmem:[%s9003_s24 + $0xf0] sm:$0xff]  ;;  %p5636_p8 = pnand %p5635_p7, %p5629_p4 }
  0xa5   :  { %282 = vmatpush1.msra.mxu0 %v5860_v5  ;;  %v5914_v14 = vld [vmem:[%s9003_s24 + $0xe0] sm:$0xff]  ;;  %v5920_v15 = vld [vmem:[%s9003_s24 + $0xd8] sm:$0xff]  ;;  %v5931_v17 = vld [vmem:[%s9003_s24 + $0xc8] sm:$0xff] }
  0xa6   :  { %283 = vmatprep.subr.mxu0 %v5866_v6  ;;  %v5925_v16 = vld [vmem:[%s9003_s24 + $0x178] sm:$0xff]  ;;  %v5937_v18 = vld [vmem:[%s9003_s24 + $0x160] sm:$0xff]  ;;  %v5949_v20 = vld [vmem:[%s9003_s24 + $0x148] sm:$0xff] }
  0xa7   :  { %284 = vmatpush1.msra.mxu0 %v5872_v7  ;;  %4374 = vmatpush3.msra.mxu1 %v5925_v16  ;;  %v5943_v19 = vld [vmem:[%s9003_s24 + $0xc0] sm:$0xff]  ;;  %v5955_v21 = vld [vmem:[%s9003_s24 + $0xb0] sm:$0xff]  ;;  %v5962_v22 = vld [vmem:[%s9003_s24 + $0xa8] sm:$0xff] }
  0xa8   :  { %285 = vmatprep.subr.mxu0 %v5878_v8  ;;  %4375 = vmatprep.subr.mxu1 %v8750_v1  ;;  %v5968_v23 = vld [vmem:[%s9003_s24 + $0x130] sm:$0xff]  ;;  %v5974_v24 = vld [vmem:[%s9003_s24 + $0x98] sm:$0xff]  ;;  %v5993_v27 = vld [vmem:[%s9003_s24 + $0x80] sm:$0xff] }
  0xa9   :  { %286 = vmatpush1.msra.mxu0 %v5884_v9  ;;  %4376 = vmatpush3.msra.mxu1 %v5937_v18  ;;  %9006 = vst [vmem:[#allocation34_spill] sm:$0xff] %v5974_v24  ;;  %v5981_v25 = vld [vmem:[%s9003_s24 + $0x90] sm:$0xff]  ;;  %v5987_v26 = vld [vmem:[%s9003_s24 + $0x118] sm:$0xff]  ;;  %9008 = vst [vmem:[#allocation36_spill] sm:$0xff] %v5993_v27 }
  0xaa   :  { %287 = vmatprep.subr.mxu0 %v5890_v10  ;;  %4377 = vmatprep.subr.mxu1 %v8750_v1  ;;  %9007 = vst [vmem:[#allocation35_spill] sm:$0xff] %v5981_v25  ;;  %v6000_v28 = vld [vmem:[%s9003_s24 + $0x78] sm:$0xff]  ;;  %v6006_v29 = vld [vmem:[%s9003_s24 + $0x100] sm:$0xff]  ;;  %v6012_v30 = vld [vmem:[%s9003_s24 + $0x68] sm:$0xff] }
  0xab   :  { %288 = vmatpush1.msra.mxu0 %v5896_v11  ;;  %4378 = vmatpush3.msra.mxu1 %v5949_v20  ;;  %9009 = vst [vmem:[#allocation37_spill] sm:$0xff] %v6000_v28  ;;  %9010 = vst [vmem:[#allocation38_spill] sm:$0xff] %v6012_v30  ;;  %v6019_v31 = vld [vmem:[%s9003_s24 + $0x60] sm:$0xff]  ;;  %v6025_v32 = vld [vmem:[%s9003_s24 + $0xe8] sm:$0xff] }
  0xac   :  { %289 = vmatprep.subr.mxu0 %v5902_v12  ;;  %4379 = vmatprep.subr.mxu1 %v8750_v1  ;;  %9011 = vst [vmem:[#allocation39_spill] sm:$0xff] %v6019_v31  ;;  %v6031_v33 = vld [vmem:[%s9003_s24 + $0x50] sm:$0xff]  ;;  %v6038_v34 = vld [vmem:[%s9003_s24 + $0x48] sm:$0xff]  ;;  %v6050_v36 = vld [vmem:[%s9003_s24 + $0x38] sm:$0xff] }
  0xad   :  { %290 = vmatpush1.msra.mxu0 %v5908_v13  ;;  %4380 = vmatpush3.msra.mxu1 %v5968_v23  ;;  %9012 = vst [vmem:[#allocation40_spill] sm:$0xff] %v6031_v33  ;;  %9013 = vst [vmem:[#allocation41_spill] sm:$0xff] %v6038_v34  ;;  %v6044_v35 = vld [vmem:[%s9003_s24 + $0xd0] sm:$0xff]  ;;  %v6063_v38 = vld [vmem:[%s9003_s24 + $0xb8] sm:$0xff] }
  0xae   :  { %291 = vmatprep.subr.mxu0 %v5914_v14  ;;  %4381 = vmatprep.subr.mxu1 %v8750_v1  ;;  %9014 = vst [vmem:[#allocation42_spill] sm:$0xff] %v6050_v36  ;;  %v6057_v37 = vld [vmem:[%s9003_s24 + $0x30] sm:$0xff]  ;;  %v6069_v39 = vld [vmem:[%s9003_s24 + $0x20] sm:$0xff]  ;;  %v6076_v40 = vld [vmem:[%s9003_s24 + $0x18] sm:$0xff] }
  0xaf   :  { %292 = vmatpush1.msra.mxu0 %v5920_v15  ;;  %4382 = vmatpush3.msra.mxu1 %v5987_v26  ;;  %9015 = vst [vmem:[#allocation43_spill] sm:$0xff] %v6057_v37  ;;  %9016 = vst [vmem:[#allocation44_spill] sm:$0xff] %v6069_v39  ;;  %v6082_v41 = vld [vmem:[%s9003_s24 + $0xa0] sm:$0xff]  ;;  %v6088_v42 = vld [vmem:[%s9003_s24 + $0x8] sm:$0xff] }
  0xb0   :  { %293 = vmatprep.subr.mxu0 %v5931_v17  ;;  %4383 = vmatprep.subr.mxu1 %v8750_v1  ;;  %9017 = vst [vmem:[#allocation45_spill] sm:$0xff] %v6076_v40  ;;  %9018 = vst [vmem:[#allocation46_spill] sm:$0xff] %v6082_v41  ;;  %v6095_v43 = vld [vmem:[%s9003_s24] sm:$0xff]  ;;  %v6101_v44 = vld [vmem:[%s9003_s24 + $0x88] sm:$0xff] }
  0xb1   :  { %294 = vmatpush1.msra.mxu0 %v5943_v19  ;;  %4384 = vmatpush3.msra.mxu1 %v6006_v29  ;;  %9019 = vst [vmem:[#allocation47_spill] sm:$0xff] %v6088_v42  ;;  %9020 = vst [vmem:[#allocation48_spill] sm:$0xff] %v6095_v43  ;;  %v6107_v45 = vld [vmem:[%s9022_s10 + $0x170] sm:$0xff]  ;;  %v6114_v46 = vld [vmem:[%s9022_s10 + $0x168] sm:$0xff] }
  0xb2   :  { %295 = vmatprep.subr.mxu0 %v5955_v21  ;;  %4385 = vmatprep.subr.mxu1 %v8750_v1  ;;  %9021 = vst [vmem:[#allocation49_spill] sm:$0xff] %v6101_v44  ;;  %9023 = vst [vmem:[#allocation50_spill] sm:$0xff] %v6107_v45  ;;  %v6121_v47 = vld [vmem:[%s9022_s10 + $0x158] sm:$0xff]  ;;  %v6127_v48 = vld [vmem:[%s9003_s24 + $0x70] sm:$0xff] }
  0xb3   :  { %296 = vmatpush1.msra.mxu0 %v5962_v22  ;;  %4386 = vmatpush3.msra.mxu1 %v6025_v32  ;;  %9024 = vst [vmem:[#allocation51_spill] sm:$0xff] %v6127_v48  ;;  %v6134_v49 = vld [vmem:[%s9022_s10 + $0x150] sm:$0xff]  ;;  %v6140_v50 = vld [vmem:[%s9022_s10 + $0x140] sm:$0xff]  ;;  %v6146_v51 = vld [vmem:[%s9003_s24 + $0x58] sm:$0xff] }
  0xb4   :  { %297 = vmatprep.subr.mxu0 %v5974_v24  ;;  %4387 = vmatprep.subr.mxu1 %v8750_v1  ;;  %9025 = vst [vmem:[#allocation52_spill] sm:$0xff] %v6146_v51  ;;  %v6152_v52 = vld [vmem:[%s9022_s10 + $0x138] sm:$0xff]  ;;  %v6159_v53 = vld [vmem:[%s9022_s10 + $0x128] sm:$0xff]  ;;  %v6165_v54 = vld [vmem:[%s9003_s24 + $0x40] sm:$0xff] }
  0xb5   :  { %298 = vmatpush1.msra.mxu0 %v5981_v25  ;;  %4388 = vmatpush3.msra.mxu1 %v6044_v35  ;;  %9026 = vst [vmem:[#allocation53_spill] sm:$0xff] %v6159_v53  ;;  %9027 = vst [vmem:[#allocation54_spill] sm:$0xff] %v6165_v54  ;;  %v6171_v55 = vld [vmem:[%s9022_s10 + $0x120] sm:$0xff]  ;;  %v6178_v56 = vld [vmem:[%s9022_s10 + $0x110] sm:$0xff] }
  0xb6   :  { %299 = vmatprep.subr.mxu0 %v5993_v27  ;;  %4389 = vmatprep.subr.mxu1 %v8750_v1  ;;  %9028 = vst [vmem:[#allocation55_spill] sm:$0xff] %v6171_v55  ;;  %9029 = vst [vmem:[#allocation56_spill] sm:$0xff] %v6178_v56  ;;  %v6184_v57 = vld [vmem:[%s9003_s24 + $0x28] sm:$0xff]  ;;  %v6197_v59 = vld [vmem:[%s9022_s10 + $0xf8] sm:$0xff] }
  0xb7   :  { %300 = vmatpush1.msra.mxu0 %v6000_v28  ;;  %4390 = vmatpush3.msra.mxu1 %v6063_v38  ;;  %9030 = vst [vmem:[#allocation57_spill] sm:$0xff] %v6184_v57  ;;  %v6190_v58 = vld [vmem:[%s9022_s10 + $0x108] sm:$0xff]  ;;  %9032 = vst [vmem:[#allocation59_spill] sm:$0xff] %v6197_v59  ;;  %v6203_v60 = vld [vmem:[%s9003_s24 + $0x10] sm:$0xff] }
  0xb8   :  { %301 = vmatprep.subr.mxu0 %v6012_v30  ;;  %4391 = vmatprep.subr.mxu1 %v8750_v1  ;;  %9031 = vst [vmem:[#allocation58_spill] sm:$0xff] %v6190_v58  ;;  %9033 = vst [vmem:[#allocation60_spill] sm:$0xff] %v6203_v60  ;;  %v6209_v61 = vld [vmem:[%s9022_s10 + $0xf0] sm:$0xff]  ;;  %v6216_v62 = vld [vmem:[%s9022_s10 + $0xe0] sm:$0xff] }
  0xb9   :  { %302 = vmatpush1.msra.mxu0 %v6019_v31  ;;  %4392 = vmatpush3.msra.mxu1 %v6082_v41  ;;  %9034 = vst [vmem:[#allocation61_spill] sm:$0xff] %v6209_v61  ;;  %9035 = vst [vmem:[#allocation62_spill] sm:$0xff] %v6216_v62  ;;  %v6223_v63 = vld [vmem:[%s9022_s10 + $0xd8] sm:$0xff]  ;;  %v6230_v0 = vld [vmem:[%s9022_s10 + $0xc8] sm:$0xff] }
  0xba   :  { %303 = vmatprep.subr.mxu0 %v6031_v33  ;;  %4393 = vmatprep.subr.mxu1 %v8750_v1  ;;  %9036 = vst [vmem:[#allocation63_spill] sm:$0xff] %v6223_v63  ;;  %9037 = vst [vmem:[#allocation64_spill] sm:$0xff] %v6230_v0 }
  0xbb   :  { %304 = vmatpush1.msra.mxu0 %v6038_v34  ;;  %4394 = vmatpush3.msra.mxu1 %v6101_v44 }
  0xbc   :  { %305 = vmatprep.subr.mxu0 %v6050_v36  ;;  %4395 = vmatprep.subr.mxu1 %v8750_v1 }
  0xbd   :  { %306 = vmatpush1.msra.mxu0 %v6057_v37  ;;  %4396 = vmatpush3.msra.mxu1 %v6127_v48 }
  0xbe   :  { %307 = vmatprep.subr.mxu0 %v6069_v39  ;;  %4397 = vmatprep.subr.mxu1 %v8750_v1 }
  0xbf   :  { %308 = vmatpush1.msra.mxu0 %v6076_v40  ;;  %4398 = vmatpush3.msra.mxu1 %v6146_v51 }
  0xc0   :  { %309 = vmatprep.subr.mxu0 %v6088_v42  ;;  %4399 = vmatprep.subr.mxu1 %v8750_v1 }
  0xc1   :  { %310 = vmatpush1.msra.mxu0 %v6095_v43  ;;  %4400 = vmatpush3.msra.mxu1 %v6165_v54 }
  0xc2   :  { %344 = vmatmul.mubr.f32.vlgmr.msra.gmra.mxu0 %v8750_v1  ;;  %485 = vmatprep.subr.mxu0 %v6107_v45 }
  0xc3   :  { %486 = vmatpush1.msra.mxu0 %v6114_v46  ;;  %4401 = vmatprep.subr.mxu1 %v8750_v1 }
  0xc4   :  { %487 = vmatprep.subr.mxu0 %v6121_v47  ;;  %4402 = vmatpush3.msra.mxu1 %v6184_v57 }
  0xc5   :  { %488 = vmatpush1.msra.mxu0 %v6134_v49  ;;  %4403 = vmatprep.subr.mxu1 %v8750_v1 }
  0xc6   :  { %489 = vmatprep.subr.mxu0 %v6140_v50  ;;  %4404 = vmatpush3.msra.mxu1 %v6203_v60 }
  0xc7   :  { %490 = vmatpush1.msra.mxu0 %v6152_v52  ;;  %549 = vmatprep.mubr.f32.mxu0 %v8750_v1 }
  0xc8   :  { %491 = vmatprep.subr.mxu0 %v6159_v53  ;;  %4408 = vmatprep.subr.mxu1 %v8750_v1  ;;  %v6299_v53 = vld [vmem:[%s9022_s10 + $0x78] sm:$0xff] }
  0xc9   :  { %492 = vmatpush1.msra.mxu0 %v6171_v55  ;;  %4406 = vmatmul.mubr.f32.vlgmr.msra.gmra.mxu1 %v8750_v1  ;;  %v6268_v1 = vld [vmem:[%s9022_s10 + $0x98] sm:$0xff]  ;;  %v6280_v55 = vld [vmem:[%s9022_s10 + $0x90] sm:$0xff]  ;;  %9047 = vst [vmem:[#allocation73_spill] sm:$0xff] %v6299_v53 }
  0xca   :  { %493 = vmatprep.subr.mxu0 %v6178_v56  ;;  %v6261_v56 = vld [vmem:[%s9022_s10 + $0xa8] sm:$0xff]  ;;  %9041 = vst [vmem:[#allocation68_spill] sm:$0xff] %v6268_v1  ;;  %9044 = vst [vmem:[#allocation70_spill] sm:$0xff] %v6280_v55 }
  0xcb   :  { %494 = vmatpush1.msra.mxu0 %v6190_v58  ;;  %v6242_v58 = vld [vmem:[%s9022_s10 + $0xc0] sm:$0xff]  ;;  %9040 = vst [vmem:[#allocation67_spill] sm:$0xff] %v6261_v56 }
  0xcc   :  { %495 = vmatprep.subr.mxu0 %v6197_v59  ;;  %v6236_v59 = vld [vmem:[%s9022_s10 + $0x178] sm:$0xff]  ;;  %9038 = vst [vmem:[#allocation65_spill] sm:$0xff] %v6242_v58 }
  0xcd   :  { %496 = vmatpush1.msra.mxu0 %v6209_v61  ;;  %v6249_v61 = vld [vmem:[%s9022_s10 + $0xb0] sm:$0xff]  ;;  %4409 = vmatpush3.msra.mxu1 %v6236_v59 }
  0xce   :  { %497 = vmatprep.subr.mxu0 %v6216_v62  ;;  %9039 = vst [vmem:[#allocation66_spill] sm:$0xff] %v6249_v61  ;;  %v6255_v62 = vld [vmem:[%s9022_s10 + $0x160] sm:$0xff] }
  0xcf   :  { %498 = vmatpush1.msra.mxu0 %v6223_v63  ;;  %v9042_v63 = vmov 0.0  }
  0xd0   :  { %499 = vmatprep.subr.mxu0 %v6230_v0  ;;  %4410 = vmatprep.subr.mxu1 %v9042_v63  ;;  %v6274_v0 = vld [vmem:[%s9022_s10 + $0x148] sm:$0xff] }
  0xd1   :  { %500 = vmatpush1.msra.mxu0 %v6242_v58  ;;  %9043 = vst [vmem:[#allocation69_spill] sm:$0xff] %v6274_v0  ;;  %4411 = vmatpush3.msra.mxu1 %v6255_v62  ;;  %v6287_v58 = vld [vmem:[%s9022_s10 + $0x80] sm:$0xff] }
  0xd2   :  { %501 = vmatprep.subr.mxu0 %v6249_v61  ;;  %9045 = vst [vmem:[#allocation71_spill] sm:$0xff] %v6287_v58  ;;  %4412 = vmatprep.subr.mxu1 %v9042_v63  ;;  %v6293_v61 = vld [vmem:[%s9022_s10 + $0x130] sm:$0xff] }
  0xd3   :  { %502 = vmatpush1.msra.mxu0 %v6261_v56  ;;  %9046 = vst [vmem:[#allocation72_spill] sm:$0xff] %v6293_v61  ;;  %4413 = vmatpush3.msra.mxu1 %v6274_v0  ;;  %v6306_v56 = vld [vmem:[%s9022_s10 + $0x68] sm:$0xff]  ;;  %v6318_v0 = vld [vmem:[%s9022_s10 + $0x60] sm:$0xff] }
  0xd4   :  { %503 = vmatprep.subr.mxu0 %v6268_v1  ;;  %9048 = vst [vmem:[#allocation74_spill] sm:$0xff] %v6306_v56  ;;  %4414 = vmatprep.subr.mxu1 %v9042_v63  ;;  %v6312_v1 = vld [vmem:[%s9022_s10 + $0x118] sm:$0xff]  ;;  %9050 = vst [vmem:[#allocation76_spill] sm:$0xff] %v6318_v0 }
  0xd5   :  { %504 = vmatpush1.msra.mxu0 %v6280_v55  ;;  %9049 = vst [vmem:[#allocation75_spill] sm:$0xff] %v6312_v1  ;;  %4415 = vmatpush3.msra.mxu1 %v6293_v61  ;;  %v6325_v55 = vld [vmem:[%s9022_s10 + $0x50] sm:$0xff]  ;;  %v6337_v61 = vld [vmem:[%s9022_s10 + $0x48] sm:$0xff] }
  0xd6   :  { %505 = vmatprep.subr.mxu0 %v6287_v58  ;;  %9051 = vst [vmem:[#allocation77_spill] sm:$0xff] %v6325_v55  ;;  %4416 = vmatprep.subr.mxu1 %v9042_v63  ;;  %v6331_v58 = vld [vmem:[%s9022_s10 + $0x100] sm:$0xff]  ;;  %9053 = vst [vmem:[#allocation79_spill] sm:$0xff] %v6337_v61 }
  0xd7   :  { %506 = vmatpush1.msra.mxu0 %v6299_v53  ;;  %9052 = vst [vmem:[#allocation78_spill] sm:$0xff] %v6331_v58  ;;  %4417 = vmatpush3.msra.mxu1 %v6312_v1  ;;  %v6344_v53 = vld [vmem:[%s9022_s10 + $0x38] sm:$0xff]  ;;  %v6356_v1 = vld [vmem:[%s9022_s10 + $0x30] sm:$0xff] }
  0xd8   :  { %507 = vmatprep.subr.mxu0 %v6306_v56  ;;  %9054 = vst [vmem:[#allocation80_spill] sm:$0xff] %v6344_v53  ;;  %4418 = vmatprep.subr.mxu1 %v9042_v63  ;;  %v6350_v56 = vld [vmem:[%s9022_s10 + $0xe8] sm:$0xff]  ;;  %9056 = vst [vmem:[#allocation82_spill] sm:$0xff] %v6356_v1 }
  0xd9   :  { %508 = vmatpush1.msra.mxu0 %v6318_v0  ;;  %9055 = vst [vmem:[#allocation81_spill] sm:$0xff] %v6350_v56  ;;  %4419 = vmatpush3.msra.mxu1 %v6331_v58  ;;  %v6363_v0 = vld [vmem:[%s9022_s10 + $0x20] sm:$0xff]  ;;  %v6375_v58 = vld [vmem:[%s9022_s10 + $0x18] sm:$0xff] }
  0xda   :  { %509 = vmatprep.subr.mxu0 %v6325_v55  ;;  %9057 = vst [vmem:[#allocation83_spill] sm:$0xff] %v6363_v0  ;;  %4420 = vmatprep.subr.mxu1 %v9042_v63  ;;  %v6369_v55 = vld [vmem:[%s9022_s10 + $0xd0] sm:$0xff]  ;;  %9059 = vst [vmem:[#allocation85_spill] sm:$0xff] %v6375_v58 }
  0xdb   :  { %510 = vmatpush1.msra.mxu0 %v6337_v61  ;;  %9058 = vst [vmem:[#allocation84_spill] sm:$0xff] %v6369_v55  ;;  %4421 = vmatpush3.msra.mxu1 %v6350_v56  ;;  %v6382_v61 = vld [vmem:[%s9022_s10 + $0x8] sm:$0xff]  ;;  %v6394_v56 = vld [vmem:[%s9022_s10] sm:$0xff] }
  0xdc   :  { %511 = vmatprep.subr.mxu0 %v6344_v53  ;;  %9060 = vst [vmem:[#allocation86_spill] sm:$0xff] %v6382_v61  ;;  %4422 = vmatprep.subr.mxu1 %v9042_v63  ;;  %v6388_v53 = vld [vmem:[%s9022_s10 + $0xb8] sm:$0xff]  ;;  %9062 = vst [vmem:[#allocation88_spill] sm:$0xff] %v6394_v56 }
  0xdd   :  { %512 = vmatpush1.msra.mxu0 %v6356_v1  ;;  %9061 = vst [vmem:[#allocation87_spill] sm:$0xff] %v6388_v53  ;;  %4423 = vmatpush3.msra.mxu1 %v6369_v55  ;;  %v6402_v1 = vld [vmem:[%s9022_s10 + $0xa0] sm:$0xff] }
  0xde   :  { %513 = vmatprep.subr.mxu0 %v6363_v0  ;;  %4424 = vmatprep.subr.mxu1 %v9042_v63  ;;  %9063 = vst [vmem:[#allocation89_spill] sm:$0xff] %v6402_v1  ;;  %v6411_v0 = vld [vmem:[%s9022_s10 + $0x88] sm:$0xff] }
  0xdf   :  { %514 = vmatpush1.msra.mxu0 %v6375_v58  ;;  %4425 = vmatpush3.msra.mxu1 %v6388_v53  ;;  %9064 = vst [vmem:[#allocation90_spill] sm:$0xff] %v6411_v0  ;;  %v6438_v58 = vld [vmem:[%s9022_s10 + $0x40] sm:$0xff] }
  0xe0   :  { %515 = vmatprep.subr.mxu0 %v6382_v61  ;;  %4426 = vmatprep.subr.mxu1 %v9042_v63  ;;  %v6419_v61 = vld [vmem:[%s9022_s10 + $0x70] sm:$0xff] }
  0xe1   :  { %516 = vmatpush1.msra.mxu0 %v6394_v56  ;;  %4427 = vmatpush3.msra.mxu1 %v6402_v1  ;;  %9065 = vst [vmem:[#allocation91_spill] sm:$0xff] %v6419_v61  ;;  %v6429_v56 = vld [vmem:[%s9022_s10 + $0x58] sm:$0xff] }
  0xe2   :  { %550 = vmatmul.mubr.f32.vlgmr.msra.gmra.mxu0 %v9042_v63  ;;  %4428 = vmatprep.subr.mxu1 %v9042_v63  ;;  %9066 = vst [vmem:[#allocation92_spill] sm:$0xff] %v6429_v56 }
  0xe3   :  { %4440 = vmatprep.mubr.msk.f32.mxu1 %vm5679_vm0, %v9042_v63  ;;  %4429 = vmatpush3.msra.mxu1 %v6411_v0 }
  0xe4   :  { %684 = vmatprep.subr.mxu0 %v5844_v2  ;;  %4430 = vmatprep.subr.mxu1 %v9042_v63 }
  0xe5   :  { %685 = vmatpush1.msra.mxu0 %v5849_v3  ;;  %4431 = vmatpush3.msra.mxu1 %v6419_v61  ;;  %v6447_v3 = vld [vmem:[%s9022_s10 + $0x28] sm:$0xff] }
  0xe6   :  { %686 = vmatprep.subr.mxu0 %v5854_v4  ;;  %4432 = vmatprep.subr.mxu1 %v9042_v63 }
  0xe7   :  { %687 = vmatpush1.msra.mxu0 %v5860_v5  ;;  %4433 = vmatpush3.msra.mxu1 %v6429_v56  ;;  %v6456_v5 = vld [vmem:[%s9022_s10 + $0x10] sm:$0xff] }
  0xe8   :  { %688 = vmatprep.subr.mxu0 %v5866_v6  ;;  %4434 = vmatprep.subr.mxu1 %v9042_v63 }
  0xe9   :  { %689 = vmatpush1.msra.mxu0 %v5872_v7  ;;  %4435 = vmatpush3.msra.mxu1 %v6438_v58 }
  0xea   :  { %690 = vmatprep.subr.mxu0 %v5878_v8  ;;  %4436 = vmatprep.subr.mxu1 %v9042_v63 }
  0xeb   :  { %691 = vmatpush1.msra.mxu0 %v5884_v9  ;;  %4437 = vmatpush3.msra.mxu1 %v6447_v3 }
  0xec   :  { %692 = vmatprep.subr.mxu0 %v5890_v10  ;;  %4438 = vmatprep.subr.mxu1 %v9042_v63 }
  0xed   :  { %693 = vmatpush1.msra.mxu0 %v5896_v11  ;;  %4439 = vmatpush3.msra.mxu1 %v6456_v5 }
  0xee   :  { %694 = vmatprep.subr.mxu0 %v5902_v12  ;;  %4441 = vmatmul.mubr.f32.vlgmr.msra.gmra.mxu1 %v9042_v63 }
  0xef   :  { %4443 = vmatprep.subr.mxu1 %v9042_v63  ;;  %695 = vmatpush1.msra.mxu0 %v5908_v13 }
  0xf0   :  { %4444 = vmatpush3.msra.mxu1 %v5925_v16  ;;  %696 = vmatprep.subr.mxu0 %v5914_v14 }
  0xf1   :  { %4445 = vmatprep.subr.mxu1 %v9042_v63  ;;  %697 = vmatpush1.msra.mxu0 %v5920_v15 }
  0xf2   :  { %4446 = vmatpush3.msra.mxu1 %v5937_v18  ;;  %698 = vmatprep.subr.mxu0 %v5931_v17 }
  0xf3   :  { %4447 = vmatprep.subr.mxu1 %v9042_v63  ;;  %699 = vmatpush1.msra.mxu0 %v5943_v19 }
  0xf4   :  { %4448 = vmatpush3.msra.mxu1 %v5949_v20  ;;  %700 = vmatprep.subr.mxu0 %v5955_v21 }
  0xf5   :  { %4449 = vmatprep.subr.mxu1 %v9042_v63  ;;  %701 = vmatpush1.msra.mxu0 %v5962_v22 }
  0xf6   :  { %4450 = vmatpush3.msra.mxu1 %v5968_v23  ;;  %702 = vmatprep.subr.mxu0 %v5974_v24 }
  0xf7   :  { %4451 = vmatprep.subr.mxu1 %v9042_v63  ;;  %703 = vmatpush1.msra.mxu0 %v5981_v25 }
  0xf8   :  { %4452 = vmatpush3.msra.mxu1 %v5987_v26  ;;  %704 = vmatprep.subr.mxu0 %v5993_v27 }
  0xf9   :  { %4453 = vmatprep.subr.mxu1 %v9042_v63  ;;  %705 = vmatpush1.msra.mxu0 %v6000_v28 }
  0xfa   :  { %4454 = vmatpush3.msra.mxu1 %v6006_v29  ;;  %706 = vmatprep.subr.mxu0 %v6012_v30 }
  0xfb   :  { %4455 = vmatprep.subr.mxu1 %v9042_v63  ;;  %707 = vmatpush1.msra.mxu0 %v6019_v31 }
  0xfc   :  { %4456 = vmatpush3.msra.mxu1 %v6025_v32  ;;  %708 = vmatprep.subr.mxu0 %v6031_v33 }
  0xfd   :  { %4457 = vmatprep.subr.mxu1 %v9042_v63  ;;  %709 = vmatpush1.msra.mxu0 %v6038_v34 }
  0xfe   :  { %4458 = vmatpush3.msra.mxu1 %v6044_v35  ;;  %710 = vmatprep.subr.mxu0 %v6050_v36 }
  0xff   :  { %4459 = vmatprep.subr.mxu1 %v9042_v63  ;;  %711 = vmatpush1.msra.mxu0 %v6057_v37 }
 0x100   :  { %4460 = vmatpush3.msra.mxu1 %v6063_v38  ;;  %712 = vmatprep.subr.mxu0 %v6069_v39 }
 0x101   :  { %4461 = vmatprep.subr.mxu1 %v9042_v63  ;;  %713 = vmatpush1.msra.mxu0 %v6076_v40  ;;  %v262_v40 = vld [vmem:[%s8720_s4] sm:$0x7] }
 0x102   :  { %4462 = vmatpush3.msra.mxu1 %v6082_v41  ;;  %714 = vmatprep.subr.mxu0 %v6088_v42 }
 0x103   :  { %4463 = vmatprep.subr.mxu1 %v9042_v63  ;;  %715 = vmatpush1.msra.mxu0 %v6095_v43  ;;  %v8814_v43 = vlaneseq }
 0x104   :  { %4464 = vmatpush3.msra.mxu1 %v6101_v44  ;;  %748 = vmatprep.mubr.f32.mxu0 %v9042_v63 }
 0x105   :  { %4465 = vmatprep.subr.mxu1 %v9042_v63  ;;  %4475 = vmatprep.mubr.msk.f32.mxu1 %vm5679_vm0, %v9042_v63  ;;  %v6525_v42 = vshrl.u32 %v8814_v43, 7 }
 0x106   :  { %4466 = vmatpush3.msra.mxu1 %v6127_v48  ;;  %825 = vmatprep.subr.mxu0 %v6107_v45 }
 0x107   :  { %4467 = vmatprep.subr.mxu1 %v9042_v63  ;;  %9067 = vst [vmem:[#allocation93_spill] sm:$0xff] %v6525_v42  ;;  %v6528_v45 = vsub.s32 0, %v6525_v42 }
 0x108   :  { %4468 = vmatpush3.msra.mxu1 %v6146_v51 }
 0x109   :  { %4469 = vmatprep.subr.mxu1 %v9042_v63  ;;  %9068 = vst [vmem:[#allocation94_spill] sm:$0xff] %v6528_v45  ;;  %v6534_v39 = vrot.slane %v262_v40, %v6528_v45 }
 0x10a   :  { %4470 = vmatpush3.msra.mxu1 %v6165_v54  ;;  %v626_v54 = vld [vmem:[%s9071_s13] sm:$0xff] }
 0x10b   :  { %4471 = vmatprep.subr.mxu1 %v9042_v63  ;;  %9069 = vst [vmem:[#allocation95_spill] sm:$0xff] %v6534_v39  ;;  %v639_v48 = vrot.slane %v626_v54, 2 }
 0x10c   :  { %4472 = vmatpush3.msra.mxu1 %v6184_v57  ;;  %v6537_v57 = vsub.s32 1, %v6525_v42 }
 0x10d   :  { %4473 = vmatprep.subr.mxu1 %v9042_v63 }
 0x10e   :  { %4474 = vmatpush3.msra.mxu1 %v6203_v60  ;;  %9070 = vst [vmem:[#allocation96_spill] sm:$0xff] %v6537_v57  ;;  %v6544_v37 = vrot.slane %v262_v40, %v6537_v57 }
 0x10f   :  { %4478 = vmatprep.subr.mxu1 %v9042_v63 }
 0x110   :  { %9072 = vst [vmem:[#allocation97_spill] sm:$0xff] %v6544_v37 }
 0x182   :  { %v345_v60 = vpop.f32.mrf.mxu0 }
 0x183   :  { %v346_v43 = vadd.f32 %v345_v60, %v6534_v39  ;;  %v274_v60 = vsub.s32 2, %v6525_v42  ;;  %v468_v39 = vld [vmem:[#allocation3] sm:$0x7] }
 0x184   :  { %v347_v36 = vpop.f32.mrf.mxu0 }
 0x185   :  { %v631_v51 = vadd.f32 %v626_v54, %v346_v43  ;;  %v348_v33 = vadd.f32 %v347_v36, %v6544_v37  ;;  %v3871_v43 = vld [vmem:[%s9071_s13 + $0x54] sm:$0xff]  ;;  %v6554_v36 = vrot.slane %v262_v40, %v274_v60  ;;  %v649_v37 = vrot.slane %v626_v54, 4 }
 0x187   :  { %v3873_v34 = vmul.f32 -1.442695, %v631_v51  ;;  %v641_v31 = vadd.f32 %v639_v48, %v348_v33  ;;  %v6552_v51 = vrot.slane %v468_v39, %v6528_v45  ;;  %9074 = vst [vmem:[#allocation99_spill] sm:$0xff] %v6554_v36 }
 0x189   :  { %5024 = vpow2.f32 %v3873_v34  ;;  %v3874_v30 = vmul.f32 -1.442695, %v641_v31  ;;  %v416_v44 = vpop.f32.mrf.mxu1  ;;  %9073 = vst [vmem:[#allocation98_spill] sm:$0xff] %v6552_v51  ;;  %v658_v31 = vrot.slane %v3871_v43, 6  ;;  %v3872_v43 = vld [vmem:[%s9071_s13 + $0x5c] sm:$0xf] }
 0x18b   :  { %v4407_v28 = vpop.f32.mrf.mxu1  ;;  %5026 = vpow2.f32 %v3874_v30 }
 0x196   :  { %v5025_v27 = vpop.eup %5024 }
 0x197   :  { %v635_v41 = vadd.f32 1.0, %v5025_v27  ;;  %v417_v27 = vadd.f32 %v416_v44, %v6554_v36 }
 0x198   :  { %v5027_v33 = vpop.eup %5026 }
 0x199   :  { %5028 = vrcp.f32 %v635_v41  ;;  %v645_v28 = vadd.f32 1.0, %v5027_v33  ;;  %v6559_v41 = vrot.slane %v468_v39, %v6537_v57 }
 0x19b   :  { %5030 = vrcp.f32 %v645_v28 }
 0x1a2   :  { %v551_v34 = vpop.f32.mrf.mxu0 }
 0x1a3   :  { %v552_v30 = vadd.f32 %v551_v34, %v6552_v51 }
 0x1a4   :  { %v553_v48 = vpop.f32.mrf.mxu0 }
 0x1a5   :  { %v660_v42 = vadd.f32 %v658_v31, %v552_v30  ;;  %v554_v40 = vadd.f32 %v553_v48, %v6559_v41 }
 0x1a6   :  { %v5029_v25 = vpop.eup %5028 }
 0x1a7   :  { %v3875_v45 = vmul.f32 -1.442695, %v660_v42  ;;  %v648_v24 = vmul.f32 %v5029_v25, %v417_v27  ;;  %v667_v44 = vadd.f32 %v3872_v43, %v554_v40 }
 0x1a8   :  { %v5031_v31 = vpop.eup %5030 }
 0x1a9   :  { %5032 = vpow2.f32 %v3875_v45  ;;  %v651_v33 = vadd.f32 %v649_v37, %v648_v24  ;;  %v3876_v34 = vmul.f32 -1.442695, %v667_v44  ;;  %v653_v28 = vsub.f32 1.0, %v5031_v31  ;;  %v9075_v45 = vld [vmem:[#allocation69_spill] sm:$0xff] }
 0x1aa   :  { %v655_v27 = vmul.f32 0.0, %v5031_v31  ;;  %v6573_v24 = vrot.slane %v468_v39, %v274_v60  ;;  %v9077_v39 = vld [vmem:[#allocation55_spill] sm:$0xff]  ;;  %v9078_v60 = vld [vmem:[#allocation72_spill] sm:$0xff]  ;;  %v676_v44 = vrot.slane %v3872_v43, 2 }
 0x1ab   :  { %5034 = vtanh.f32 %v651_v33  ;;  %v9076_v33 = vld [vmem:[#allocation53_spill] sm:$0xff] }
 0x1ac   :  { %5036 = vpow2.f32 %v3876_v34  ;;  %v9079_v34 = vld [vmem:[#allocation56_spill] sm:$0xff] }
 0x1ae   :  { %v622_v57 = vpop.f32.mrf.mxu1 }
 0x1af   :  { %v623_v40 = vadd.f32 %v622_v57, %v6573_v24 }
 0x1b0   :  { %v4442_v36 = vpop.f32.mrf.mxu1 }
 0x1b6   :  { %v5033_v54 = vpop.eup %5032 }
 0x1b7   :  { %v664_v30 = vadd.f32 1.0, %v5033_v54  ;;  %v9080_v54 = vld [vmem:[#allocation58_spill] sm:$0xff] }
 0x1b8   :  { %v5035_v42 = vpop.eup %5034 }
 0x1b9   :  { %5038 = vrcp.f32 %v664_v30  ;;  %v654_v25 = vmul.f32 %v5035_v42, %v653_v28  ;;  %v5037_v37 = vpop.eup %5036  ;;  %v9081_v30 = vld [vmem:[#allocation75_spill] sm:$0xff]  ;;  %v9083_v42 = vld [vmem:[#allocation61_spill] sm:$0xff] }
 0x1ba   :  { %v671_v36 = vadd.f32 1.0, %v5037_v37  ;;  %v9082_v28 = vld [vmem:[#allocation59_spill] sm:$0xff] }
 0x1bb   :  { %v6565_v48 = vadd.f32 %v655_v27, %v654_v25  ;;  %v9084_v25 = vld [vmem:[#allocation78_spill] sm:$0xff]  ;;  %v9086_v37 = vld [vmem:[#allocation63_spill] sm:$0xff] }
 0x1bc   :  { %5040 = vrcp.f32 %v671_v36  ;;  %v9085_v27 = vld [vmem:[#allocation62_spill] sm:$0xff]  ;;  %v9088_v36 = vld [vmem:[#allocation64_spill] sm:$0xff] }
 0x1bd   :  { %749 = vmatmul.mubr.f32.vlgmr.msra.gmra.mxu0 %v6565_v48  ;;  %4476 = vmatmul.mubr.f32.vlgmr.msra.gmra.mxu1 %v6565_v48 }
 0x1be   :  { %826 = vmatpush1.msra.mxu0 %v6114_v46  ;;  %4479 = vmatpush3.msra.mxu1 %v6236_v59 }
 0x1bf   :  { %827 = vmatprep.subr.mxu0 %v6121_v47  ;;  %4480 = vmatprep.subr.mxu1 %v9042_v63 }
 0x1c0   :  { %828 = vmatpush1.msra.mxu0 %v6134_v49  ;;  %4481 = vmatpush3.msra.mxu1 %v6255_v62 }
 0x1c1   :  { %829 = vmatprep.subr.mxu0 %v6140_v50  ;;  %4482 = vmatprep.subr.mxu1 %v9042_v63 }
 0x1c2   :  { %830 = vmatpush1.msra.mxu0 %v6152_v52  ;;  %4483 = vmatpush3.msra.mxu1 %v9075_v45 }
 0x1c3   :  { %831 = vmatprep.subr.mxu0 %v9076_v33  ;;  %4484 = vmatprep.subr.mxu1 %v9042_v63 }
 0x1c4   :  { %832 = vmatpush1.msra.mxu0 %v9077_v39  ;;  %4485 = vmatpush3.msra.mxu1 %v9078_v60 }
 0x1c5   :  { %833 = vmatprep.subr.mxu0 %v9079_v34  ;;  %4486 = vmatprep.subr.mxu1 %v9042_v63 }
 0x1c6   :  { %v5039_v31 = vpop.eup %5038  ;;  %834 = vmatpush1.msra.mxu0 %v9080_v54  ;;  %4487 = vmatpush3.msra.mxu1 %v9081_v30  ;;  %v9087_v54 = vld [vmem:[#allocation81_spill] sm:$0xff] }
 0x1c7   :  { %v674_v57 = vmul.f32 %v5039_v31, %v623_v40  ;;  %835 = vmatprep.subr.mxu0 %v9082_v28  ;;  %4488 = vmatprep.subr.mxu1 %v9042_v63  ;;  %v9089_v40 = vld [vmem:[#allocation65_spill] sm:$0xff]  ;;  %v9090_v31 = vld [vmem:[#allocation66_spill] sm:$0xff] }
 0x1c8   :  { %836 = vmatpush1.msra.mxu0 %v9083_v42  ;;  %4489 = vmatpush3.msra.mxu1 %v9084_v25 }
 0x1c9   :  { %v678_v43 = vadd.f32 %v676_v44, %v674_v57  ;;  %837 = vmatprep.subr.mxu0 %v9085_v27  ;;  %4490 = vmatprep.subr.mxu1 %v9042_v63  ;;  %v9091_v44 = vld [vmem:[#allocation67_spill] sm:$0xff]  ;;  %v9092_v57 = vld [vmem:[#allocation68_spill] sm:$0xff] }
 0x1ca   :  { %838 = vmatpush1.msra.mxu0 %v9086_v37  ;;  %4491 = vmatpush3.msra.mxu1 %v9087_v54 }
 0x1cb   :  { %5042 = vtanh.f32 %v678_v43  ;;  %839 = vmatprep.subr.mxu0 %v9088_v36  ;;  %4492 = vmatprep.subr.mxu1 %v9042_v63  ;;  %v9093_v43 = vld [vmem:[#allocation70_spill] sm:$0xff]  ;;  %v9094_v36 = vld [vmem:[#allocation71_spill] sm:$0xff] }
 0x1cc   :  { %840 = vmatpush1.msra.mxu0 %v9089_v40  ;;  %4493 = vmatpush3.msra.mxu1 %v6369_v55  ;;  %v9095_v55 = vld [vmem:[#allocation73_spill] sm:$0xff] }
 0x1cd   :  { %841 = vmatprep.subr.mxu0 %v9090_v31  ;;  %4494 = vmatprep.subr.mxu1 %v9042_v63  ;;  %v9096_v31 = vld [vmem:[#allocation74_spill] sm:$0xff] }
 0x1ce   :  { %842 = vmatpush1.msra.mxu0 %v9091_v44  ;;  %4495 = vmatpush3.msra.mxu1 %v6388_v53  ;;  %v5041_v53 = vpop.eup %5040  ;;  %v9103_v44 = vld [vmem:[#allocation85_spill] sm:$0xff] }
 0x1cf   :  { %843 = vmatprep.subr.mxu0 %v9092_v57  ;;  %4496 = vmatprep.subr.mxu1 %v9042_v63  ;;  %v9097_v57 = vld [vmem:[#allocation76_spill] sm:$0xff] }
 0x1d0   :  { %844 = vmatpush1.msra.mxu0 %v9093_v43  ;;  %4497 = vmatpush3.msra.mxu1 %v6402_v1  ;;  %v9098_v43 = vld [vmem:[#allocation77_spill] sm:$0xff]  ;;  %v9101_v1 = vld [vmem:[#allocation82_spill] sm:$0xff] }
 0x1d1   :  { %845 = vmatprep.subr.mxu0 %v9094_v36  ;;  %4498 = vmatprep.subr.mxu1 %v9042_v63  ;;  %v9099_v36 = vld [vmem:[#allocation79_spill] sm:$0xff] }
 0x1d2   :  { %846 = vmatpush1.msra.mxu0 %v9095_v55  ;;  %4499 = vmatpush3.msra.mxu1 %v6411_v0  ;;  %v9100_v55 = vld [vmem:[#allocation80_spill] sm:$0xff] }
 0x1d3   :  { %847 = vmatprep.subr.mxu0 %v9096_v31  ;;  %4500 = vmatprep.subr.mxu1 %v9042_v63  ;;  %v680_v31 = vsub.f32 1.0, %v5041_v53 }
 0x1d4   :  { %848 = vmatpush1.msra.mxu0 %v9097_v57  ;;  %4501 = vmatpush3.msra.mxu1 %v6419_v61  ;;  %v9102_v57 = vld [vmem:[#allocation83_spill] sm:$0xff]  ;;  %v682_v61 = vmul.f32 0.0, %v5041_v53  ;;  %v9106_v53 = vld [vmem:[#allocation32_spill] sm:$0xff] }
 0x1d5   :  { %849 = vmatprep.subr.mxu0 %v9098_v43  ;;  %4502 = vmatprep.subr.mxu1 %v9042_v63 }
 0x1d6   :  { %850 = vmatpush1.msra.mxu0 %v9099_v36  ;;  %4503 = vmatpush3.msra.mxu1 %v6429_v56  ;;  %v9104_v56 = vld [vmem:[#allocation86_spill] sm:$0xff]  ;;  %v9105_v36 = vld [vmem:[#allocation88_spill] sm:$0xff] }
 0x1d7   :  { %851 = vmatprep.subr.mxu0 %v9100_v55  ;;  %4504 = vmatprep.subr.mxu1 %v9042_v63 }
 0x1d8   :  { %v5043_v0 = vpop.eup %5042  ;;  %852 = vmatpush1.msra.mxu0 %v9101_v1  ;;  %4505 = vmatpush3.msra.mxu1 %v6438_v58 }
 0x1d9   :  { %853 = vmatprep.subr.mxu0 %v9102_v57  ;;  %4506 = vmatprep.subr.mxu1 %v9042_v63  ;;  %v681_v43 = vmul.f32 %v5043_v0, %v680_v31  ;;  %v9130_v0 = vld [vmem:[#allocation95_spill] sm:$0xff] }
 0x1da   :  { %854 = vmatpush1.msra.mxu0 %v9103_v44  ;;  %4507 = vmatpush3.msra.mxu1 %v6447_v3 }
 0x1db   :  { %855 = vmatprep.subr.mxu0 %v9104_v56  ;;  %4508 = vmatprep.subr.mxu1 %v9042_v63  ;;  %v6632_v55 = vadd.f32 %v682_v61, %v681_v43  ;;  %v9107_v61 = vld [vmem:[#allocation33_spill] sm:$0xff] }
 0x1dc   :  { %856 = vmatpush1.msra.mxu0 %v9105_v36  ;;  %889 = vmatprep.mubr.f32.mxu0 %v9042_v63 }
 0x1dd   :  { %4509 = vmatpush3.msra.mxu1 %v6456_v5  ;;  %4510 = vmatprep.mubr.msk.f32.mxu1 %vm5679_vm0, %v9042_v63 }
 0x1de   :  { %890 = vmatmul.mubr.f32.vlgmr.msra.gmra.mxu0 %v6632_v55  ;;  %4511 = vmatmul.mubr.f32.vlgmr.msra.gmra.mxu1 %v6632_v55 }
 0x1df   :  { %1025 = vmatprep.subr.mxu0 %v5844_v2  ;;  %4513 = vmatprep.subr.mxu1 %v9042_v63  ;;  %v9108_v2 = vld [vmem:[#allocation34_spill] sm:$0xff] }
 0x1e0   :  { %1026 = vmatpush1.msra.mxu0 %v9106_v53  ;;  %4514 = vmatpush3.msra.mxu1 %v5925_v16  ;;  %v9120_v16 = vld [vmem:[#allocation42_spill] sm:$0xff] }
 0x1e1   :  { %1027 = vmatprep.subr.mxu0 %v5854_v4  ;;  %4515 = vmatprep.subr.mxu1 %v9042_v63  ;;  %v9109_v4 = vld [vmem:[#allocation35_spill] sm:$0xff] }
 0x1e2   :  { %1028 = vmatpush1.msra.mxu0 %v9107_v61  ;;  %4516 = vmatpush3.msra.mxu1 %v5937_v18  ;;  %v9122_v18 = vld [vmem:[#allocation54_spill] sm:$0xff] }
 0x1e3   :  { %1029 = vmatprep.subr.mxu0 %v5866_v6  ;;  %4517 = vmatprep.subr.mxu1 %v9042_v63  ;;  %v9110_v6 = vld [vmem:[#allocation46_spill] sm:$0xff] }
 0x1e4   :  { %1030 = vmatpush1.msra.mxu0 %v5872_v7  ;;  %4518 = vmatpush3.msra.mxu1 %v5949_v20  ;;  %v9111_v7 = vld [vmem:[#allocation36_spill] sm:$0xff]  ;;  %v9124_v20 = vld [vmem:[#allocation45_spill] sm:$0xff] }
 0x1e5   :  { %1031 = vmatprep.subr.mxu0 %v5878_v8  ;;  %4519 = vmatprep.subr.mxu1 %v9042_v63  ;;  %v9112_v8 = vld [vmem:[#allocation37_spill] sm:$0xff] }
 0x1e6   :  { %1032 = vmatpush1.msra.mxu0 %v5884_v9  ;;  %4520 = vmatpush3.msra.mxu1 %v5968_v23  ;;  %v9113_v9 = vld [vmem:[#allocation49_spill] sm:$0xff]  ;;  %v9127_v23 = vld [vmem:[#allocation48_spill] sm:$0xff] }
 0x1e7   :  { %1033 = vmatprep.subr.mxu0 %v5890_v10  ;;  %4521 = vmatprep.subr.mxu1 %v9042_v63  ;;  %v9114_v10 = vld [vmem:[#allocation38_spill] sm:$0xff] }
 0x1e8   :  { %1034 = vmatpush1.msra.mxu0 %v5896_v11  ;;  %4522 = vmatpush3.msra.mxu1 %v5987_v26  ;;  %v9115_v11 = vld [vmem:[#allocation39_spill] sm:$0xff]  ;;  %v9128_v26 = vld [vmem:[#allocation60_spill] sm:$0xff] }
 0x1e9   :  { %1035 = vmatprep.subr.mxu0 %v5902_v12  ;;  %4523 = vmatprep.subr.mxu1 %v9042_v63  ;;  %v9116_v12 = vld [vmem:[#allocation51_spill] sm:$0xff] }
 0x1ea   :  { %1036 = vmatpush1.msra.mxu0 %v5908_v13  ;;  %4524 = vmatpush3.msra.mxu1 %v6006_v29  ;;  %v9117_v13 = vld [vmem:[#allocation40_spill] sm:$0xff]  ;;  %v9129_v29 = vld [vmem:[#allocation50_spill] sm:$0xff] }
 0x1eb   :  { %1037 = vmatprep.subr.mxu0 %v5914_v14  ;;  %4525 = vmatprep.subr.mxu1 %v9042_v63  ;;  %v9118_v14 = vld [vmem:[#allocation41_spill] sm:$0xff] }
 0x1ec   :  { %1038 = vmatpush1.msra.mxu0 %v5920_v15  ;;  %4526 = vmatpush3.msra.mxu1 %v6025_v32  ;;  %v9119_v15 = vld [vmem:[#allocation52_spill] sm:$0xff] }
 0x1ed   :  { %1039 = vmatprep.subr.mxu0 %v5931_v17  ;;  %4527 = vmatprep.subr.mxu1 %v9042_v63  ;;  %v9121_v17 = vld [vmem:[#allocation43_spill] sm:$0xff] }
 0x1ee   :  { %1040 = vmatpush1.msra.mxu0 %v5943_v19  ;;  %4528 = vmatpush3.msra.mxu1 %v6044_v35  ;;  %v9123_v19 = vld [vmem:[#allocation44_spill] sm:$0xff] }
 0x1ef   :  { %1041 = vmatprep.subr.mxu0 %v5955_v21  ;;  %4529 = vmatprep.subr.mxu1 %v9042_v63  ;;  %v9125_v21 = vld [vmem:[#allocation57_spill] sm:$0xff]  ;;  %v3877_v35 = vld [vmem:[%s9071_s13 + $0xc] sm:$0xff] }
 0x1f0   :  { %1042 = vmatpush1.msra.mxu0 %v5962_v22  ;;  %4530 = vmatpush3.msra.mxu1 %v6063_v38  ;;  %v9126_v22 = vld [vmem:[#allocation47_spill] sm:$0xff] }
 0x1f1   :  { %1043 = vmatprep.subr.mxu0 %v9108_v2  ;;  %4531 = vmatprep.subr.mxu1 %v9042_v63 }
 0x1f2   :  { %1044 = vmatpush1.msra.mxu0 %v9109_v4  ;;  %4532 = vmatpush3.msra.mxu1 %v9110_v6  ;;  %v9131_v4 = vld [vmem:[#allocation97_spill] sm:$0xff] }
 0x1f3   :  { %1045 = vmatprep.subr.mxu0 %v9111_v7  ;;  %4533 = vmatprep.subr.mxu1 %v9042_v63  ;;  %v980_v7 = vrot.slane %v3877_v35, 2 }
 0x1f4   :  { %1046 = vmatpush1.msra.mxu0 %v9112_v8  ;;  %4534 = vmatpush3.msra.mxu1 %v9113_v9 }
 0x1f5   :  { %1047 = vmatprep.subr.mxu0 %v9114_v10  ;;  %4535 = vmatprep.subr.mxu1 %v9042_v63 }
 0x1f6   :  { %1048 = vmatpush1.msra.mxu0 %v9115_v11  ;;  %4536 = vmatpush3.msra.mxu1 %v9116_v12  ;;  %v3879_v12 = vld [vmem:[%s9071_s13 + $0x48] sm:$0xff] }
 0x1f7   :  { %1049 = vmatprep.subr.mxu0 %v9117_v13  ;;  %4537 = vmatprep.subr.mxu1 %v9042_v63 }
 0x1f8   :  { %1050 = vmatpush1.msra.mxu0 %v9118_v14  ;;  %4538 = vmatpush3.msra.mxu1 %v9119_v15  ;;  %v999_v14 = vrot.slane %v3879_v12, 6 }
 0x1f9   :  { %1051 = vmatprep.subr.mxu0 %v9120_v16  ;;  %4539 = vmatprep.subr.mxu1 %v9042_v63 }
 0x1fa   :  { %1052 = vmatpush1.msra.mxu0 %v9121_v17  ;;  %4540 = vmatpush3.msra.mxu1 %v9122_v18 }
 0x1fb   :  { %1053 = vmatprep.subr.mxu0 %v9123_v19  ;;  %4541 = vmatprep.subr.mxu1 %v9042_v63  ;;  %v9132_v19 = vld [vmem:[#allocation99_spill] sm:$0xff] }
 0x1fc   :  { %1054 = vmatpush1.msra.mxu0 %v9124_v20  ;;  %4542 = vmatpush3.msra.mxu1 %v9125_v21  ;;  %v990_v21 = vrot.slane %v3877_v35, 4 }
 0x1fd   :  { %1055 = vmatprep.subr.mxu0 %v9126_v22  ;;  %4543 = vmatprep.subr.mxu1 %v9042_v63 }
 0x1fe   :  { %1056 = vmatpush1.msra.mxu0 %v9127_v23  ;;  %1089 = vmatprep.mubr.f32.mxu0 %v9042_v63 }
 0x1ff   :  { %4544 = vmatpush3.msra.mxu1 %v9128_v26  ;;  %4545 = vmatprep.mubr.msk.f32.mxu1 %vm5679_vm0, %v9042_v63 }
 0x200   :  { %1166 = vmatprep.subr.mxu0 %v9129_v29  ;;  %4548 = vmatprep.subr.mxu1 %v9042_v63 }
 0x27d   :  { %v750_v32 = vpop.f32.mrf.mxu0  ;;  %v821_v38 = vpop.f32.mrf.mxu1 }
 0x27e   :  { %v751_v31 = vadd.f32 %v750_v32, %v9130_v0  ;;  %v822_v20 = vadd.f32 %v821_v38, %v9132_v19 }
 0x27f   :  { %v752_v43 = vpop.f32.mrf.mxu0  ;;  %v4477_v53 = vpop.f32.mrf.mxu1 }
 0x280   :  { %v972_v61 = vadd.f32 %v3877_v35, %v751_v31  ;;  %v753_v6 = vadd.f32 %v752_v43, %v9131_v4 }
 0x282   :  { %v3881_v2 = vmul.f32 -1.442695, %v972_v61  ;;  %v982_v8 = vadd.f32 %v980_v7, %v753_v6  ;;  %v3880_v61 = vld [vmem:[%s9071_s13 + $0x50] sm:$0xf] }
 0x284   :  { %5044 = vpow2.f32 %v3881_v2  ;;  %v3882_v9 = vmul.f32 -1.442695, %v982_v8 }
 0x286   :  { %5046 = vpow2.f32 %v3882_v9 }
 0x291   :  { %v5045_v10 = vpop.eup %5044 }
 0x292   :  { %v976_v11 = vadd.f32 1.0, %v5045_v10 }
 0x293   :  { %v5047_v13 = vpop.eup %5046 }
 0x294   :  { %5048 = vrcp.f32 %v976_v11  ;;  %v986_v15 = vadd.f32 1.0, %v5047_v13  ;;  %v9147_v13 = vld [vmem:[#allocation91_spill] sm:$0xff] }
 0x296   :  { %5050 = vrcp.f32 %v986_v15  ;;  %v9148_v15 = vld [vmem:[#allocation77_spill] sm:$0xff] }
 0x29e   :  { %v891_v16 = vpop.f32.mrf.mxu0  ;;  %v962_v17 = vpop.f32.mrf.mxu1 }
 0x29f   :  { %v892_v18 = vadd.f32 %v891_v16, %v6552_v51  ;;  %v9149_v16 = vld [vmem:[#allocation79_spill] sm:$0xff] }
 0x2a0   :  { %v893_v22 = vpop.f32.mrf.mxu0  ;;  %v4512_v23 = vpop.f32.mrf.mxu1 }
 0x2a1   :  { %v5049_v26 = vpop.eup %5048  ;;  %v1001_v29 = vadd.f32 %v999_v14, %v892_v18  ;;  %v894_v43 = vadd.f32 %v893_v22, %v6559_v41  ;;  %v9151_v18 = vld [vmem:[#allocation80_spill] sm:$0xff] }
 0x2a2   :  { %v989_v32 = vmul.f32 %v5049_v26, %v822_v20  ;;  %v6854_v26 = vld [vmem:[%s9003_s24 + $0x148] sm:$0xff] }
 0x2a3   :  { %v3883_v31 = vmul.f32 -1.442695, %v1001_v29  ;;  %v1008_v2 = vadd.f32 %v3880_v61, %v894_v43  ;;  %v5051_v38 = vpop.eup %5050  ;;  %v6860_v29 = vld [vmem:[%s9003_s24 + $0x128] sm:$0xff]  ;;  %v6879_v43 = vld [vmem:[%s9003_s24 + $0x110] sm:$0xff] }
 0x2a4   :  { %v992_v53 = vadd.f32 %v990_v21, %v989_v32  ;;  %v994_v7 = vsub.f32 1.0, %v5051_v38  ;;  %v996_v11 = vmul.f32 %v5051_v38, %v6565_v48  ;;  %v6867_v32 = vld [vmem:[%s9003_s24 + $0x120] sm:$0xff] }
 0x2a5   :  { %5052 = vpow2.f32 %v3883_v31  ;;  %v3884_v6 = vmul.f32 -1.442695, %v1008_v2  ;;  %v6873_v31 = vld [vmem:[%s9003_s24 + $0x130] sm:$0xff]  ;;  %v6898_v2 = vld [vmem:[%s9003_s24 + $0xf8] sm:$0xff]  ;;  %v6911_v38 = vld [vmem:[%s9003_s24 + $0x100] sm:$0xff] }
 0x2a6   :  { %5054 = vtanh.f32 %v992_v53  ;;  %v6886_v53 = vld [vmem:[%s9003_s24 + $0x108] sm:$0xff] }
 0x2a7   :  { %5056 = vpow2.f32 %v3884_v6  ;;  %v6905_v6 = vld [vmem:[%s9003_s24 + $0xf0] sm:$0xff] }
 0x2b2   :  { %v5053_v35 = vpop.eup %5052 }
 0x2b3   :  { %v5055_v8 = vpop.eup %5054  ;;  %v1005_v9 = vadd.f32 1.0, %v5053_v35  ;;  %v6917_v35 = vld [vmem:[%s9003_s24 + $0xe0] sm:$0xff] }
 0x2b4   :  { %v995_v10 = vmul.f32 %v5055_v8, %v994_v7  ;;  %v5057_v48 = vpop.eup %5056  ;;  %v6924_v7 = vld [vmem:[%s9003_s24 + $0xd8] sm:$0xff]  ;;  %v6930_v8 = vld [vmem:[%s9003_s24 + $0xe8] sm:$0xff] }
 0x2b5   :  { %5058 = vrcp.f32 %v1005_v9  ;;  %v6936_v9 = vld [vmem:[%s9003_s24 + $0xc8] sm:$0xff] }
 0x2b6   :  { %v6725_v12 = vadd.f32 %v996_v11, %v995_v10  ;;  %v6943_v10 = vld [vmem:[%s9003_s24 + $0xc0] sm:$0xff]  ;;  %v6949_v11 = vld [vmem:[%s9003_s24 + $0xd0] sm:$0xff] }
 0x2b7   :  { %9152 = vst [vmem:[#allocation69_spill] sm:$0xff] %v6949_v11 }
 0x2b8   :  { %1090 = vmatmul.mubr.f32.vlgmr.msra.gmra.mxu0 %v6725_v12  ;;  %4546 = vmatmul.mubr.f32.vlgmr.msra.gmra.mxu1 %v6725_v12 }
 0x2b9   :  { %1167 = vmatpush1.msra.mxu0 %v6114_v46  ;;  %4549 = vmatpush3.msra.mxu1 %v6236_v59  ;;  %v1012_v46 = vadd.f32 1.0, %v5057_v48  ;;  %v6955_v48 = vld [vmem:[%s9003_s24 + $0xb0] sm:$0xff] }
 0x2ba   :  { %1168 = vmatprep.subr.mxu0 %v6121_v47  ;;  %4550 = vmatprep.subr.mxu1 %v9042_v63  ;;  %v963_v47 = vadd.f32 %v962_v17, %v6573_v24  ;;  %v9150_v17 = vld [vmem:[#allocation92_spill] sm:$0xff]  ;;  %9153 = vst [vmem:[#allocation53_spill] sm:$0xff] %v6955_v48 }
 0x2bb   :  { %1169 = vmatpush1.msra.mxu0 %v6134_v49  ;;  %4551 = vmatpush3.msra.mxu1 %v6255_v62  ;;  %v1017_v49 = vrot.slane %v3880_v61, 2  ;;  %5060 = vrcp.f32 %v1012_v46  ;;  %v6892_v61 = vld [vmem:[%s9003_s24 + $0x118] sm:$0xff]  ;;  %v6962_v46 = vld [vmem:[%s9003_s24 + $0xa8] sm:$0xff] }
 0x2bc   :  { %1170 = vmatprep.subr.mxu0 %v6140_v50  ;;  %4552 = vmatprep.subr.mxu1 %v9042_v63  ;;  %v9133_v50 = vld [vmem:[#allocation58_spill] sm:$0xff]  ;;  %9154 = vst [vmem:[#allocation55_spill] sm:$0xff] %v6962_v46 }
 0x2bd   :  { %1171 = vmatpush1.msra.mxu0 %v6152_v52  ;;  %4553 = vmatpush3.msra.mxu1 %v9075_v45  ;;  %v9134_v45 = vld [vmem:[#allocation64_spill] sm:$0xff] }
 0x2be   :  { %1172 = vmatprep.subr.mxu0 %v9076_v33  ;;  %4554 = vmatprep.subr.mxu1 %v9042_v63  ;;  %v9135_v33 = vld [vmem:[#allocation84_spill] sm:$0xff] }
 0x2bf   :  { %1173 = vmatpush1.msra.mxu0 %v9077_v39  ;;  %4555 = vmatpush3.msra.mxu1 %v9078_v60  ;;  %v9136_v39 = vld [vmem:[#allocation66_spill] sm:$0xff]  ;;  %v9137_v60 = vld [vmem:[#allocation67_spill] sm:$0xff] }
 0x2c0   :  { %1174 = vmatprep.subr.mxu0 %v9079_v34  ;;  %4556 = vmatprep.subr.mxu1 %v9042_v63  ;;  %v9138_v34 = vld [vmem:[#allocation87_spill] sm:$0xff] }
 0x2c1   :  { %1175 = vmatpush1.msra.mxu0 %v9133_v50  ;;  %4557 = vmatpush3.msra.mxu1 %v9081_v30  ;;  %v9139_v30 = vld [vmem:[#allocation68_spill] sm:$0xff] }
 0x2c2   :  { %v5059_v52 = vpop.eup %5058  ;;  %1176 = vmatprep.subr.mxu0 %v9082_v28  ;;  %4558 = vmatprep.subr.mxu1 %v9042_v63  ;;  %v9141_v28 = vld [vmem:[#allocation89_spill] sm:$0xff]  ;;  %v6981_v50 = vld [vmem:[%s9003_s24 + $0x90] sm:$0xff] }
 0x2c3   :  { %v1015_v59 = vmul.f32 %v5059_v52, %v963_v47  ;;  %1177 = vmatpush1.msra.mxu0 %v9083_v42  ;;  %4559 = vmatpush3.msra.mxu1 %v9084_v25  ;;  %v9142_v42 = vld [vmem:[#allocation71_spill] sm:$0xff]  ;;  %v9143_v25 = vld [vmem:[#allocation73_spill] sm:$0xff]  ;;  %9157 = vst [vmem:[#allocation75_spill] sm:$0xff] %v6981_v50 }
 0x2c4   :  { %1178 = vmatprep.subr.mxu0 %v9085_v27  ;;  %4560 = vmatprep.subr.mxu1 %v9042_v63  ;;  %v9144_v27 = vld [vmem:[#allocation90_spill] sm:$0xff]  ;;  %v6968_v47 = vld [vmem:[%s9003_s24 + $0xb8] sm:$0xff] }
 0x2c5   :  { %v1019_v62 = vadd.f32 %v1017_v49, %v1015_v59  ;;  %1179 = vmatpush1.msra.mxu0 %v9086_v37  ;;  %4561 = vmatpush3.msra.mxu1 %v9087_v54  ;;  %v9140_v54 = vld [vmem:[#allocation70_spill] sm:$0xff]  ;;  %9155 = vst [vmem:[#allocation72_spill] sm:$0xff] %v6968_v47  ;;  %v6974_v49 = vld [vmem:[%s9003_s24 + $0x98] sm:$0xff] }
 0x2c6   :  { %1180 = vmatprep.subr.mxu0 %v9134_v45  ;;  %4562 = vmatprep.subr.mxu1 %v9042_v63  ;;  %v9145_v37 = vld [vmem:[#allocation74_spill] sm:$0xff]  ;;  %9156 = vst [vmem:[#allocation56_spill] sm:$0xff] %v6974_v49 }
 0x2c7   :  { %5062 = vtanh.f32 %v1019_v62  ;;  %1181 = vmatpush1.msra.mxu0 %v9089_v40  ;;  %4563 = vmatpush3.msra.mxu1 %v9135_v33  ;;  %v9146_v40 = vld [vmem:[#allocation76_spill] sm:$0xff]  ;;  %v6987_v52 = vld [vmem:[%s9003_s24 + $0xa0] sm:$0xff]  ;;  %v7006_v45 = vld [vmem:[%s9003_s24 + $0x88] sm:$0xff] }
 0x2c8   :  { %1182 = vmatprep.subr.mxu0 %v9136_v39  ;;  %4564 = vmatprep.subr.mxu1 %v9042_v63  ;;  %v5061_v14 = vpop.eup %5060  ;;  %9158 = vst [vmem:[#allocation59_spill] sm:$0xff] %v6987_v52  ;;  %v6993_v59 = vld [vmem:[%s9003_s24 + $0x80] sm:$0xff]  ;;  %v7000_v62 = vld [vmem:[%s9003_s24 + $0x78] sm:$0xff]  ;;  %9161 = vst [vmem:[#allocation62_spill] sm:$0xff] %v7006_v45 }
 0x2c9   :  { %1183 = vmatpush1.msra.mxu0 %v9137_v60  ;;  %4565 = vmatpush3.msra.mxu1 %v9138_v34  ;;  %v1021_v20 = vsub.f32 1.0, %v5061_v14  ;;  %v1023_v23 = vmul.f32 %v5061_v14, %v6632_v55  ;;  %v6816_v55 = vld [vmem:[%s9003_s24 + $0x178] sm:$0xff]  ;;  %9159 = vst [vmem:[#allocation61_spill] sm:$0xff] %v6993_v59  ;;  %9160 = vst [vmem:[#allocation78_spill] sm:$0xff] %v7000_v62  ;;  %v7012_v33 = vld [vmem:[%s9003_s24 + $0x68] sm:$0xff] }
 0x2ca   :  { %1184 = vmatprep.subr.mxu0 %v9139_v30  ;;  %4566 = vmatprep.subr.mxu1 %v9042_v63  ;;  %9162 = vst [vmem:[#allocation63_spill] sm:$0xff] %v7012_v33  ;;  %v7019_v39 = vld [vmem:[%s9003_s24 + $0x60] sm:$0xff]  ;;  %v7025_v60 = vld [vmem:[%s9003_s24 + $0x70] sm:$0xff]  ;;  %v7038_v30 = vld [vmem:[%s9003_s24 + $0x48] sm:$0xff] }
 0x2cb   :  { %1185 = vmatpush1.msra.mxu0 %v9140_v54  ;;  %4567 = vmatpush3.msra.mxu1 %v9141_v28  ;;  %9163 = vst [vmem:[#allocation81_spill] sm:$0xff] %v7019_v39  ;;  %9164 = vst [vmem:[#allocation65_spill] sm:$0xff] %v7025_v60  ;;  %v7031_v34 = vld [vmem:[%s9003_s24 + $0x50] sm:$0xff]  ;;  %v7044_v54 = vld [vmem:[%s9003_s24 + $0x58] sm:$0xff] }
 0x2cc   :  { %1186 = vmatprep.subr.mxu0 %v9142_v42  ;;  %4568 = vmatprep.subr.mxu1 %v9042_v63  ;;  %9165 = vst [vmem:[#allocation82_spill] sm:$0xff] %v7031_v34  ;;  %9166 = vst [vmem:[#allocation83_spill] sm:$0xff] %v7038_v30  ;;  %v7050_v28 = vld [vmem:[%s9003_s24 + $0x38] sm:$0xff]  ;;  %v7057_v42 = vld [vmem:[%s9003_s24 + $0x30] sm:$0xff] }
 0x2cd   :  { %1187 = vmatpush1.msra.mxu0 %v9143_v25  ;;  %4569 = vmatpush3.msra.mxu1 %v9144_v27  ;;  %9167 = vst [vmem:[#allocation85_spill] sm:$0xff] %v7044_v54  ;;  %9168 = vst [vmem:[#allocation86_spill] sm:$0xff] %v7050_v28  ;;  %v7063_v25 = vld [vmem:[%s9003_s24 + $0x40] sm:$0xff] }
 0x2ce   :  { %1188 = vmatprep.subr.mxu0 %v9145_v37  ;;  %4570 = vmatprep.subr.mxu1 %v9042_v63  ;;  %9169 = vst [vmem:[#allocation88_spill] sm:$0xff] %v7057_v42  ;;  %9170 = vst [vmem:[#allocation32_spill] sm:$0xff] %v7063_v25  ;;  %v7069_v27 = vld [vmem:[%s9003_s24 + $0x20] sm:$0xff]  ;;  %v7076_v37 = vld [vmem:[%s9003_s24 + $0x18] sm:$0xff] }
 0x2cf   :  { %1189 = vmatpush1.msra.mxu0 %v9146_v40  ;;  %4571 = vmatpush3.msra.mxu1 %v9147_v13  ;;  %9171 = vst [vmem:[#allocation33_spill] sm:$0xff] %v7069_v27  ;;  %9172 = vst [vmem:[#allocation34_spill] sm:$0xff] %v7076_v37  ;;  %v7082_v40 = vld [vmem:[%s9003_s24 + $0x28] sm:$0xff]  ;;  %v7095_v14 = vld [vmem:[%s9003_s24] sm:$0xff] }
 0x2d0   :  { %1190 = vmatprep.subr.mxu0 %v9148_v15  ;;  %4572 = vmatprep.subr.mxu1 %v9042_v63  ;;  %9173 = vst [vmem:[#allocation35_spill] sm:$0xff] %v7082_v40  ;;  %v7088_v13 = vld [vmem:[%s9003_s24 + $0x8] sm:$0xff]  ;;  %9175 = vst [vmem:[#allocation36_spill] sm:$0xff] %v7095_v14  ;;  %v7102_v15 = vld [vmem:[%s9003_s24 + $0x10] sm:$0xff] }
 0x2d1   :  { %1191 = vmatpush1.msra.mxu0 %v9149_v16  ;;  %4573 = vmatpush3.msra.mxu1 %v9150_v17  ;;  %9174 = vst [vmem:[#allocation46_spill] sm:$0xff] %v7088_v13  ;;  %9176 = vst [vmem:[#allocation37_spill] sm:$0xff] %v7102_v15  ;;  %v7110_v16 = vld [vmem:[%s9022_s10 + $0x170] sm:$0xff] }
 0x2d2   :  { %1192 = vmatprep.subr.mxu0 %v9151_v18  ;;  %4574 = vmatprep.subr.mxu1 %v9042_v63  ;;  %9177 = vst [vmem:[#allocation49_spill] sm:$0xff] %v7110_v16  ;;  %v3885_v18 = vld [vmem:[%s9071_s13 + $0x18] sm:$0xff] }
 0x2d3   :  { %1193 = vmatpush1.msra.mxu0 %v9101_v1  ;;  %4575 = vmatpush3.msra.mxu1 %v6438_v58  ;;  %v6829_v58 = vld [vmem:[%s9003_s24 + $0x150] sm:$0xff] }
 0x2d4   :  { %v5063_v21 = vpop.eup %5062  ;;  %1194 = vmatprep.subr.mxu0 %v9102_v57  ;;  %4576 = vmatprep.subr.mxu1 %v9042_v63  ;;  %v6848_v57 = vld [vmem:[%s9003_s24 + $0x138] sm:$0xff] }
 0x2d5   :  { %1195 = vmatpush1.msra.mxu0 %v9103_v44  ;;  %4577 = vmatpush3.msra.mxu1 %v6447_v3  ;;  %v1022_v22 = vmul.f32 %v5063_v21, %v1021_v20  ;;  %v6803_v3 = vld [vmem:[%s9003_s24 + $0x170] sm:$0xff]  ;;  %v6841_v44 = vld [vmem:[%s9003_s24 + $0x140] sm:$0xff] }
 0x2d6   :  { %1196 = vmatprep.subr.mxu0 %v9104_v56  ;;  %4578 = vmatprep.subr.mxu1 %v9042_v63  ;;  %v6822_v56 = vld [vmem:[%s9003_s24 + $0x158] sm:$0xff] }
 0x2d7   :  { %1197 = vmatpush1.msra.mxu0 %v9105_v36  ;;  %1230 = vmatprep.mubr.f32.mxu0 %v9042_v63  ;;  %v6793_v1 = vadd.f32 %v1023_v23, %v1022_v22  ;;  %v6835_v36 = vld [vmem:[%s9003_s24 + $0x160] sm:$0xff] }
 0x2d8   :  { %4579 = vmatpush3.msra.mxu1 %v6456_v5  ;;  %4580 = vmatprep.mubr.msk.f32.mxu1 %vm5679_vm0, %v9042_v63  ;;  %v6810_v5 = vld [vmem:[%s9003_s24 + $0x168] sm:$0xff] }
 0x2d9   :  { %1231 = vmatmul.mubr.f32.vlgmr.msra.gmra.mxu0 %v6793_v1  ;;  %4581 = vmatmul.mubr.f32.vlgmr.msra.gmra.mxu1 %v6793_v1 }
 0x2da   :  { %1366 = vmatprep.subr.mxu0 %v6803_v3  ;;  %4583 = vmatprep.subr.mxu1 %v9042_v63 }
 0x2db   :  { %1367 = vmatpush1.msra.mxu0 %v6810_v5  ;;  %4584 = vmatpush3.msra.mxu1 %v6816_v55 }
 0x2dc   :  { %1368 = vmatprep.subr.mxu0 %v6822_v56  ;;  %4585 = vmatprep.subr.mxu1 %v9042_v63 }
 0x2dd   :  { %1369 = vmatpush1.msra.mxu0 %v6829_v58  ;;  %4586 = vmatpush3.msra.mxu1 %v6835_v36 }
 0x2de   :  { %1370 = vmatprep.subr.mxu0 %v6841_v44  ;;  %4587 = vmatprep.subr.mxu1 %v9042_v63 }
 0x2df   :  { %1371 = vmatpush1.msra.mxu0 %v6848_v57  ;;  %4588 = vmatpush3.msra.mxu1 %v6854_v26 }
 0x2e0   :  { %1372 = vmatprep.subr.mxu0 %v6860_v29  ;;  %4589 = vmatprep.subr.mxu1 %v9042_v63 }
 0x2e1   :  { %1373 = vmatpush1.msra.mxu0 %v6867_v32  ;;  %4590 = vmatpush3.msra.mxu1 %v6873_v31 }
 0x2e2   :  { %1374 = vmatprep.subr.mxu0 %v6879_v43  ;;  %4591 = vmatprep.subr.mxu1 %v9042_v63 }
 0x2e3   :  { %1375 = vmatpush1.msra.mxu0 %v6886_v53  ;;  %4592 = vmatpush3.msra.mxu1 %v6892_v61 }
 0x2e4   :  { %1376 = vmatprep.subr.mxu0 %v6898_v2  ;;  %4593 = vmatprep.subr.mxu1 %v9042_v63 }
 0x2e5   :  { %1377 = vmatpush1.msra.mxu0 %v6905_v6  ;;  %4594 = vmatpush3.msra.mxu1 %v6911_v38 }
 0x2e6   :  { %1378 = vmatprep.subr.mxu0 %v6917_v35  ;;  %4595 = vmatprep.subr.mxu1 %v9042_v63 }
 0x2e7   :  { %1379 = vmatpush1.msra.mxu0 %v6924_v7  ;;  %4596 = vmatpush3.msra.mxu1 %v6930_v8 }
 0x2e8   :  { %1380 = vmatprep.subr.mxu0 %v6936_v9  ;;  %4597 = vmatprep.subr.mxu1 %v9042_v63 }
 0x2e9   :  { %1381 = vmatpush1.msra.mxu0 %v6943_v10  ;;  %4598 = vmatpush3.msra.mxu1 %v6949_v11 }
 0x2ea   :  { %1382 = vmatprep.subr.mxu0 %v6955_v48  ;;  %4599 = vmatprep.subr.mxu1 %v9042_v63 }
 0x2eb   :  { %1383 = vmatpush1.msra.mxu0 %v6962_v46  ;;  %4600 = vmatpush3.msra.mxu1 %v6968_v47 }
 0x2ec   :  { %1384 = vmatprep.subr.mxu0 %v6974_v49  ;;  %4601 = vmatprep.subr.mxu1 %v9042_v63 }
 0x2ed   :  { %1385 = vmatpush1.msra.mxu0 %v6981_v50  ;;  %4602 = vmatpush3.msra.mxu1 %v6987_v52 }
 0x2ee   :  { %1386 = vmatprep.subr.mxu0 %v6993_v59  ;;  %4603 = vmatprep.subr.mxu1 %v9042_v63 }
 0x2ef   :  { %1387 = vmatpush1.msra.mxu0 %v7000_v62  ;;  %4604 = vmatpush3.msra.mxu1 %v7006_v45 }
 0x2f0   :  { %1388 = vmatprep.subr.mxu0 %v7012_v33  ;;  %4605 = vmatprep.subr.mxu1 %v9042_v63 }
 0x2f1   :  { %1389 = vmatpush1.msra.mxu0 %v7019_v39  ;;  %4606 = vmatpush3.msra.mxu1 %v7025_v60 }
 0x2f2   :  { %1390 = vmatprep.subr.mxu0 %v7031_v34  ;;  %4607 = vmatprep.subr.mxu1 %v9042_v63 }
 0x2f3   :  { %1391 = vmatpush1.msra.mxu0 %v7038_v30  ;;  %4608 = vmatpush3.msra.mxu1 %v7044_v54 }
 0x2f4   :  { %1392 = vmatprep.subr.mxu0 %v7050_v28  ;;  %4609 = vmatprep.subr.mxu1 %v9042_v63 }
 0x2f5   :  { %1393 = vmatpush1.msra.mxu0 %v7057_v42  ;;  %4610 = vmatpush3.msra.mxu1 %v7063_v25  ;;  %v3887_v42 = vld [vmem:[%s9071_s13 + $0x3c] sm:$0xff] }
 0x2f6   :  { %1394 = vmatprep.subr.mxu0 %v7069_v27  ;;  %4611 = vmatprep.subr.mxu1 %v9042_v63 }
 0x2f7   :  { %1395 = vmatpush1.msra.mxu0 %v7076_v37  ;;  %4612 = vmatpush3.msra.mxu1 %v7082_v40  ;;  %v1321_v40 = vrot.slane %v3885_v18, 2 }
 0x2f8   :  { %1396 = vmatprep.subr.mxu0 %v7088_v13  ;;  %4613 = vmatprep.subr.mxu1 %v9042_v63 }
 0x2f9   :  { %1397 = vmatpush1.msra.mxu0 %v7095_v14  ;;  %1430 = vmatprep.mubr.f32.mxu0 %v9042_v63 }
 0x2fa   :  { %4614 = vmatpush3.msra.mxu1 %v7102_v15  ;;  %4615 = vmatprep.mubr.msk.f32.mxu1 %vm5679_vm0, %v9042_v63 }
 0x2fb   :  { %1507 = vmatprep.subr.mxu0 %v7110_v16  ;;  %4618 = vmatprep.subr.mxu1 %v9042_v63 }
 0x378   :  { %v1091_v17 = vpop.f32.mrf.mxu0  ;;  %v1162_v20 = vpop.f32.mrf.mxu1 }
 0x379   :  { %v1092_v21 = vadd.f32 %v1091_v17, %v9130_v0  ;;  %v1340_v17 = vrot.slane %v3887_v42, 6 }
 0x37a   :  { %v1093_v22 = vpop.f32.mrf.mxu0  ;;  %v4547_v23 = vpop.f32.mrf.mxu1 }
 0x37b   :  { %v1313_v15 = vadd.f32 %v3885_v18, %v1092_v21  ;;  %v1094_v13 = vadd.f32 %v1093_v22, %v9131_v4  ;;  %v1163_v22 = vadd.f32 %v1162_v20, %v9132_v19 }
 0x37d   :  { %v3889_v14 = vmul.f32 -1.442695, %v1313_v15  ;;  %v1323_v37 = vadd.f32 %v1321_v40, %v1094_v13 }
 0x37f   :  { %5064 = vpow2.f32 %v3889_v14  ;;  %v3890_v16 = vmul.f32 -1.442695, %v1323_v37  ;;  %v1331_v14 = vrot.slane %v3885_v18, 4 }
 0x381   :  { %5066 = vpow2.f32 %v3890_v16 }
 0x38c   :  { %v5065_v27 = vpop.eup %5064 }
 0x38d   :  { %v1317_v25 = vadd.f32 1.0, %v5065_v27 }
 0x38e   :  { %v5067_v28 = vpop.eup %5066 }
 0x38f   :  { %5068 = vrcp.f32 %v1317_v25  ;;  %v1327_v0 = vadd.f32 1.0, %v5067_v28  ;;  %v7128_v28 = vld [vmem:[%s9071_s13 + $0x44] sm:$0xf] }
 0x391   :  { %5070 = vrcp.f32 %v1327_v0 }
 0x399   :  { %v1232_v23 = vpop.f32.mrf.mxu0  ;;  %v1303_v21 = vpop.f32.mrf.mxu1 }
 0x39a   :  { %v1233_v15 = vadd.f32 %v1232_v23, %v6552_v51 }
 0x39b   :  { %v1234_v40 = vpop.f32.mrf.mxu0  ;;  %v4582_v37 = vpop.f32.mrf.mxu1 }
 0x39c   :  { %v5069_v13 = vpop.eup %5068  ;;  %v1342_v16 = vadd.f32 %v1340_v17, %v1233_v15  ;;  %v1235_v4 = vadd.f32 %v1234_v40, %v6559_v41  ;;  %v7158_v37 = vld [vmem:[%s9022_s10 + $0x150] sm:$0xff] }
 0x39d   :  { %v1330_v27 = vmul.f32 %v5069_v13, %v1163_v22  ;;  %v7164_v13 = vld [vmem:[%s9022_s10 + $0x160] sm:$0xff] }
 0x39e   :  { %v3891_v25 = vmul.f32 -1.442695, %v1342_v16  ;;  %v1349_v42 = vadd.f32 %v7128_v28, %v1235_v4  ;;  %v5071_v20 = vpop.eup %5070  ;;  %v7139_v4 = vld [vmem:[%s9022_s10 + $0x168] sm:$0xff] }
 0x39f   :  { %v1333_v54 = vadd.f32 %v1331_v14, %v1330_v27  ;;  %v1335_v17 = vsub.f32 1.0, %v5071_v20  ;;  %v1337_v40 = vmul.f32 %v5071_v20, %v6725_v12  ;;  %v7151_v12 = vld [vmem:[%s9022_s10 + $0x158] sm:$0xff]  ;;  %v7170_v27 = vld [vmem:[%s9022_s10 + $0x140] sm:$0xff] }
 0x3a0   :  { %5072 = vpow2.f32 %v3891_v25  ;;  %v3892_v18 = vmul.f32 -1.442695, %v1349_v42  ;;  %v7177_v25 = vld [vmem:[%s9022_s10 + $0x138] sm:$0xff]  ;;  %v7183_v42 = vld [vmem:[%s9022_s10 + $0x148] sm:$0xff] }
 0x3a1   :  { %5074 = vtanh.f32 %v1333_v54  ;;  %v7145_v54 = vld [vmem:[%s9022_s10 + $0x178] sm:$0xff] }
 0x3a2   :  { %5076 = vpow2.f32 %v3892_v18  ;;  %v7189_v18 = vld [vmem:[%s9022_s10 + $0x128] sm:$0xff] }
 0x3ad   :  { %v5073_v23 = vpop.eup %5072 }
 0x3ae   :  { %v5075_v15 = vpop.eup %5074  ;;  %v1346_v0 = vadd.f32 1.0, %v5073_v23  ;;  %v7196_v23 = vld [vmem:[%s9022_s10 + $0x120] sm:$0xff] }
 0x3af   :  { %v1336_v22 = vmul.f32 %v5075_v15, %v1335_v17  ;;  %v5077_v16 = vpop.eup %5076  ;;  %v7202_v17 = vld [vmem:[%s9022_s10 + $0x130] sm:$0xff] }
 0x3b0   :  { %5078 = vrcp.f32 %v1346_v0  ;;  %v1353_v20 = vadd.f32 1.0, %v5077_v16  ;;  %v7208_v15 = vld [vmem:[%s9022_s10 + $0x110] sm:$0xff]  ;;  %v1304_v0 = vadd.f32 %v1303_v21, %v6573_v24  ;;  %v7223_v16 = vld [vmem:[%s9022_s10 + $0x118] sm:$0xff] }
 0x3b1   :  { %v7132_v14 = vadd.f32 %v1337_v40, %v1336_v22  ;;  %9178 = vst [vmem:[#allocation38_spill] sm:$0xff] %v7208_v15  ;;  %v1358_v22 = vrot.slane %v7128_v28, 2  ;;  %v7217_v40 = vld [vmem:[%s9022_s10 + $0x108] sm:$0xff]  ;;  %9180 = vst [vmem:[#allocation51_spill] sm:$0xff] %v7223_v16  ;;  %v7229_v21 = vld [vmem:[%s9022_s10 + $0xf8] sm:$0xff] }
 0x3b2   :  { %9179 = vst [vmem:[#allocation39_spill] sm:$0xff] %v7217_v40  ;;  %9181 = vst [vmem:[#allocation40_spill] sm:$0xff] %v7229_v21  ;;  %5080 = vrcp.f32 %v1353_v20 }
 0x3b3   :  { %1431 = vmatmul.mubr.f32.vlgmr.msra.gmra.mxu0 %v7132_v14  ;;  %4616 = vmatmul.mubr.f32.vlgmr.msra.gmra.mxu1 %v7132_v14 }
 0x3b4   :  { %1508 = vmatpush1.msra.mxu0 %v7139_v4  ;;  %4619 = vmatpush3.msra.mxu1 %v7145_v54 }
 0x3b5   :  { %1509 = vmatprep.subr.mxu0 %v7151_v12  ;;  %4620 = vmatprep.subr.mxu1 %v9042_v63 }
 0x3b6   :  { %1510 = vmatpush1.msra.mxu0 %v7158_v37  ;;  %4621 = vmatpush3.msra.mxu1 %v7164_v13 }
 0x3b7   :  { %1511 = vmatprep.subr.mxu0 %v7170_v27  ;;  %4622 = vmatprep.subr.mxu1 %v9042_v63 }
 0x3b8   :  { %1512 = vmatpush1.msra.mxu0 %v7177_v25  ;;  %4623 = vmatpush3.msra.mxu1 %v7183_v42 }
 0x3b9   :  { %1513 = vmatprep.subr.mxu0 %v7189_v18  ;;  %4624 = vmatprep.subr.mxu1 %v9042_v63 }
 0x3ba   :  { %1514 = vmatpush1.msra.mxu0 %v7196_v23  ;;  %4625 = vmatpush3.msra.mxu1 %v7202_v17 }
 0x3bb   :  { %1515 = vmatprep.subr.mxu0 %v7208_v15  ;;  %4626 = vmatprep.subr.mxu1 %v9042_v63 }
 0x3bc   :  { %1516 = vmatpush1.msra.mxu0 %v7217_v40  ;;  %4627 = vmatpush3.msra.mxu1 %v7223_v16  ;;  %v7236_v40 = vld [vmem:[%s9022_s10 + $0xf0] sm:$0xff]  ;;  %v7242_v16 = vld [vmem:[%s9022_s10 + $0x100] sm:$0xff] }
 0x3bd   :  { %v5079_v15 = vpop.eup %5078  ;;  %1517 = vmatprep.subr.mxu0 %v7229_v21  ;;  %4628 = vmatprep.subr.mxu1 %v9042_v63  ;;  %9182 = vst [vmem:[#allocation41_spill] sm:$0xff] %v7236_v40  ;;  %9183 = vst [vmem:[#allocation52_spill] sm:$0xff] %v7242_v16  ;;  %v7248_v21 = vld [vmem:[%s9022_s10 + $0xe0] sm:$0xff] }
 0x3be   :  { %v1356_v28 = vmul.f32 %v5079_v15, %v1304_v0  ;;  %1518 = vmatpush1.msra.mxu0 %v7236_v40  ;;  %4629 = vmatpush3.msra.mxu1 %v7242_v16  ;;  %9184 = vst [vmem:[#allocation42_spill] sm:$0xff] %v7248_v21  ;;  %v7255_v15 = vld [vmem:[%s9022_s10 + $0xd8] sm:$0xff]  ;;  %v7261_v0 = vld [vmem:[%s9022_s10 + $0xe8] sm:$0xff] }
 0x3bf   :  { %1519 = vmatprep.subr.mxu0 %v7248_v21  ;;  %4630 = vmatprep.subr.mxu1 %v9042_v63  ;;  %9185 = vst [vmem:[#allocation43_spill] sm:$0xff] %v7255_v15  ;;  %9186 = vst [vmem:[#allocation54_spill] sm:$0xff] %v7261_v0  ;;  %v7267_v21 = vld [vmem:[%s9022_s10 + $0xc8] sm:$0xff] }
 0x3c0   :  { %v1360_v20 = vadd.f32 %v1358_v22, %v1356_v28  ;;  %1520 = vmatpush1.msra.mxu0 %v7255_v15  ;;  %4631 = vmatpush3.msra.mxu1 %v7261_v0  ;;  %9187 = vst [vmem:[#allocation44_spill] sm:$0xff] %v7267_v21  ;;  %v7274_v22 = vld [vmem:[%s9022_s10 + $0xc0] sm:$0xff]  ;;  %v7280_v28 = vld [vmem:[%s9022_s10 + $0xd0] sm:$0xff] }
 0x3c1   :  { %1521 = vmatprep.subr.mxu0 %v7267_v21  ;;  %4632 = vmatprep.subr.mxu1 %v9042_v63  ;;  %9188 = vst [vmem:[#allocation45_spill] sm:$0xff] %v7274_v22  ;;  %9189 = vst [vmem:[#allocation57_spill] sm:$0xff] %v7280_v28  ;;  %v7286_v21 = vld [vmem:[%s9022_s10 + $0xb0] sm:$0xff] }
 0x3c2   :  { %5082 = vtanh.f32 %v1360_v20  ;;  %1522 = vmatpush1.msra.mxu0 %v7274_v22  ;;  %4633 = vmatpush3.msra.mxu1 %v7280_v28  ;;  %9190 = vst [vmem:[#allocation47_spill] sm:$0xff] %v7286_v21  ;;  %v7293_v20 = vld [vmem:[%s9022_s10 + $0xa8] sm:$0xff]  ;;  %v7299_v28 = vld [vmem:[%s9022_s10 + $0xb8] sm:$0xff]  ;;  %v5081_v22 = vpop.eup %5080 }
 0x3c3   :  { %1523 = vmatprep.subr.mxu0 %v7286_v21  ;;  %4634 = vmatprep.subr.mxu1 %v9042_v63  ;;  %9191 = vst [vmem:[#allocation48_spill] sm:$0xff] %v7293_v20  ;;  %9192 = vst [vmem:[#allocation60_spill] sm:$0xff] %v7299_v28  ;;  %v7305_v21 = vld [vmem:[%s9022_s10 + $0x98] sm:$0xff]  ;;  %v1362_v0 = vsub.f32 1.0, %v5081_v22  ;;  %v1364_v40 = vmul.f32 %v5081_v22, %v6793_v1  ;;  %v7436_v1 = vld [vmem:[%s9022_s10 + $0x10] sm:$0xff] }
 0x3c4   :  { %1524 = vmatpush1.msra.mxu0 %v7293_v20  ;;  %4635 = vmatpush3.msra.mxu1 %v7299_v28  ;;  %9193 = vst [vmem:[#allocation50_spill] sm:$0xff] %v7305_v21  ;;  %v7312_v20 = vld [vmem:[%s9022_s10 + $0x90] sm:$0xff]  ;;  %v7318_v28 = vld [vmem:[%s9022_s10 + $0xa0] sm:$0xff] }
 0x3c5   :  { %1525 = vmatprep.subr.mxu0 %v7305_v21  ;;  %4636 = vmatprep.subr.mxu1 %v9042_v63  ;;  %9194 = vst [vmem:[#allocation58_spill] sm:$0xff] %v7312_v20  ;;  %9195 = vst [vmem:[#allocation64_spill] sm:$0xff] %v7318_v28  ;;  %v7324_v21 = vld [vmem:[%s9022_s10 + $0x80] sm:$0xff]  ;;  %v9213_v22 = vld [vmem:[#allocation32_spill] sm:$0xff] }
 0x3c6   :  { %1526 = vmatpush1.msra.mxu0 %v7312_v20  ;;  %4637 = vmatpush3.msra.mxu1 %v7318_v28  ;;  %9196 = vst [vmem:[#allocation84_spill] sm:$0xff] %v7324_v21  ;;  %v7331_v20 = vld [vmem:[%s9022_s10 + $0x78] sm:$0xff]  ;;  %v7337_v28 = vld [vmem:[%s9022_s10 + $0x88] sm:$0xff] }
 0x3c7   :  { %1527 = vmatprep.subr.mxu0 %v7324_v21  ;;  %4638 = vmatprep.subr.mxu1 %v9042_v63  ;;  %9197 = vst [vmem:[#allocation66_spill] sm:$0xff] %v7331_v20  ;;  %9198 = vst [vmem:[#allocation67_spill] sm:$0xff] %v7337_v28  ;;  %v7343_v21 = vld [vmem:[%s9022_s10 + $0x68] sm:$0xff] }
 0x3c8   :  { %1528 = vmatpush1.msra.mxu0 %v7331_v20  ;;  %4639 = vmatpush3.msra.mxu1 %v7337_v28  ;;  %9199 = vst [vmem:[#allocation87_spill] sm:$0xff] %v7343_v21  ;;  %v7350_v20 = vld [vmem:[%s9022_s10 + $0x60] sm:$0xff]  ;;  %v7356_v28 = vld [vmem:[%s9022_s10 + $0x70] sm:$0xff] }
 0x3c9   :  { %1529 = vmatprep.subr.mxu0 %v7343_v21  ;;  %4640 = vmatprep.subr.mxu1 %v9042_v63  ;;  %9200 = vst [vmem:[#allocation68_spill] sm:$0xff] %v7350_v20  ;;  %9201 = vst [vmem:[#allocation70_spill] sm:$0xff] %v7356_v28  ;;  %v7362_v21 = vld [vmem:[%s9022_s10 + $0x50] sm:$0xff] }
 0x3ca   :  { %1530 = vmatpush1.msra.mxu0 %v7350_v20  ;;  %4641 = vmatpush3.msra.mxu1 %v7356_v28  ;;  %9202 = vst [vmem:[#allocation89_spill] sm:$0xff] %v7362_v21  ;;  %v7369_v20 = vld [vmem:[%s9022_s10 + $0x48] sm:$0xff]  ;;  %v7375_v28 = vld [vmem:[%s9022_s10 + $0x58] sm:$0xff] }
 0x3cb   :  { %1531 = vmatprep.subr.mxu0 %v7362_v21  ;;  %4642 = vmatprep.subr.mxu1 %v9042_v63  ;;  %9203 = vst [vmem:[#allocation71_spill] sm:$0xff] %v7369_v20  ;;  %9204 = vst [vmem:[#allocation73_spill] sm:$0xff] %v7375_v28  ;;  %v7381_v21 = vld [vmem:[%s9022_s10 + $0x38] sm:$0xff] }
 0x3cc   :  { %1532 = vmatpush1.msra.mxu0 %v7369_v20  ;;  %4643 = vmatpush3.msra.mxu1 %v7375_v28  ;;  %9205 = vst [vmem:[#allocation90_spill] sm:$0xff] %v7381_v21  ;;  %v7388_v20 = vld [vmem:[%s9022_s10 + $0x30] sm:$0xff]  ;;  %v7394_v28 = vld [vmem:[%s9022_s10 + $0x40] sm:$0xff] }
 0x3cd   :  { %1533 = vmatprep.subr.mxu0 %v7381_v21  ;;  %4644 = vmatprep.subr.mxu1 %v9042_v63  ;;  %9206 = vst [vmem:[#allocation74_spill] sm:$0xff] %v7388_v20  ;;  %9207 = vst [vmem:[#allocation76_spill] sm:$0xff] %v7394_v28  ;;  %v7400_v21 = vld [vmem:[%s9022_s10 + $0x20] sm:$0xff] }
 0x3ce   :  { %1534 = vmatpush1.msra.mxu0 %v7388_v20  ;;  %4645 = vmatpush3.msra.mxu1 %v7394_v28  ;;  %9208 = vst [vmem:[#allocation91_spill] sm:$0xff] %v7400_v21  ;;  %v7407_v20 = vld [vmem:[%s9022_s10 + $0x18] sm:$0xff]  ;;  %v7413_v28 = vld [vmem:[%s9022_s10 + $0x28] sm:$0xff] }
 0x3cf   :  { %v5083_v15 = vpop.eup %5082  ;;  %1535 = vmatprep.subr.mxu0 %v7400_v21  ;;  %4646 = vmatprep.subr.mxu1 %v9042_v63  ;;  %9209 = vst [vmem:[#allocation77_spill] sm:$0xff] %v7407_v20  ;;  %v7420_v21 = vld [vmem:[%s9022_s10 + $0x8] sm:$0xff] }
 0x3d0   :  { %1536 = vmatpush1.msra.mxu0 %v7407_v20  ;;  %4647 = vmatpush3.msra.mxu1 %v7413_v28  ;;  %v1363_v16 = vmul.f32 %v5083_v15, %v1362_v0  ;;  %v7427_v20 = vld [vmem:[%s9022_s10] sm:$0xff]  ;;  %v9212_v0 = vld [vmem:[#allocation88_spill] sm:$0xff] }
 0x3d1   :  { %1537 = vmatprep.subr.mxu0 %v7420_v21  ;;  %4648 = vmatprep.subr.mxu1 %v9042_v63 }
 0x3d2   :  { %1538 = vmatpush1.msra.mxu0 %v7427_v20  ;;  %1571 = vmatprep.mubr.f32.mxu0 %v9042_v63  ;;  %v7431_v15 = vadd.f32 %v1364_v40, %v1363_v16  ;;  %v9210_v40 = vld [vmem:[#allocation85_spill] sm:$0xff]  ;;  %v9211_v16 = vld [vmem:[#allocation86_spill] sm:$0xff] }
 0x3d3   :  { %4649 = vmatpush3.msra.mxu1 %v7436_v1  ;;  %4650 = vmatprep.mubr.msk.f32.mxu1 %vm5679_vm0, %v9042_v63 }
 0x3d4   :  { %1572 = vmatmul.mubr.f32.vlgmr.msra.gmra.mxu0 %v7431_v15  ;;  %4651 = vmatmul.mubr.f32.vlgmr.msra.gmra.mxu1 %v7431_v15 }
 0x3d5   :  { %1707 = vmatprep.subr.mxu0 %v6803_v3  ;;  %4653 = vmatprep.subr.mxu1 %v9042_v63 }
 0x3d6   :  { %1708 = vmatpush1.msra.mxu0 %v6810_v5  ;;  %4654 = vmatpush3.msra.mxu1 %v6816_v55 }
 0x3d7   :  { %1709 = vmatprep.subr.mxu0 %v6822_v56  ;;  %4655 = vmatprep.subr.mxu1 %v9042_v63 }
 0x3d8   :  { %1710 = vmatpush1.msra.mxu0 %v6829_v58  ;;  %4656 = vmatpush3.msra.mxu1 %v6835_v36 }
 0x3d9   :  { %1711 = vmatprep.subr.mxu0 %v6841_v44  ;;  %4657 = vmatprep.subr.mxu1 %v9042_v63 }
 0x3da   :  { %1712 = vmatpush1.msra.mxu0 %v6848_v57  ;;  %4658 = vmatpush3.msra.mxu1 %v6854_v26 }
 0x3db   :  { %1713 = vmatprep.subr.mxu0 %v6860_v29  ;;  %4659 = vmatprep.subr.mxu1 %v9042_v63 }
 0x3dc   :  { %1714 = vmatpush1.msra.mxu0 %v6867_v32  ;;  %4660 = vmatpush3.msra.mxu1 %v6873_v31 }
 0x3dd   :  { %1715 = vmatprep.subr.mxu0 %v6879_v43  ;;  %4661 = vmatprep.subr.mxu1 %v9042_v63 }
 0x3de   :  { %1716 = vmatpush1.msra.mxu0 %v6886_v53  ;;  %4662 = vmatpush3.msra.mxu1 %v6892_v61 }
 0x3df   :  { %1717 = vmatprep.subr.mxu0 %v6898_v2  ;;  %4663 = vmatprep.subr.mxu1 %v9042_v63 }
 0x3e0   :  { %1718 = vmatpush1.msra.mxu0 %v6905_v6  ;;  %4664 = vmatpush3.msra.mxu1 %v6911_v38 }
 0x3e1   :  { %1719 = vmatprep.subr.mxu0 %v6917_v35  ;;  %4665 = vmatprep.subr.mxu1 %v9042_v63 }
 0x3e2   :  { %1720 = vmatpush1.msra.mxu0 %v6924_v7  ;;  %4666 = vmatpush3.msra.mxu1 %v6930_v8 }
 0x3e3   :  { %1721 = vmatprep.subr.mxu0 %v6936_v9  ;;  %4667 = vmatprep.subr.mxu1 %v9042_v63 }
 0x3e4   :  { %1722 = vmatpush1.msra.mxu0 %v6943_v10  ;;  %4668 = vmatpush3.msra.mxu1 %v6949_v11 }
 0x3e5   :  { %1723 = vmatprep.subr.mxu0 %v6955_v48  ;;  %4669 = vmatprep.subr.mxu1 %v9042_v63 }
 0x3e6   :  { %1724 = vmatpush1.msra.mxu0 %v6962_v46  ;;  %4670 = vmatpush3.msra.mxu1 %v6968_v47 }
 0x3e7   :  { %1725 = vmatprep.subr.mxu0 %v6974_v49  ;;  %4671 = vmatprep.subr.mxu1 %v9042_v63 }
 0x3e8   :  { %1726 = vmatpush1.msra.mxu0 %v6981_v50  ;;  %4672 = vmatpush3.msra.mxu1 %v6987_v52 }
 0x3e9   :  { %1727 = vmatprep.subr.mxu0 %v6993_v59  ;;  %4673 = vmatprep.subr.mxu1 %v9042_v63 }
 0x3ea   :  { %1728 = vmatpush1.msra.mxu0 %v7000_v62  ;;  %4674 = vmatpush3.msra.mxu1 %v7006_v45  ;;  %v9223_v62 = vld [vmem:[#allocation97_spill] sm:$0xff] }
 0x3eb   :  { %1729 = vmatprep.subr.mxu0 %v7012_v33  ;;  %4675 = vmatprep.subr.mxu1 %v9042_v63  ;;  %v9214_v33 = vld [vmem:[#allocation33_spill] sm:$0xff] }
 0x3ec   :  { %1730 = vmatpush1.msra.mxu0 %v7019_v39  ;;  %4676 = vmatpush3.msra.mxu1 %v7025_v60  ;;  %v9215_v60 = vld [vmem:[#allocation34_spill] sm:$0xff] }
 0x3ed   :  { %1731 = vmatprep.subr.mxu0 %v7031_v34  ;;  %4677 = vmatprep.subr.mxu1 %v9042_v63  ;;  %v9216_v34 = vld [vmem:[#allocation35_spill] sm:$0xff]  ;;  %v9217_v39 = vld [vmem:[#allocation46_spill] sm:$0xff] }
 0x3ee   :  { %1732 = vmatpush1.msra.mxu0 %v7038_v30  ;;  %4678 = vmatpush3.msra.mxu1 %v9210_v40  ;;  %v9218_v40 = vld [vmem:[#allocation36_spill] sm:$0xff] }
 0x3ef   :  { %1733 = vmatprep.subr.mxu0 %v9211_v16  ;;  %4679 = vmatprep.subr.mxu1 %v9042_v63  ;;  %v9219_v16 = vld [vmem:[#allocation37_spill] sm:$0xff] }
 0x3f0   :  { %1734 = vmatpush1.msra.mxu0 %v9212_v0  ;;  %4680 = vmatpush3.msra.mxu1 %v9213_v22  ;;  %v9222_v22 = vld [vmem:[#allocation95_spill] sm:$0xff] }
 0x3f1   :  { %1735 = vmatprep.subr.mxu0 %v9214_v33  ;;  %4681 = vmatprep.subr.mxu1 %v9042_v63  ;;  %v9220_v33 = vld [vmem:[#allocation49_spill] sm:$0xff] }
 0x3f2   :  { %1736 = vmatpush1.msra.mxu0 %v9215_v60  ;;  %4682 = vmatpush3.msra.mxu1 %v9216_v34 }
 0x3f3   :  { %1737 = vmatprep.subr.mxu0 %v9217_v39  ;;  %4683 = vmatprep.subr.mxu1 %v9042_v63  ;;  %v7515_v39 = vld [vmem:[%s9071_s13 + $0x24] sm:$0xff] }
 0x3f4   :  { %1738 = vmatpush1.msra.mxu0 %v9218_v40  ;;  %1771 = vmatprep.mubr.f32.mxu0 %v9042_v63  ;;  %9221 = vst [vmem:[#allocation79_spill] sm:$0xff] %v7515_v39 }
 0x3f5   :  { %4684 = vmatpush3.msra.mxu1 %v9219_v16  ;;  %4685 = vmatprep.mubr.msk.f32.mxu1 %vm5679_vm0, %v9042_v63 }
 0x3f6   :  { %1848 = vmatprep.subr.mxu0 %v9220_v33  ;;  %4688 = vmatprep.subr.mxu1 %v9042_v63  ;;  %v1662_v33 = vrot.slane %v7515_v39, 2 }
 0x473   :  { %v1432_v60 = vpop.f32.mrf.mxu0  ;;  %v1503_v34 = vpop.f32.mrf.mxu1 }
 0x474   :  { %v1433_v40 = vadd.f32 %v1432_v60, %v9222_v22  ;;  %v7524_v60 = vld [vmem:[%s9071_s13 + $0x30] sm:$0xff] }
 0x475   :  { %v1434_v0 = vpop.f32.mrf.mxu0  ;;  %v4617_v30 = vpop.f32.mrf.mxu1 }
 0x476   :  { %v1654_v16 = vadd.f32 %v7515_v39, %v1433_v40  ;;  %v1435_v59 = vadd.f32 %v1434_v0, %v9223_v62  ;;  %v1681_v40 = vrot.slane %v7524_v60, 6 }
 0x478   :  { %v3897_v45 = vmul.f32 -1.442695, %v1654_v16  ;;  %v1664_v52 = vadd.f32 %v1662_v33, %v1435_v59  ;;  %v1504_v59 = vadd.f32 %v1503_v34, %v9132_v19 }
 0x47a   :  { %5084 = vpow2.f32 %v3897_v45  ;;  %v3898_v50 = vmul.f32 -1.442695, %v1664_v52 }
 0x47c   :  { %5086 = vpow2.f32 %v3898_v50  ;;  %v1672_v50 = vrot.slane %v7515_v39, 4 }
 0x487   :  { %v5085_v49 = vpop.eup %5084 }
 0x488   :  { %v1658_v47 = vadd.f32 1.0, %v5085_v49 }
 0x489   :  { %v5087_v30 = vpop.eup %5086 }
 0x48a   :  { %5088 = vrcp.f32 %v1658_v47  ;;  %v1668_v16 = vadd.f32 1.0, %v5087_v30  ;;  %v3896_v30 = vld [vmem:[%s9071_s13 + $0x38] sm:$0xf] }
 0x48c   :  { %5090 = vrcp.f32 %v1668_v16 }
 0x494   :  { %v1573_v22 = vpop.f32.mrf.mxu0  ;;  %v1644_v0 = vpop.f32.mrf.mxu1 }
 0x495   :  { %v1574_v62 = vadd.f32 %v1573_v22, %v6552_v51 }
 0x496   :  { %v1575_v52 = vpop.f32.mrf.mxu0  ;;  %v4652_v49 = vpop.f32.mrf.mxu1 }
 0x497   :  { %v5089_v47 = vpop.eup %5088  ;;  %v1683_v45 = vadd.f32 %v1681_v40, %v1574_v62  ;;  %v1576_v48 = vadd.f32 %v1575_v52, %v6559_v41  ;;  %v9227_v52 = vld [vmem:[#allocation40_spill] sm:$0xff] }
 0x498   :  { %v1671_v33 = vmul.f32 %v5089_v47, %v1504_v59 }
 0x499   :  { %v3899_v46 = vmul.f32 -1.442695, %v1683_v45  ;;  %v1690_v22 = vadd.f32 %v3896_v30, %v1576_v48  ;;  %v5091_v19 = vpop.eup %5090  ;;  %v1645_v48 = vadd.f32 %v1644_v0, %v6573_v24  ;;  %v9228_v45 = vld [vmem:[#allocation41_spill] sm:$0xff] }
 0x49a   :  { %v1674_v11 = vadd.f32 %v1672_v50, %v1671_v33  ;;  %v1676_v49 = vsub.f32 1.0, %v5091_v19  ;;  %v1678_v16 = vmul.f32 %v5091_v19, %v7132_v14  ;;  %v9226_v14 = vld [vmem:[#allocation51_spill] sm:$0xff]  ;;  %v9229_v33 = vld [vmem:[#allocation52_spill] sm:$0xff] }
 0x49b   :  { %5092 = vpow2.f32 %v3899_v46  ;;  %v3900_v34 = vmul.f32 -1.442695, %v1690_v22  ;;  %v1699_v46 = vrot.slane %v3896_v30, 2  ;;  %v9230_v22 = vld [vmem:[#allocation42_spill] sm:$0xff]  ;;  %v9231_v30 = vld [vmem:[#allocation43_spill] sm:$0xff] }
 0x49c   :  { %5094 = vtanh.f32 %v1674_v11  ;;  %v9224_v11 = vld [vmem:[#allocation38_spill] sm:$0xff] }
 0x49d   :  { %5096 = vpow2.f32 %v3900_v34  ;;  %v9232_v34 = vld [vmem:[#allocation54_spill] sm:$0xff] }
 0x4a8   :  { %v5093_v51 = vpop.eup %5092 }
 0x4a9   :  { %v5095_v39 = vpop.eup %5094  ;;  %v1687_v62 = vadd.f32 1.0, %v5093_v51 }
 0x4aa   :  { %v1677_v40 = vmul.f32 %v5095_v39, %v1676_v49  ;;  %v5097_v51 = vpop.eup %5096  ;;  %v9225_v39 = vld [vmem:[#allocation39_spill] sm:$0xff]  ;;  %v9233_v49 = vld [vmem:[#allocation44_spill] sm:$0xff] }
 0x4ab   :  { %5098 = vrcp.f32 %v1687_v62  ;;  %v1694_v19 = vadd.f32 1.0, %v5097_v51  ;;  %v9234_v62 = vld [vmem:[#allocation45_spill] sm:$0xff]  ;;  %v9237_v51 = vld [vmem:[#allocation48_spill] sm:$0xff] }
 0x4ac   :  { %v7535_v59 = vadd.f32 %v1678_v16, %v1677_v40  ;;  %v9235_v40 = vld [vmem:[#allocation57_spill] sm:$0xff]  ;;  %v9236_v16 = vld [vmem:[#allocation47_spill] sm:$0xff] }
 0x4ad   :  { %5100 = vrcp.f32 %v1694_v19  ;;  %v9238_v19 = vld [vmem:[#allocation60_spill] sm:$0xff] }
 0x4ae   :  { %1772 = vmatmul.mubr.f32.vlgmr.msra.gmra.mxu0 %v7535_v59  ;;  %4686 = vmatmul.mubr.f32.vlgmr.msra.gmra.mxu1 %v7535_v59 }
 0x4af   :  { %1849 = vmatpush1.msra.mxu0 %v7139_v4  ;;  %4689 = vmatpush3.msra.mxu1 %v7145_v54 }
 0x4b0   :  { %1850 = vmatprep.subr.mxu0 %v7151_v12  ;;  %4690 = vmatprep.subr.mxu1 %v9042_v63 }
 0x4b1   :  { %1851 = vmatpush1.msra.mxu0 %v7158_v37  ;;  %4691 = vmatpush3.msra.mxu1 %v7164_v13 }
 0x4b2   :  { %1852 = vmatprep.subr.mxu0 %v7170_v27  ;;  %4692 = vmatprep.subr.mxu1 %v9042_v63 }
 0x4b3   :  { %1853 = vmatpush1.msra.mxu0 %v7177_v25  ;;  %4693 = vmatpush3.msra.mxu1 %v7183_v42 }
 0x4b4   :  { %1854 = vmatprep.subr.mxu0 %v7189_v18  ;;  %4694 = vmatprep.subr.mxu1 %v9042_v63 }
 0x4b5   :  { %1855 = vmatpush1.msra.mxu0 %v7196_v23  ;;  %4695 = vmatpush3.msra.mxu1 %v7202_v17 }
 0x4b6   :  { %1856 = vmatprep.subr.mxu0 %v9224_v11  ;;  %4696 = vmatprep.subr.mxu1 %v9042_v63 }
 0x4b7   :  { %1857 = vmatpush1.msra.mxu0 %v9225_v39  ;;  %4697 = vmatpush3.msra.mxu1 %v9226_v14 }
 0x4b8   :  { %v5099_v50 = vpop.eup %5098  ;;  %1858 = vmatprep.subr.mxu0 %v9227_v52  ;;  %4698 = vmatprep.subr.mxu1 %v9042_v63 }
 0x4b9   :  { %v1697_v47 = vmul.f32 %v5099_v50, %v1645_v48  ;;  %1859 = vmatpush1.msra.mxu0 %v9228_v45  ;;  %4699 = vmatpush3.msra.mxu1 %v9229_v33  ;;  %v9239_v48 = vld [vmem:[#allocation50_spill] sm:$0xff]  ;;  %v9241_v50 = vld [vmem:[#allocation64_spill] sm:$0xff] }
 0x4ba   :  { %1860 = vmatprep.subr.mxu0 %v9230_v22  ;;  %4700 = vmatprep.subr.mxu1 %v9042_v63 }
 0x4bb   :  { %v1701_v0 = vadd.f32 %v1699_v46, %v1697_v47  ;;  %1861 = vmatpush1.msra.mxu0 %v9231_v30  ;;  %4701 = vmatpush3.msra.mxu1 %v9232_v34  ;;  %v9240_v46 = vld [vmem:[#allocation58_spill] sm:$0xff]  ;;  %v9242_v47 = vld [vmem:[#allocation84_spill] sm:$0xff] }
 0x4bc   :  { %1862 = vmatprep.subr.mxu0 %v9233_v49  ;;  %4702 = vmatprep.subr.mxu1 %v9042_v63 }
 0x4bd   :  { %5102 = vtanh.f32 %v1701_v0  ;;  %1863 = vmatpush1.msra.mxu0 %v9234_v62  ;;  %4703 = vmatpush3.msra.mxu1 %v9235_v40  ;;  %v9243_v0 = vld [vmem:[#allocation66_spill] sm:$0xff]  ;;  %v9245_v40 = vld [vmem:[#allocation87_spill] sm:$0xff] }
 0x4be   :  { %1864 = vmatprep.subr.mxu0 %v9236_v16  ;;  %4704 = vmatprep.subr.mxu1 %v9042_v63  ;;  %v9244_v16 = vld [vmem:[#allocation67_spill] sm:$0xff] }
 0x4bf   :  { %1865 = vmatpush1.msra.mxu0 %v9237_v51  ;;  %4705 = vmatpush3.msra.mxu1 %v9238_v19  ;;  %v9246_v19 = vld [vmem:[#allocation68_spill] sm:$0xff]  ;;  %v5101_v51 = vpop.eup %5100 }
 0x4c0   :  { %1866 = vmatprep.subr.mxu0 %v9239_v48  ;;  %4706 = vmatprep.subr.mxu1 %v9042_v63  ;;  %v9247_v48 = vld [vmem:[#allocation70_spill] sm:$0xff] }
 0x4c1   :  { %1867 = vmatpush1.msra.mxu0 %v9240_v46  ;;  %4707 = vmatpush3.msra.mxu1 %v9241_v50  ;;  %v9248_v46 = vld [vmem:[#allocation89_spill] sm:$0xff] }
 0x4c2   :  { %1868 = vmatprep.subr.mxu0 %v9242_v47  ;;  %4708 = vmatprep.subr.mxu1 %v9042_v63  ;;  %v9249_v47 = vld [vmem:[#allocation71_spill] sm:$0xff]  ;;  %v9250_v50 = vld [vmem:[#allocation73_spill] sm:$0xff] }
 0x4c3   :  { %1869 = vmatpush1.msra.mxu0 %v9243_v0  ;;  %4709 = vmatpush3.msra.mxu1 %v9244_v16  ;;  %v9251_v0 = vld [vmem:[#allocation90_spill] sm:$0xff]  ;;  %v9253_v16 = vld [vmem:[#allocation76_spill] sm:$0xff] }
 0x4c4   :  { %1870 = vmatprep.subr.mxu0 %v9245_v40  ;;  %4710 = vmatprep.subr.mxu1 %v9042_v63  ;;  %v9252_v40 = vld [vmem:[#allocation74_spill] sm:$0xff] }
 0x4c5   :  { %1871 = vmatpush1.msra.mxu0 %v9246_v19  ;;  %4711 = vmatpush3.msra.mxu1 %v9247_v48  ;;  %v1703_v19 = vsub.f32 1.0, %v5101_v51  ;;  %v9254_v48 = vld [vmem:[#allocation91_spill] sm:$0xff] }
 0x4c6   :  { %1872 = vmatprep.subr.mxu0 %v9248_v46  ;;  %4712 = vmatprep.subr.mxu1 %v9042_v63  ;;  %v9255_v46 = vld [vmem:[#allocation77_spill] sm:$0xff] }
 0x4c7   :  { %1873 = vmatpush1.msra.mxu0 %v9249_v47  ;;  %4713 = vmatpush3.msra.mxu1 %v9250_v50  ;;  %v1705_v50 = vmul.f32 %v5101_v51, %v7431_v15  ;;  %v9279_v15 = vld [vmem:[#allocation36_spill] sm:$0xff]  ;;  %v9281_v51 = vld [vmem:[#allocation49_spill] sm:$0xff] }
 0x4c8   :  { %1874 = vmatprep.subr.mxu0 %v9251_v0  ;;  %4714 = vmatprep.subr.mxu1 %v9042_v63 }
 0x4c9   :  { %1875 = vmatpush1.msra.mxu0 %v9252_v40  ;;  %4715 = vmatpush3.msra.mxu1 %v9253_v16 }
 0x4ca   :  { %v5103_v62 = vpop.eup %5102  ;;  %1876 = vmatprep.subr.mxu0 %v9254_v48  ;;  %4716 = vmatprep.subr.mxu1 %v9042_v63 }
 0x4cb   :  { %1877 = vmatpush1.msra.mxu0 %v9255_v46  ;;  %4717 = vmatpush3.msra.mxu1 %v7413_v28  ;;  %v1704_v47 = vmul.f32 %v5103_v62, %v1703_v19  ;;  %v9280_v62 = vld [vmem:[#allocation37_spill] sm:$0xff] }
 0x4cc   :  { %1878 = vmatprep.subr.mxu0 %v7420_v21  ;;  %4718 = vmatprep.subr.mxu1 %v9042_v63 }
 0x4cd   :  { %1879 = vmatpush1.msra.mxu0 %v7427_v20  ;;  %1912 = vmatprep.mubr.f32.mxu0 %v9042_v63  ;;  %v7603_v16 = vadd.f32 %v1705_v50, %v1704_v47  ;;  %v9282_v47 = vld [vmem:[#allocation95_spill] sm:$0xff] }
 0x4ce   :  { %4719 = vmatpush3.msra.mxu1 %v7436_v1  ;;  %4720 = vmatprep.mubr.msk.f32.mxu1 %vm5679_vm0, %v9042_v63 }
 0x4cf   :  { %1913 = vmatmul.mubr.f32.vlgmr.msra.gmra.mxu0 %v7603_v16  ;;  %4721 = vmatmul.mubr.f32.vlgmr.msra.gmra.mxu1 %v7603_v16 }
 0x4d0   :  { %2040 = vmatprep.subr.mxu0 %v6803_v3  ;;  %4723 = vmatprep.subr.mxu1 %v9042_v63  ;;  %v9256_v3 = vld [vmem:[#allocation69_spill] sm:$0xff] }
 0x4d1   :  { %2041 = vmatpush1.msra.mxu0 %v6810_v5  ;;  %4724 = vmatpush3.msra.mxu1 %v6816_v55  ;;  %v9257_v5 = vld [vmem:[#allocation53_spill] sm:$0xff]  ;;  %v9258_v55 = vld [vmem:[#allocation55_spill] sm:$0xff] }
 0x4d2   :  { %2042 = vmatprep.subr.mxu0 %v6822_v56  ;;  %4725 = vmatprep.subr.mxu1 %v9042_v63  ;;  %v9259_v56 = vld [vmem:[#allocation72_spill] sm:$0xff] }
 0x4d3   :  { %2043 = vmatpush1.msra.mxu0 %v6829_v58  ;;  %4726 = vmatpush3.msra.mxu1 %v6835_v36  ;;  %v9260_v58 = vld [vmem:[#allocation56_spill] sm:$0xff]  ;;  %v9261_v36 = vld [vmem:[#allocation75_spill] sm:$0xff] }
 0x4d4   :  { %2044 = vmatprep.subr.mxu0 %v6841_v44  ;;  %4727 = vmatprep.subr.mxu1 %v9042_v63  ;;  %v9262_v44 = vld [vmem:[#allocation59_spill] sm:$0xff] }
 0x4d5   :  { %2045 = vmatpush1.msra.mxu0 %v6848_v57  ;;  %4728 = vmatpush3.msra.mxu1 %v6854_v26  ;;  %v9263_v57 = vld [vmem:[#allocation61_spill] sm:$0xff]  ;;  %v9264_v26 = vld [vmem:[#allocation78_spill] sm:$0xff] }
 0x4d6   :  { %2046 = vmatprep.subr.mxu0 %v6860_v29  ;;  %4729 = vmatprep.subr.mxu1 %v9042_v63  ;;  %v9265_v29 = vld [vmem:[#allocation62_spill] sm:$0xff] }
 0x4d7   :  { %2047 = vmatpush1.msra.mxu0 %v6867_v32  ;;  %4730 = vmatpush3.msra.mxu1 %v6873_v31  ;;  %v9266_v32 = vld [vmem:[#allocation63_spill] sm:$0xff]  ;;  %v9267_v31 = vld [vmem:[#allocation81_spill] sm:$0xff] }
 0x4d8   :  { %2048 = vmatprep.subr.mxu0 %v6879_v43  ;;  %4731 = vmatprep.subr.mxu1 %v9042_v63  ;;  %v9268_v43 = vld [vmem:[#allocation65_spill] sm:$0xff] }
 0x4d9   :  { %2049 = vmatpush1.msra.mxu0 %v6886_v53  ;;  %4732 = vmatpush3.msra.mxu1 %v6892_v61  ;;  %v9269_v53 = vld [vmem:[#allocation82_spill] sm:$0xff]  ;;  %v9270_v61 = vld [vmem:[#allocation83_spill] sm:$0xff] }
 0x4da   :  { %2050 = vmatprep.subr.mxu0 %v6898_v2  ;;  %4733 = vmatprep.subr.mxu1 %v9042_v63  ;;  %v9271_v2 = vld [vmem:[#allocation85_spill] sm:$0xff] }
 0x4db   :  { %2051 = vmatpush1.msra.mxu0 %v6905_v6  ;;  %4734 = vmatpush3.msra.mxu1 %v6911_v38  ;;  %v9272_v6 = vld [vmem:[#allocation86_spill] sm:$0xff]  ;;  %v9273_v38 = vld [vmem:[#allocation88_spill] sm:$0xff] }
 0x4dc   :  { %2052 = vmatprep.subr.mxu0 %v6917_v35  ;;  %4735 = vmatprep.subr.mxu1 %v9042_v63  ;;  %v9274_v35 = vld [vmem:[#allocation32_spill] sm:$0xff] }
 0x4dd   :  { %2053 = vmatpush1.msra.mxu0 %v6924_v7  ;;  %4736 = vmatpush3.msra.mxu1 %v6930_v8  ;;  %v9275_v7 = vld [vmem:[#allocation33_spill] sm:$0xff]  ;;  %v9276_v8 = vld [vmem:[#allocation34_spill] sm:$0xff] }
 0x4de   :  { %2054 = vmatprep.subr.mxu0 %v6936_v9  ;;  %4737 = vmatprep.subr.mxu1 %v9042_v63  ;;  %v9277_v9 = vld [vmem:[#allocation35_spill] sm:$0xff] }
 0x4df   :  { %2055 = vmatpush1.msra.mxu0 %v6943_v10  ;;  %4738 = vmatpush3.msra.mxu1 %v9256_v3  ;;  %v9278_v10 = vld [vmem:[#allocation46_spill] sm:$0xff] }
 0x4e0   :  { %2056 = vmatprep.subr.mxu0 %v9257_v5  ;;  %4739 = vmatprep.subr.mxu1 %v9042_v63 }
 0x4e1   :  { %2057 = vmatpush1.msra.mxu0 %v9258_v55  ;;  %4740 = vmatpush3.msra.mxu1 %v9259_v56 }
 0x4e2   :  { %2058 = vmatprep.subr.mxu0 %v9260_v58  ;;  %4741 = vmatprep.subr.mxu1 %v9042_v63 }
 0x4e3   :  { %2059 = vmatpush1.msra.mxu0 %v9261_v36  ;;  %4742 = vmatpush3.msra.mxu1 %v9262_v44  ;;  %v9283_v36 = vld [vmem:[#allocation97_spill] sm:$0xff] }
 0x4e4   :  { %2060 = vmatprep.subr.mxu0 %v9263_v57  ;;  %4743 = vmatprep.subr.mxu1 %v9042_v63  ;;  %v1996_v57 = vrot.slane %v7524_v60, 2 }
 0x4e5   :  { %2061 = vmatpush1.msra.mxu0 %v9264_v26  ;;  %4744 = vmatpush3.msra.mxu1 %v9265_v29 }
 0x4e6   :  { %2062 = vmatprep.subr.mxu0 %v9266_v32  ;;  %4745 = vmatprep.subr.mxu1 %v9042_v63 }
 0x4e7   :  { %2063 = vmatpush1.msra.mxu0 %v9267_v31  ;;  %4746 = vmatpush3.msra.mxu1 %v9268_v43 }
 0x4e8   :  { %2064 = vmatprep.subr.mxu0 %v9269_v53  ;;  %4747 = vmatprep.subr.mxu1 %v9042_v63  ;;  %v9284_v53 = vld [vmem:[#allocation79_spill] sm:$0xff] }
 0x4e9   :  { %2065 = vmatpush1.msra.mxu0 %v9270_v61  ;;  %4748 = vmatpush3.msra.mxu1 %v9271_v2  ;;  %v2014_v61 = vrot.slane %v9284_v53, 6 }
 0x4ea   :  { %2066 = vmatprep.subr.mxu0 %v9272_v6  ;;  %4749 = vmatprep.subr.mxu1 %v9042_v63 }
 0x4eb   :  { %2067 = vmatpush1.msra.mxu0 %v9273_v38  ;;  %4750 = vmatpush3.msra.mxu1 %v9274_v35  ;;  %v9285_v35 = vld [vmem:[#allocation98_spill] sm:$0xff] }
 0x4ec   :  { %2068 = vmatprep.subr.mxu0 %v9275_v7  ;;  %4751 = vmatprep.subr.mxu1 %v9042_v63 }
 0x4ed   :  { %2069 = vmatpush1.msra.mxu0 %v9276_v8  ;;  %4752 = vmatpush3.msra.mxu1 %v9277_v9  ;;  %v9286_v8 = vld [vmem:[#allocation99_spill] sm:$0xff] }
 0x4ee   :  { %2070 = vmatprep.subr.mxu0 %v9278_v10  ;;  %4753 = vmatprep.subr.mxu1 %v9042_v63  ;;  %v2006_v10 = vrot.slane %v7524_v60, 4 }
 0x4ef   :  { %2071 = vmatpush1.msra.mxu0 %v9279_v15  ;;  %2104 = vmatprep.mubr.f32.mxu0 %v9042_v63 }
 0x4f0   :  { %4754 = vmatpush3.msra.mxu1 %v9280_v62  ;;  %4755 = vmatprep.mubr.msk.f32.mxu1 %vm5679_vm0, %v9042_v63 }
 0x4f1   :  { %2181 = vmatprep.subr.mxu0 %v9281_v51  ;;  %4758 = vmatprep.subr.mxu1 %v9042_v63 }
 0x56e   :  { %v1773_v19 = vpop.f32.mrf.mxu0  ;;  %v1844_v50 = vpop.f32.mrf.mxu1 }
 0x56f   :  { %v1774_v3 = vadd.f32 %v1773_v19, %v9282_v47  ;;  %v1845_v9 = vadd.f32 %v1844_v50, %v9286_v8 }
 0x570   :  { %v1775_v5 = vpop.f32.mrf.mxu0  ;;  %v4687_v55 = vpop.f32.mrf.mxu1 }
 0x571   :  { %v1989_v56 = vadd.f32 %v7524_v60, %v1774_v3  ;;  %v1776_v44 = vadd.f32 %v1775_v5, %v9283_v36 }
 0x573   :  { %v3901_v58 = vmul.f32 -1.442695, %v1989_v56  ;;  %v1998_v26 = vadd.f32 %v1996_v57, %v1776_v44 }
 0x575   :  { %5104 = vpow2.f32 %v3901_v58  ;;  %v3902_v29 = vmul.f32 -1.442695, %v1998_v26  ;;  %v3894_v58 = vld [vmem:[%s9071_s13 + $0x2c] sm:$0xf] }
 0x577   :  { %5106 = vpow2.f32 %v3902_v29 }
 0x582   :  { %v5105_v32 = vpop.eup %5104 }
 0x583   :  { %v1993_v31 = vadd.f32 1.0, %v5105_v32 }
 0x584   :  { %v5107_v43 = vpop.eup %5106 }
 0x585   :  { %5108 = vrcp.f32 %v1993_v31  ;;  %v2002_v2 = vadd.f32 1.0, %v5107_v43 }
 0x587   :  { %5110 = vrcp.f32 %v2002_v2  ;;  %v9302_v2 = vld [vmem:[#allocation71_spill] sm:$0xff] }
 0x58f   :  { %v1914_v6 = vpop.f32.mrf.mxu0  ;;  %v1985_v38 = vpop.f32.mrf.mxu1 }
 0x590   :  { %v1915_v7 = vadd.f32 %v1914_v6, %v9285_v35  ;;  %v9303_v6 = vld [vmem:[#allocation73_spill] sm:$0xff] }
 0x591   :  { %v1916_v15 = vpop.f32.mrf.mxu0  ;;  %v4722_v62 = vpop.f32.mrf.mxu1 }
 0x592   :  { %v5109_v51 = vpop.eup %5108  ;;  %v2016_v19 = vadd.f32 %v2014_v61, %v1915_v7  ;;  %v1917_v55 = vadd.f32 %v1916_v15, %v6559_v41  ;;  %v9301_v61 = vld [vmem:[#allocation89_spill] sm:$0xff]  ;;  %v7821_v62 = vld [vmem:[%s9003_s24 + $0x148] sm:$0xff] }
 0x593   :  { %v2005_v3 = vmul.f32 %v5109_v51, %v1845_v9  ;;  %v7827_v51 = vld [vmem:[%s9003_s24 + $0x128] sm:$0xff] }
 0x594   :  { %v3903_v5 = vmul.f32 -1.442695, %v2016_v19  ;;  %v2023_v44 = vadd.f32 %v3894_v58, %v1917_v55  ;;  %v5111_v57 = vpop.eup %5110  ;;  %v7834_v19 = vld [vmem:[%s9003_s24 + $0x120] sm:$0xff]  ;;  %v7853_v55 = vld [vmem:[%s9003_s24 + $0x108] sm:$0xff] }
 0x595   :  { %v2008_v56 = vadd.f32 %v2006_v10, %v2005_v3  ;;  %v2010_v26 = vsub.f32 1.0, %v5111_v57  ;;  %v2012_v43 = vmul.f32 %v5111_v57, %v7535_v59  ;;  %v7840_v3 = vld [vmem:[%s9003_s24 + $0x130] sm:$0xff]  ;;  %v7884_v57 = vld [vmem:[%s9003_s24 + $0xe0] sm:$0xff] }
 0x596   :  { %5112 = vpow2.f32 %v3903_v5  ;;  %v3904_v50 = vmul.f32 -1.442695, %v2023_v44  ;;  %v7846_v5 = vld [vmem:[%s9003_s24 + $0x110] sm:$0xff] }
 0x597   :  { %5114 = vtanh.f32 %v2008_v56  ;;  %v7859_v56 = vld [vmem:[%s9003_s24 + $0x118] sm:$0xff]  ;;  %v7872_v44 = vld [vmem:[%s9003_s24 + $0xf0] sm:$0xff] }
 0x598   :  { %5116 = vpow2.f32 %v3904_v50  ;;  %v7878_v50 = vld [vmem:[%s9003_s24 + $0x100] sm:$0xff] }
 0x5a3   :  { %v5113_v60 = vpop.eup %5112 }
 0x5a4   :  { %v5115_v29 = vpop.eup %5114  ;;  %v2020_v32 = vadd.f32 1.0, %v5113_v60  ;;  %v7891_v60 = vld [vmem:[%s9003_s24 + $0xd8] sm:$0xff] }
 0x5a5   :  { %v2011_v31 = vmul.f32 %v5115_v29, %v2010_v26  ;;  %v5117_v59 = vpop.eup %5116  ;;  %v7897_v26 = vld [vmem:[%s9003_s24 + $0xe8] sm:$0xff] }
 0x5a6   :  { %5118 = vrcp.f32 %v2020_v32  ;;  %v7903_v29 = vld [vmem:[%s9003_s24 + $0xc8] sm:$0xff]  ;;  %v7910_v32 = vld [vmem:[%s9003_s24 + $0xc0] sm:$0xff] }
 0x5a7   :  { %v7692_v53 = vadd.f32 %v2012_v43, %v2011_v31  ;;  %v7916_v31 = vld [vmem:[%s9003_s24 + $0xd0] sm:$0xff] }
 0x5a8   :  { %v7922_v43 = vld [vmem:[%s9003_s24 + $0xb0] sm:$0xff] }
 0x5a9   :  { %2105 = vmatmul.mubr.f32.vlgmr.msra.gmra.mxu0 %v7692_v53  ;;  %4756 = vmatmul.mubr.f32.vlgmr.msra.gmra.mxu1 %v7692_v53 }
 0x5aa   :  { %2182 = vmatpush1.msra.mxu0 %v7139_v4  ;;  %4759 = vmatpush3.msra.mxu1 %v7145_v54  ;;  %v2027_v4 = vadd.f32 1.0, %v5117_v59  ;;  %v1986_v54 = vadd.f32 %v1985_v38, %v6573_v24  ;;  %v9304_v38 = vld [vmem:[#allocation76_spill] sm:$0xff]  ;;  %v7929_v59 = vld [vmem:[%s9003_s24 + $0xa8] sm:$0xff] }
 0x5ab   :  { %2183 = vmatprep.subr.mxu0 %v7151_v12  ;;  %4760 = vmatprep.subr.mxu1 %v9042_v63  ;;  %v2032_v12 = vrot.slane %v3894_v58, 2  ;;  %v7865_v58 = vld [vmem:[%s9003_s24 + $0xf8] sm:$0xff] }
 0x5ac   :  { %2184 = vmatpush1.msra.mxu0 %v7158_v37  ;;  %4761 = vmatpush3.msra.mxu1 %v7164_v13  ;;  %5120 = vrcp.f32 %v2027_v4  ;;  %v7935_v4 = vld [vmem:[%s9003_s24 + $0xb8] sm:$0xff] }
 0x5ad   :  { %2185 = vmatprep.subr.mxu0 %v7170_v27  ;;  %4762 = vmatprep.subr.mxu1 %v9042_v63 }
 0x5ae   :  { %2186 = vmatpush1.msra.mxu0 %v7177_v25  ;;  %4763 = vmatpush3.msra.mxu1 %v7183_v42  ;;  %v9287_v25 = vld [vmem:[#allocation45_spill] sm:$0xff] }
 0x5af   :  { %2187 = vmatprep.subr.mxu0 %v7189_v18  ;;  %4764 = vmatprep.subr.mxu1 %v9042_v63  ;;  %v9288_v42 = vld [vmem:[#allocation57_spill] sm:$0xff]  ;;  %v9289_v18 = vld [vmem:[#allocation47_spill] sm:$0xff] }
 0x5b0   :  { %2188 = vmatpush1.msra.mxu0 %v7196_v23  ;;  %4765 = vmatpush3.msra.mxu1 %v7202_v17  ;;  %v9290_v23 = vld [vmem:[#allocation48_spill] sm:$0xff] }
 0x5b1   :  { %2189 = vmatprep.subr.mxu0 %v9224_v11  ;;  %4766 = vmatprep.subr.mxu1 %v9042_v63  ;;  %v9291_v17 = vld [vmem:[#allocation60_spill] sm:$0xff]  ;;  %v9292_v11 = vld [vmem:[#allocation50_spill] sm:$0xff] }
 0x5b2   :  { %2190 = vmatpush1.msra.mxu0 %v9225_v39  ;;  %4767 = vmatpush3.msra.mxu1 %v9226_v14  ;;  %v9293_v39 = vld [vmem:[#allocation58_spill] sm:$0xff]  ;;  %v9294_v14 = vld [vmem:[#allocation64_spill] sm:$0xff] }
 0x5b3   :  { %v5119_v37 = vpop.eup %5118  ;;  %2191 = vmatprep.subr.mxu0 %v9227_v52  ;;  %4768 = vmatprep.subr.mxu1 %v9042_v63  ;;  %v9295_v52 = vld [vmem:[#allocation84_spill] sm:$0xff] }
 0x5b4   :  { %v2030_v13 = vmul.f32 %v5119_v37, %v1986_v54  ;;  %2192 = vmatpush1.msra.mxu0 %v9228_v45  ;;  %4769 = vmatpush3.msra.mxu1 %v9229_v33  ;;  %v9296_v45 = vld [vmem:[#allocation66_spill] sm:$0xff]  ;;  %v9297_v33 = vld [vmem:[#allocation67_spill] sm:$0xff]  ;;  %v7941_v54 = vld [vmem:[%s9003_s24 + $0x98] sm:$0xff] }
 0x5b5   :  { %2193 = vmatprep.subr.mxu0 %v9230_v22  ;;  %4770 = vmatprep.subr.mxu1 %v9042_v63  ;;  %v9298_v22 = vld [vmem:[#allocation87_spill] sm:$0xff]  ;;  %v7954_v37 = vld [vmem:[%s9003_s24 + $0xa0] sm:$0xff] }
 0x5b6   :  { %v2034_v27 = vadd.f32 %v2032_v12, %v2030_v13  ;;  %2194 = vmatpush1.msra.mxu0 %v9231_v30  ;;  %4771 = vmatpush3.msra.mxu1 %v9232_v34  ;;  %v9299_v30 = vld [vmem:[#allocation68_spill] sm:$0xff]  ;;  %v9300_v34 = vld [vmem:[#allocation70_spill] sm:$0xff] }
 0x5b7   :  { %2195 = vmatprep.subr.mxu0 %v9233_v49  ;;  %4772 = vmatprep.subr.mxu1 %v9042_v63  ;;  %v7948_v12 = vld [vmem:[%s9003_s24 + $0x90] sm:$0xff]  ;;  %v7960_v13 = vld [vmem:[%s9003_s24 + $0x80] sm:$0xff] }
 0x5b8   :  { %5122 = vtanh.f32 %v2034_v27  ;;  %2196 = vmatpush1.msra.mxu0 %v9287_v25  ;;  %4773 = vmatpush3.msra.mxu1 %v9288_v42  ;;  %v7967_v27 = vld [vmem:[%s9003_s24 + $0x78] sm:$0xff]  ;;  %v7973_v25 = vld [vmem:[%s9003_s24 + $0x88] sm:$0xff] }
 0x5b9   :  { %2197 = vmatprep.subr.mxu0 %v9289_v18  ;;  %4774 = vmatprep.subr.mxu1 %v9042_v63  ;;  %v5121_v49 = vpop.eup %5120  ;;  %v7979_v42 = vld [vmem:[%s9003_s24 + $0x68] sm:$0xff]  ;;  %v7986_v18 = vld [vmem:[%s9003_s24 + $0x60] sm:$0xff] }
 0x5ba   :  { %2198 = vmatpush1.msra.mxu0 %v9290_v23  ;;  %4775 = vmatpush3.msra.mxu1 %v9291_v17  ;;  %v2036_v7 = vsub.f32 1.0, %v5121_v49  ;;  %v2038_v15 = vmul.f32 %v5121_v49, %v7603_v16  ;;  %v7796_v16 = vld [vmem:[%s9003_s24 + $0x150] sm:$0xff]  ;;  %v8062_v49 = vld [vmem:[%s9003_s24] sm:$0xff] }
 0x5bb   :  { %2199 = vmatprep.subr.mxu0 %v9292_v11  ;;  %4776 = vmatprep.subr.mxu1 %v9042_v63  ;;  %v7992_v23 = vld [vmem:[%s9003_s24 + $0x70] sm:$0xff]  ;;  %v8005_v11 = vld [vmem:[%s9003_s24 + $0x48] sm:$0xff]  ;;  %9313 = vst [vmem:[#allocation42_spill] sm:$0xff] %v8062_v49 }
 0x5bc   :  { %2200 = vmatpush1.msra.mxu0 %v9293_v39  ;;  %4777 = vmatpush3.msra.mxu1 %v9294_v14  ;;  %v7998_v17 = vld [vmem:[%s9003_s24 + $0x50] sm:$0xff]  ;;  %v8011_v39 = vld [vmem:[%s9003_s24 + $0x58] sm:$0xff] }
 0x5bd   :  { %2201 = vmatprep.subr.mxu0 %v9295_v52  ;;  %4778 = vmatprep.subr.mxu1 %v9042_v63  ;;  %9305 = vst [vmem:[#allocation92_spill] sm:$0xff] %v8011_v39  ;;  %v8017_v14 = vld [vmem:[%s9003_s24 + $0x38] sm:$0xff]  ;;  %v8024_v52 = vld [vmem:[%s9003_s24 + $0x30] sm:$0xff] }
 0x5be   :  { %2202 = vmatpush1.msra.mxu0 %v9296_v45  ;;  %4779 = vmatpush3.msra.mxu1 %v9297_v33  ;;  %9306 = vst [vmem:[#allocation80_spill] sm:$0xff] %v8017_v14  ;;  %9307 = vst [vmem:[#allocation38_spill] sm:$0xff] %v8024_v52  ;;  %v8030_v45 = vld [vmem:[%s9003_s24 + $0x40] sm:$0xff] }
 0x5bf   :  { %2203 = vmatprep.subr.mxu0 %v9298_v22  ;;  %4780 = vmatprep.subr.mxu1 %v9042_v63  ;;  %9308 = vst [vmem:[#allocation39_spill] sm:$0xff] %v8030_v45  ;;  %v8036_v33 = vld [vmem:[%s9003_s24 + $0x20] sm:$0xff]  ;;  %v8043_v22 = vld [vmem:[%s9003_s24 + $0x18] sm:$0xff] }
 0x5c0   :  { %2204 = vmatpush1.msra.mxu0 %v9299_v30  ;;  %4781 = vmatpush3.msra.mxu1 %v9300_v34  ;;  %9309 = vst [vmem:[#allocation51_spill] sm:$0xff] %v8036_v33  ;;  %9310 = vst [vmem:[#allocation40_spill] sm:$0xff] %v8043_v22  ;;  %v8049_v30 = vld [vmem:[%s9003_s24 + $0x28] sm:$0xff] }
 0x5c1   :  { %2205 = vmatprep.subr.mxu0 %v9301_v61  ;;  %4782 = vmatprep.subr.mxu1 %v9042_v63  ;;  %9311 = vst [vmem:[#allocation41_spill] sm:$0xff] %v8049_v30  ;;  %v8055_v34 = vld [vmem:[%s9003_s24 + $0x8] sm:$0xff]  ;;  %v8069_v61 = vld [vmem:[%s9003_s24 + $0x10] sm:$0xff] }
 0x5c2   :  { %2206 = vmatpush1.msra.mxu0 %v9302_v2  ;;  %4783 = vmatpush3.msra.mxu1 %v9303_v6  ;;  %9312 = vst [vmem:[#allocation52_spill] sm:$0xff] %v8055_v34  ;;  %9314 = vst [vmem:[#allocation43_spill] sm:$0xff] %v8069_v61  ;;  %v8077_v2 = vld [vmem:[%s9022_s10 + $0x170] sm:$0xff] }
 0x5c3   :  { %2207 = vmatprep.subr.mxu0 %v9251_v0  ;;  %4784 = vmatprep.subr.mxu1 %v9042_v63  ;;  %v7815_v0 = vld [vmem:[%s9003_s24 + $0x138] sm:$0xff]  ;;  %9315 = vst [vmem:[#allocation54_spill] sm:$0xff] %v8077_v2 }
 0x5c4   :  { %2208 = vmatpush1.msra.mxu0 %v9252_v40  ;;  %4785 = vmatpush3.msra.mxu1 %v9304_v38 }
 0x5c5   :  { %v5123_v9 = vpop.eup %5122  ;;  %2209 = vmatprep.subr.mxu0 %v9254_v48  ;;  %4786 = vmatprep.subr.mxu1 %v9042_v63  ;;  %v7802_v48 = vld [vmem:[%s9003_s24 + $0x160] sm:$0xff] }
 0x5c6   :  { %2210 = vmatpush1.msra.mxu0 %v9255_v46  ;;  %4787 = vmatpush3.msra.mxu1 %v7413_v28  ;;  %v2037_v10 = vmul.f32 %v5123_v9, %v2036_v7  ;;  %v7777_v28 = vld [vmem:[%s9003_s24 + $0x168] sm:$0xff]  ;;  %v7808_v46 = vld [vmem:[%s9003_s24 + $0x140] sm:$0xff] }
 0x5c7   :  { %2211 = vmatprep.subr.mxu0 %v7420_v21  ;;  %4788 = vmatprep.subr.mxu1 %v9042_v63  ;;  %v7770_v21 = vld [vmem:[%s9003_s24 + $0x170] sm:$0xff] }
 0x5c8   :  { %2212 = vmatpush1.msra.mxu0 %v7427_v20  ;;  %2245 = vmatprep.mubr.f32.mxu0 %v9042_v63  ;;  %v7760_v40 = vadd.f32 %v2038_v15, %v2037_v10  ;;  %v7783_v20 = vld [vmem:[%s9003_s24 + $0x178] sm:$0xff] }
 0x5c9   :  { %4789 = vmatpush3.msra.mxu1 %v7436_v1  ;;  %4790 = vmatprep.mubr.msk.f32.mxu1 %vm5679_vm0, %v9042_v63  ;;  %v7789_v1 = vld [vmem:[%s9003_s24 + $0x158] sm:$0xff] }
 0x5ca   :  { %2246 = vmatmul.mubr.f32.vlgmr.msra.gmra.mxu0 %v7760_v40  ;;  %4791 = vmatmul.mubr.f32.vlgmr.msra.gmra.mxu1 %v7760_v40  ;;  %v5335_v15 = vld [vmem:[%s9071_s13 + $0x3c] sm:$0xff] }
 0x5cb   :  { %2373 = vmatprep.subr.mxu0 %v7770_v21  ;;  %4793 = vmatprep.subr.mxu1 %v9042_v63 }
 0x5cc   :  { %2374 = vmatpush1.msra.mxu0 %v7777_v28  ;;  %4794 = vmatpush3.msra.mxu1 %v7783_v20 }
 0x5cd   :  { %2375 = vmatprep.subr.mxu0 %v7789_v1  ;;  %4795 = vmatprep.subr.mxu1 %v9042_v63 }
 0x5ce   :  { %2376 = vmatpush1.msra.mxu0 %v7796_v16  ;;  %4796 = vmatpush3.msra.mxu1 %v7802_v48 }
 0x5cf   :  { %2377 = vmatprep.subr.mxu0 %v7808_v46  ;;  %4797 = vmatprep.subr.mxu1 %v9042_v63 }
 0x5d0   :  { %2378 = vmatpush1.msra.mxu0 %v7815_v0  ;;  %4798 = vmatpush3.msra.mxu1 %v7821_v62 }
 0x5d1   :  { %2379 = vmatprep.subr.mxu0 %v7827_v51  ;;  %4799 = vmatprep.subr.mxu1 %v9042_v63 }
 0x5d2   :  { %2380 = vmatpush1.msra.mxu0 %v7834_v19  ;;  %4800 = vmatpush3.msra.mxu1 %v7840_v3 }
 0x5d3   :  { %2381 = vmatprep.subr.mxu0 %v7846_v5  ;;  %4801 = vmatprep.subr.mxu1 %v9042_v63 }
 0x5d4   :  { %2382 = vmatpush1.msra.mxu0 %v7853_v55  ;;  %4802 = vmatpush3.msra.mxu1 %v7859_v56 }
 0x5d5   :  { %2383 = vmatprep.subr.mxu0 %v7865_v58  ;;  %4803 = vmatprep.subr.mxu1 %v9042_v63 }
 0x5d6   :  { %2384 = vmatpush1.msra.mxu0 %v7872_v44  ;;  %4804 = vmatpush3.msra.mxu1 %v7878_v50 }
 0x5d7   :  { %2385 = vmatprep.subr.mxu0 %v7884_v57  ;;  %4805 = vmatprep.subr.mxu1 %v9042_v63 }
 0x5d8   :  { %2386 = vmatpush1.msra.mxu0 %v7891_v60  ;;  %4806 = vmatpush3.msra.mxu1 %v7897_v26 }
 0x5d9   :  { %2387 = vmatprep.subr.mxu0 %v7903_v29  ;;  %4807 = vmatprep.subr.mxu1 %v9042_v63 }
 0x5da   :  { %2388 = vmatpush1.msra.mxu0 %v7910_v32  ;;  %4808 = vmatpush3.msra.mxu1 %v7916_v31 }
 0x5db   :  { %2389 = vmatprep.subr.mxu0 %v7922_v43  ;;  %4809 = vmatprep.subr.mxu1 %v9042_v63 }
 0x5dc   :  { %2390 = vmatpush1.msra.mxu0 %v7929_v59  ;;  %4810 = vmatpush3.msra.mxu1 %v7935_v4 }
 0x5dd   :  { %2391 = vmatprep.subr.mxu0 %v7941_v54  ;;  %4811 = vmatprep.subr.mxu1 %v9042_v63 }
 0x5de   :  { %2392 = vmatpush1.msra.mxu0 %v7948_v12  ;;  %4812 = vmatpush3.msra.mxu1 %v7954_v37 }
 0x5df   :  { %2393 = vmatprep.subr.mxu0 %v7960_v13  ;;  %4813 = vmatprep.subr.mxu1 %v9042_v63 }
 0x5e0   :  { %2394 = vmatpush1.msra.mxu0 %v7967_v27  ;;  %4814 = vmatpush3.msra.mxu1 %v7973_v25 }
 0x5e1   :  { %2395 = vmatprep.subr.mxu0 %v7979_v42  ;;  %4815 = vmatprep.subr.mxu1 %v9042_v63 }
 0x5e2   :  { %2396 = vmatpush1.msra.mxu0 %v7986_v18  ;;  %4816 = vmatpush3.msra.mxu1 %v7992_v23 }
 0x5e3   :  { %2397 = vmatprep.subr.mxu0 %v7998_v17  ;;  %4817 = vmatprep.subr.mxu1 %v9042_v63 }
 0x5e4   :  { %2398 = vmatpush1.msra.mxu0 %v8005_v11  ;;  %4818 = vmatpush3.msra.mxu1 %v8011_v39 }
 0x5e5   :  { %2399 = vmatprep.subr.mxu0 %v8017_v14  ;;  %4819 = vmatprep.subr.mxu1 %v9042_v63 }
 0x5e6   :  { %2400 = vmatpush1.msra.mxu0 %v8024_v52  ;;  %4820 = vmatpush3.msra.mxu1 %v8030_v45 }
 0x5e7   :  { %2401 = vmatprep.subr.mxu0 %v8036_v33  ;;  %4821 = vmatprep.subr.mxu1 %v9042_v63 }
 0x5e8   :  { %2402 = vmatpush1.msra.mxu0 %v8043_v22  ;;  %4822 = vmatpush3.msra.mxu1 %v8049_v30  ;;  %v2329_v30 = vrot.slane %v5335_v15, 2 }
 0x5e9   :  { %2403 = vmatprep.subr.mxu0 %v8055_v34  ;;  %4823 = vmatprep.subr.mxu1 %v9042_v63 }
 0x5ea   :  { %2404 = vmatpush1.msra.mxu0 %v8062_v49  ;;  %2437 = vmatprep.mubr.f32.mxu0 %v9042_v63 }
 0x5eb   :  { %4824 = vmatpush3.msra.mxu1 %v8069_v61  ;;  %4825 = vmatprep.mubr.msk.f32.mxu1 %vm5679_vm0, %v9042_v63 }
 0x5ec   :  { %2514 = vmatprep.subr.mxu0 %v8077_v2  ;;  %4828 = vmatprep.subr.mxu1 %v9042_v63 }
 0x669   :  { %v2106_v6 = vpop.f32.mrf.mxu0  ;;  %v2177_v38 = vpop.f32.mrf.mxu1 }
 0x66a   :  { %v2107_v7 = vadd.f32 %v2106_v6, %v9282_v47  ;;  %v5336_v6 = vld [vmem:[%s9071_s13 + $0x18] sm:$0xff] }
 0x66b   :  { %v2108_v9 = vpop.f32.mrf.mxu0  ;;  %v4757_v10 = vpop.f32.mrf.mxu1 }
 0x66c   :  { %v2322_v61 = vadd.f32 %v5335_v15, %v2107_v7  ;;  %v2109_v34 = vadd.f32 %v2108_v9, %v9283_v36  ;;  %v2347_v10 = vrot.slane %v5336_v6, 6  ;;  %v2178_v9 = vadd.f32 %v2177_v38, %v9286_v8 }
 0x66e   :  { %v3905_v49 = vmul.f32 -1.442695, %v2322_v61  ;;  %v2331_v22 = vadd.f32 %v2329_v30, %v2109_v34 }
 0x670   :  { %5124 = vpow2.f32 %v3905_v49  ;;  %v3906_v2 = vmul.f32 -1.442695, %v2331_v22  ;;  %v2339_v49 = vrot.slane %v5335_v15, 4 }
 0x672   :  { %5126 = vpow2.f32 %v3906_v2 }
 0x67d   :  { %v5125_v33 = vpop.eup %5124 }
 0x67e   :  { %v2326_v45 = vadd.f32 1.0, %v5125_v33 }
 0x67f   :  { %v5127_v52 = vpop.eup %5126 }
 0x680   :  { %5128 = vrcp.f32 %v2326_v45  ;;  %v2335_v47 = vadd.f32 1.0, %v5127_v52  ;;  %v8095_v52 = vld [vmem:[%s9071_s13 + $0x20] sm:$0xf] }
 0x682   :  { %5130 = vrcp.f32 %v2335_v47 }
 0x68a   :  { %v2247_v14 = vpop.f32.mrf.mxu0  ;;  %v2318_v7 = vpop.f32.mrf.mxu1 }
 0x68b   :  { %v2248_v61 = vadd.f32 %v2247_v14, %v9285_v35 }
 0x68c   :  { %v2249_v30 = vpop.f32.mrf.mxu0  ;;  %v4792_v22 = vpop.f32.mrf.mxu1 }
 0x68d   :  { %v5129_v34 = vpop.eup %5128  ;;  %v2349_v2 = vadd.f32 %v2347_v10, %v2248_v61  ;;  %v2250_v36 = vadd.f32 %v2249_v30, %v6559_v41  ;;  %v8125_v22 = vld [vmem:[%s9022_s10 + $0x150] sm:$0xff] }
 0x68e   :  { %v2338_v33 = vmul.f32 %v5129_v34, %v2178_v9  ;;  %v8131_v34 = vld [vmem:[%s9022_s10 + $0x160] sm:$0xff] }
 0x68f   :  { %v3907_v45 = vmul.f32 -1.442695, %v2349_v2  ;;  %v2356_v14 = vadd.f32 %v8095_v52, %v2250_v36  ;;  %v5131_v15 = vpop.eup %5130  ;;  %v8106_v36 = vld [vmem:[%s9022_s10 + $0x168] sm:$0xff] }
 0x690   :  { %v2341_v39 = vadd.f32 %v2339_v49, %v2338_v33  ;;  %v2343_v10 = vsub.f32 1.0, %v5131_v15  ;;  %v2345_v30 = vmul.f32 %v5131_v15, %v7692_v53  ;;  %v8118_v53 = vld [vmem:[%s9022_s10 + $0x158] sm:$0xff]  ;;  %v8137_v33 = vld [vmem:[%s9022_s10 + $0x140] sm:$0xff] }
 0x691   :  { %5132 = vpow2.f32 %v3907_v45  ;;  %v3908_v38 = vmul.f32 -1.442695, %v2356_v14  ;;  %v8144_v45 = vld [vmem:[%s9022_s10 + $0x138] sm:$0xff]  ;;  %v8150_v14 = vld [vmem:[%s9022_s10 + $0x148] sm:$0xff] }
 0x692   :  { %5134 = vtanh.f32 %v2341_v39  ;;  %v8112_v39 = vld [vmem:[%s9022_s10 + $0x178] sm:$0xff] }
 0x693   :  { %5136 = vpow2.f32 %v3908_v38  ;;  %v8156_v38 = vld [vmem:[%s9022_s10 + $0x128] sm:$0xff] }
 0x69e   :  { %v5133_v6 = vpop.eup %5132 }
 0x69f   :  { %v5135_v61 = vpop.eup %5134  ;;  %v2353_v47 = vadd.f32 1.0, %v5133_v6  ;;  %v8163_v6 = vld [vmem:[%s9022_s10 + $0x120] sm:$0xff] }
 0x6a0   :  { %v2344_v9 = vmul.f32 %v5135_v61, %v2343_v10  ;;  %v5137_v2 = vpop.eup %5136  ;;  %v8169_v10 = vld [vmem:[%s9022_s10 + $0x130] sm:$0xff] }
 0x6a1   :  { %5138 = vrcp.f32 %v2353_v47  ;;  %v2360_v15 = vadd.f32 1.0, %v5137_v2  ;;  %v8175_v61 = vld [vmem:[%s9022_s10 + $0x110] sm:$0xff]  ;;  %v2319_v47 = vadd.f32 %v2318_v7, %v6573_v24  ;;  %v8190_v2 = vld [vmem:[%s9022_s10 + $0x118] sm:$0xff] }
 0x6a2   :  { %v8099_v49 = vadd.f32 %v2345_v30, %v2344_v9  ;;  %9316 = vst [vmem:[#allocation44_spill] sm:$0xff] %v8175_v61  ;;  %v2365_v9 = vrot.slane %v8095_v52, 2  ;;  %v8184_v30 = vld [vmem:[%s9022_s10 + $0x108] sm:$0xff]  ;;  %9318 = vst [vmem:[#allocation74_spill] sm:$0xff] %v8190_v2  ;;  %v8196_v7 = vld [vmem:[%s9022_s10 + $0xf8] sm:$0xff] }
 0x6a3   :  { %9317 = vst [vmem:[#allocation90_spill] sm:$0xff] %v8184_v30  ;;  %9319 = vst [vmem:[#allocation91_spill] sm:$0xff] %v8196_v7  ;;  %5140 = vrcp.f32 %v2360_v15 }
 0x6a4   :  { %2438 = vmatmul.mubr.f32.vlgmr.msra.gmra.mxu0 %v8099_v49  ;;  %4826 = vmatmul.mubr.f32.vlgmr.msra.gmra.mxu1 %v8099_v49 }
 0x6a5   :  { %2515 = vmatpush1.msra.mxu0 %v8106_v36  ;;  %4829 = vmatpush3.msra.mxu1 %v8112_v39 }
 0x6a6   :  { %2516 = vmatprep.subr.mxu0 %v8118_v53  ;;  %4830 = vmatprep.subr.mxu1 %v9042_v63 }
 0x6a7   :  { %2517 = vmatpush1.msra.mxu0 %v8125_v22  ;;  %4831 = vmatpush3.msra.mxu1 %v8131_v34 }
 0x6a8   :  { %2518 = vmatprep.subr.mxu0 %v8137_v33  ;;  %4832 = vmatprep.subr.mxu1 %v9042_v63 }
 0x6a9   :  { %2519 = vmatpush1.msra.mxu0 %v8144_v45  ;;  %4833 = vmatpush3.msra.mxu1 %v8150_v14 }
 0x6aa   :  { %2520 = vmatprep.subr.mxu0 %v8156_v38  ;;  %4834 = vmatprep.subr.mxu1 %v9042_v63 }
 0x6ab   :  { %2521 = vmatpush1.msra.mxu0 %v8163_v6  ;;  %4835 = vmatpush3.msra.mxu1 %v8169_v10 }
 0x6ac   :  { %2522 = vmatprep.subr.mxu0 %v8175_v61  ;;  %4836 = vmatprep.subr.mxu1 %v9042_v63 }
 0x6ad   :  { %2523 = vmatpush1.msra.mxu0 %v8184_v30  ;;  %4837 = vmatpush3.msra.mxu1 %v8190_v2  ;;  %v8203_v30 = vld [vmem:[%s9022_s10 + $0xf0] sm:$0xff]  ;;  %v8209_v2 = vld [vmem:[%s9022_s10 + $0x100] sm:$0xff] }
 0x6ae   :  { %v5139_v61 = vpop.eup %5138  ;;  %2524 = vmatprep.subr.mxu0 %v8196_v7  ;;  %4838 = vmatprep.subr.mxu1 %v9042_v63  ;;  %9320 = vst [vmem:[#allocation77_spill] sm:$0xff] %v8203_v30  ;;  %9321 = vst [vmem:[#allocation69_spill] sm:$0xff] %v8209_v2  ;;  %v8215_v7 = vld [vmem:[%s9022_s10 + $0xe0] sm:$0xff] }
 0x6af   :  { %v2363_v52 = vmul.f32 %v5139_v61, %v2319_v47  ;;  %2525 = vmatpush1.msra.mxu0 %v8203_v30  ;;  %4839 = vmatpush3.msra.mxu1 %v8209_v2  ;;  %9322 = vst [vmem:[#allocation53_spill] sm:$0xff] %v8215_v7  ;;  %v8222_v61 = vld [vmem:[%s9022_s10 + $0xd8] sm:$0xff]  ;;  %v8228_v47 = vld [vmem:[%s9022_s10 + $0xe8] sm:$0xff] }
 0x6b0   :  { %2526 = vmatprep.subr.mxu0 %v8215_v7  ;;  %4840 = vmatprep.subr.mxu1 %v9042_v63  ;;  %9323 = vst [vmem:[#allocation55_spill] sm:$0xff] %v8222_v61  ;;  %9324 = vst [vmem:[#allocation72_spill] sm:$0xff] %v8228_v47  ;;  %v8234_v7 = vld [vmem:[%s9022_s10 + $0xc8] sm:$0xff] }
 0x6b1   :  { %v2367_v15 = vadd.f32 %v2365_v9, %v2363_v52  ;;  %2527 = vmatpush1.msra.mxu0 %v8222_v61  ;;  %4841 = vmatpush3.msra.mxu1 %v8228_v47  ;;  %9325 = vst [vmem:[#allocation56_spill] sm:$0xff] %v8234_v7  ;;  %v8241_v9 = vld [vmem:[%s9022_s10 + $0xc0] sm:$0xff]  ;;  %v8247_v52 = vld [vmem:[%s9022_s10 + $0xd0] sm:$0xff] }
 0x6b2   :  { %2528 = vmatprep.subr.mxu0 %v8234_v7  ;;  %4842 = vmatprep.subr.mxu1 %v9042_v63  ;;  %9326 = vst [vmem:[#allocation75_spill] sm:$0xff] %v8241_v9  ;;  %9327 = vst [vmem:[#allocation59_spill] sm:$0xff] %v8247_v52  ;;  %v8253_v7 = vld [vmem:[%s9022_s10 + $0xb0] sm:$0xff] }
 0x6b3   :  { %5142 = vtanh.f32 %v2367_v15  ;;  %2529 = vmatpush1.msra.mxu0 %v8241_v9  ;;  %4843 = vmatpush3.msra.mxu1 %v8247_v52  ;;  %9328 = vst [vmem:[#allocation61_spill] sm:$0xff] %v8253_v7  ;;  %v8260_v15 = vld [vmem:[%s9022_s10 + $0xa8] sm:$0xff]  ;;  %v8266_v52 = vld [vmem:[%s9022_s10 + $0xb8] sm:$0xff]  ;;  %v5141_v9 = vpop.eup %5140 }
 0x6b4   :  { %2530 = vmatprep.subr.mxu0 %v8253_v7  ;;  %4844 = vmatprep.subr.mxu1 %v9042_v63  ;;  %9329 = vst [vmem:[#allocation78_spill] sm:$0xff] %v8260_v15  ;;  %9330 = vst [vmem:[#allocation62_spill] sm:$0xff] %v8266_v52  ;;  %v8272_v7 = vld [vmem:[%s9022_s10 + $0x98] sm:$0xff]  ;;  %v2369_v47 = vsub.f32 1.0, %v5141_v9  ;;  %v2371_v30 = vmul.f32 %v5141_v9, %v7760_v40  ;;  %v8403_v40 = vld [vmem:[%s9022_s10 + $0x10] sm:$0xff] }
 0x6b5   :  { %2531 = vmatpush1.msra.mxu0 %v8260_v15  ;;  %4845 = vmatpush3.msra.mxu1 %v8266_v52  ;;  %9331 = vst [vmem:[#allocation63_spill] sm:$0xff] %v8272_v7  ;;  %v8279_v15 = vld [vmem:[%s9022_s10 + $0x90] sm:$0xff]  ;;  %v8285_v52 = vld [vmem:[%s9022_s10 + $0xa0] sm:$0xff] }
 0x6b6   :  { %2532 = vmatprep.subr.mxu0 %v8272_v7  ;;  %4846 = vmatprep.subr.mxu1 %v9042_v63  ;;  %9332 = vst [vmem:[#allocation81_spill] sm:$0xff] %v8279_v15  ;;  %9333 = vst [vmem:[#allocation65_spill] sm:$0xff] %v8285_v52  ;;  %v8291_v7 = vld [vmem:[%s9022_s10 + $0x80] sm:$0xff] }
 0x6b7   :  { %2533 = vmatpush1.msra.mxu0 %v8279_v15  ;;  %4847 = vmatpush3.msra.mxu1 %v8285_v52  ;;  %9334 = vst [vmem:[#allocation82_spill] sm:$0xff] %v8291_v7  ;;  %v8298_v15 = vld [vmem:[%s9022_s10 + $0x78] sm:$0xff]  ;;  %v8304_v52 = vld [vmem:[%s9022_s10 + $0x88] sm:$0xff] }
 0x6b8   :  { %2534 = vmatprep.subr.mxu0 %v8291_v7  ;;  %4848 = vmatprep.subr.mxu1 %v9042_v63  ;;  %9335 = vst [vmem:[#allocation83_spill] sm:$0xff] %v8298_v15  ;;  %9336 = vst [vmem:[#allocation85_spill] sm:$0xff] %v8304_v52  ;;  %v8310_v7 = vld [vmem:[%s9022_s10 + $0x68] sm:$0xff] }
 0x6b9   :  { %2535 = vmatpush1.msra.mxu0 %v8298_v15  ;;  %4849 = vmatpush3.msra.mxu1 %v8304_v52  ;;  %9337 = vst [vmem:[#allocation86_spill] sm:$0xff] %v8310_v7  ;;  %v8317_v15 = vld [vmem:[%s9022_s10 + $0x60] sm:$0xff]  ;;  %v8323_v52 = vld [vmem:[%s9022_s10 + $0x70] sm:$0xff] }
 0x6ba   :  { %2536 = vmatprep.subr.mxu0 %v8310_v7  ;;  %4850 = vmatprep.subr.mxu1 %v9042_v63  ;;  %9338 = vst [vmem:[#allocation88_spill] sm:$0xff] %v8317_v15  ;;  %9339 = vst [vmem:[#allocation32_spill] sm:$0xff] %v8323_v52  ;;  %v8329_v7 = vld [vmem:[%s9022_s10 + $0x50] sm:$0xff] }
 0x6bb   :  { %2537 = vmatpush1.msra.mxu0 %v8317_v15  ;;  %4851 = vmatpush3.msra.mxu1 %v8323_v52  ;;  %9340 = vst [vmem:[#allocation33_spill] sm:$0xff] %v8329_v7  ;;  %v8336_v15 = vld [vmem:[%s9022_s10 + $0x48] sm:$0xff]  ;;  %v8342_v52 = vld [vmem:[%s9022_s10 + $0x58] sm:$0xff] }
 0x6bc   :  { %2538 = vmatprep.subr.mxu0 %v8329_v7  ;;  %4852 = vmatprep.subr.mxu1 %v9042_v63  ;;  %9341 = vst [vmem:[#allocation34_spill] sm:$0xff] %v8336_v15  ;;  %9342 = vst [vmem:[#allocation35_spill] sm:$0xff] %v8342_v52  ;;  %v8348_v7 = vld [vmem:[%s9022_s10 + $0x38] sm:$0xff] }
 0x6bd   :  { %2539 = vmatpush1.msra.mxu0 %v8336_v15  ;;  %4853 = vmatpush3.msra.mxu1 %v8342_v52  ;;  %9343 = vst [vmem:[#allocation46_spill] sm:$0xff] %v8348_v7  ;;  %v8355_v15 = vld [vmem:[%s9022_s10 + $0x30] sm:$0xff]  ;;  %v8361_v52 = vld [vmem:[%s9022_s10 + $0x40] sm:$0xff] }
 0x6be   :  { %2540 = vmatprep.subr.mxu0 %v8348_v7  ;;  %4854 = vmatprep.subr.mxu1 %v9042_v63  ;;  %9344 = vst [vmem:[#allocation36_spill] sm:$0xff] %v8355_v15  ;;  %9345 = vst [vmem:[#allocation37_spill] sm:$0xff] %v8361_v52  ;;  %v8367_v7 = vld [vmem:[%s9022_s10 + $0x20] sm:$0xff] }
 0x6bf   :  { %2541 = vmatpush1.msra.mxu0 %v8355_v15  ;;  %4855 = vmatpush3.msra.mxu1 %v8361_v52  ;;  %9346 = vst [vmem:[#allocation49_spill] sm:$0xff] %v8367_v7  ;;  %v8374_v15 = vld [vmem:[%s9022_s10 + $0x18] sm:$0xff]  ;;  %v8380_v52 = vld [vmem:[%s9022_s10 + $0x28] sm:$0xff] }
 0x6c0   :  { %v5143_v61 = vpop.eup %5142  ;;  %2542 = vmatprep.subr.mxu0 %v8367_v7  ;;  %4856 = vmatprep.subr.mxu1 %v9042_v63  ;;  %9347 = vst [vmem:[#allocation79_spill] sm:$0xff] %v8374_v15  ;;  %v8387_v7 = vld [vmem:[%s9022_s10 + $0x8] sm:$0xff] }
 0x6c1   :  { %2543 = vmatpush1.msra.mxu0 %v8374_v15  ;;  %4857 = vmatpush3.msra.mxu1 %v8380_v52  ;;  %v2370_v2 = vmul.f32 %v5143_v61, %v2369_v47  ;;  %v8394_v15 = vld [vmem:[%s9022_s10] sm:$0xff] }
 0x6c2   :  { %2544 = vmatprep.subr.mxu0 %v8387_v7  ;;  %4858 = vmatprep.subr.mxu1 %v9042_v63 }
 0x6c3   :  { %2545 = vmatpush1.msra.mxu0 %v8394_v15  ;;  %2578 = vmatprep.mubr.f32.mxu0 %v9042_v63  ;;  %v8398_v61 = vadd.f32 %v2371_v30, %v2370_v2 }
 0x6c4   :  { %4859 = vmatpush3.msra.mxu1 %v8403_v40  ;;  %4860 = vmatprep.mubr.msk.f32.mxu1 %vm5679_vm0, %v9042_v63 }
 0x6c5   :  { %2579 = vmatmul.mubr.f32.vlgmr.msra.gmra.mxu0 %v8398_v61  ;;  %4861 = vmatmul.mubr.f32.vlgmr.msra.gmra.mxu1 %v8398_v61 }
 0x6c6   :  { %2706 = vmatprep.subr.mxu0 %v7770_v21  ;;  %4863 = vmatprep.subr.mxu1 %v9042_v63  ;;  %v9348_v21 = vld [vmem:[#allocation92_spill] sm:$0xff] }
 0x6c7   :  { %2707 = vmatpush1.msra.mxu0 %v7777_v28  ;;  %4864 = vmatpush3.msra.mxu1 %v7783_v20  ;;  %v9349_v28 = vld [vmem:[#allocation80_spill] sm:$0xff]  ;;  %v9350_v20 = vld [vmem:[#allocation38_spill] sm:$0xff] }
 0x6c8   :  { %2708 = vmatprep.subr.mxu0 %v7789_v1  ;;  %4865 = vmatprep.subr.mxu1 %v9042_v63  ;;  %v9351_v1 = vld [vmem:[#allocation39_spill] sm:$0xff] }
 0x6c9   :  { %2709 = vmatpush1.msra.mxu0 %v7796_v16  ;;  %4866 = vmatpush3.msra.mxu1 %v7802_v48  ;;  %v9352_v16 = vld [vmem:[#allocation51_spill] sm:$0xff]  ;;  %v9353_v48 = vld [vmem:[#allocation40_spill] sm:$0xff] }
 0x6ca   :  { %2710 = vmatprep.subr.mxu0 %v7808_v46  ;;  %4867 = vmatprep.subr.mxu1 %v9042_v63  ;;  %v9354_v46 = vld [vmem:[#allocation41_spill] sm:$0xff] }
 0x6cb   :  { %2711 = vmatpush1.msra.mxu0 %v7815_v0  ;;  %4868 = vmatpush3.msra.mxu1 %v7821_v62  ;;  %v9355_v0 = vld [vmem:[#allocation52_spill] sm:$0xff]  ;;  %v9356_v62 = vld [vmem:[#allocation42_spill] sm:$0xff] }
 0x6cc   :  { %2712 = vmatprep.subr.mxu0 %v7827_v51  ;;  %4869 = vmatprep.subr.mxu1 %v9042_v63  ;;  %v9357_v51 = vld [vmem:[#allocation43_spill] sm:$0xff] }
 0x6cd   :  { %2713 = vmatpush1.msra.mxu0 %v7834_v19  ;;  %4870 = vmatpush3.msra.mxu1 %v7840_v3  ;;  %v9358_v19 = vld [vmem:[#allocation54_spill] sm:$0xff] }
 0x6ce   :  { %2714 = vmatprep.subr.mxu0 %v7846_v5  ;;  %4871 = vmatprep.subr.mxu1 %v9042_v63 }
 0x6cf   :  { %2715 = vmatpush1.msra.mxu0 %v7853_v55  ;;  %4872 = vmatpush3.msra.mxu1 %v7859_v56  ;;  %v9359_v55 = vld [vmem:[#allocation95_spill] sm:$0xff] }
 0x6d0   :  { %2716 = vmatprep.subr.mxu0 %v7865_v58  ;;  %4873 = vmatprep.subr.mxu1 %v9042_v63 }
 0x6d1   :  { %2717 = vmatpush1.msra.mxu0 %v7872_v44  ;;  %4874 = vmatpush3.msra.mxu1 %v7878_v50  ;;  %v5384_v50 = vld [vmem:[%s9071_s13 + $0x48] sm:$0xff] }
 0x6d2   :  { %2718 = vmatprep.subr.mxu0 %v7884_v57  ;;  %4875 = vmatprep.subr.mxu1 %v9042_v63 }
 0x6d3   :  { %2719 = vmatpush1.msra.mxu0 %v7891_v60  ;;  %4876 = vmatpush3.msra.mxu1 %v7897_v26  ;;  %v9360_v26 = vld [vmem:[#allocation97_spill] sm:$0xff] }
 0x6d4   :  { %2720 = vmatprep.subr.mxu0 %v7903_v29  ;;  %4877 = vmatprep.subr.mxu1 %v9042_v63 }
 0x6d5   :  { %2721 = vmatpush1.msra.mxu0 %v7910_v32  ;;  %4878 = vmatpush3.msra.mxu1 %v7916_v31  ;;  %v2662_v32 = vrot.slane %v5384_v50, 2 }
 0x6d6   :  { %2722 = vmatprep.subr.mxu0 %v7922_v43  ;;  %4879 = vmatprep.subr.mxu1 %v9042_v63 }
 0x6d7   :  { %2723 = vmatpush1.msra.mxu0 %v7929_v59  ;;  %4880 = vmatpush3.msra.mxu1 %v7935_v4 }
 0x6d8   :  { %2724 = vmatprep.subr.mxu0 %v7941_v54  ;;  %4881 = vmatprep.subr.mxu1 %v9042_v63 }
 0x6d9   :  { %2725 = vmatpush1.msra.mxu0 %v7948_v12  ;;  %4882 = vmatpush3.msra.mxu1 %v7954_v37  ;;  %v5385_v12 = vld [vmem:[%s9071_s13 + $0xc] sm:$0xff] }
 0x6da   :  { %2726 = vmatprep.subr.mxu0 %v7960_v13  ;;  %4883 = vmatprep.subr.mxu1 %v9042_v63  ;;  %v2680_v37 = vrot.slane %v5385_v12, 6  ;;  %v9379_v12 = vld [vmem:[#allocation82_spill] sm:$0xff] }
 0x6db   :  { %2727 = vmatpush1.msra.mxu0 %v7967_v27  ;;  %4884 = vmatpush3.msra.mxu1 %v7973_v25 }
 0x6dc   :  { %2728 = vmatprep.subr.mxu0 %v7979_v42  ;;  %4885 = vmatprep.subr.mxu1 %v9042_v63 }
 0x6dd   :  { %2729 = vmatpush1.msra.mxu0 %v7986_v18  ;;  %4886 = vmatpush3.msra.mxu1 %v7992_v23  ;;  %v2672_v23 = vrot.slane %v5384_v50, 4 }
 0x6de   :  { %2730 = vmatprep.subr.mxu0 %v7998_v17  ;;  %4887 = vmatprep.subr.mxu1 %v9042_v63 }
 0x6df   :  { %2731 = vmatpush1.msra.mxu0 %v8005_v11  ;;  %4888 = vmatpush3.msra.mxu1 %v9348_v21 }
 0x6e0   :  { %2732 = vmatprep.subr.mxu0 %v9349_v28  ;;  %4889 = vmatprep.subr.mxu1 %v9042_v63 }
 0x6e1   :  { %2733 = vmatpush1.msra.mxu0 %v9350_v20  ;;  %4890 = vmatpush3.msra.mxu1 %v9351_v1  ;;  %v3878_v20 = vld [vmem:[%s9071_s13 + $0x14] sm:$0xf] }
 0x6e2   :  { %2734 = vmatprep.subr.mxu0 %v9352_v16  ;;  %4891 = vmatprep.subr.mxu1 %v9042_v63 }
 0x6e3   :  { %2735 = vmatpush1.msra.mxu0 %v9353_v48  ;;  %4892 = vmatpush3.msra.mxu1 %v9354_v46 }
 0x6e4   :  { %2736 = vmatprep.subr.mxu0 %v9355_v0  ;;  %4893 = vmatprep.subr.mxu1 %v9042_v63 }
 0x6e5   :  { %2737 = vmatpush1.msra.mxu0 %v9356_v62  ;;  %2770 = vmatprep.mubr.f32.mxu0 %v9042_v63 }
 0x6e6   :  { %4894 = vmatpush3.msra.mxu1 %v9357_v51  ;;  %4895 = vmatprep.mubr.msk.f32.mxu1 %vm5679_vm0, %v9042_v63 }
 0x6e7   :  { %2847 = vmatprep.subr.mxu0 %v9358_v19  ;;  %4898 = vmatprep.subr.mxu1 %v9042_v63 }
 0x764   :  { %v2439_v3 = vpop.f32.mrf.mxu0  ;;  %v2510_v5 = vpop.f32.mrf.mxu1 }
 0x765   :  { %v2440_v56 = vadd.f32 %v2439_v3, %v9359_v55  ;;  %v2511_v18 = vadd.f32 %v2510_v5, %v9286_v8 }
 0x766   :  { %v2441_v58 = vpop.f32.mrf.mxu0  ;;  %v4827_v44 = vpop.f32.mrf.mxu1 }
 0x767   :  { %v2655_v57 = vadd.f32 %v5384_v50, %v2440_v56  ;;  %v2442_v29 = vadd.f32 %v2441_v58, %v9360_v26  ;;  %v9367_v56 = vld [vmem:[#allocation53_spill] sm:$0xff]  ;;  %v9368_v44 = vld [vmem:[#allocation55_spill] sm:$0xff]  ;;  %v9369_v50 = vld [vmem:[#allocation72_spill] sm:$0xff] }
 0x769   :  { %v3909_v60 = vmul.f32 -1.442695, %v2655_v57  ;;  %v2664_v31 = vadd.f32 %v2662_v32, %v2442_v29  ;;  %v9370_v57 = vld [vmem:[#allocation56_spill] sm:$0xff]  ;;  %v9372_v29 = vld [vmem:[#allocation59_spill] sm:$0xff]  ;;  %v9373_v32 = vld [vmem:[#allocation61_spill] sm:$0xff] }
 0x76b   :  { %5144 = vpow2.f32 %v3909_v60  ;;  %v3910_v43 = vmul.f32 -1.442695, %v2664_v31  ;;  %v9371_v60 = vld [vmem:[#allocation75_spill] sm:$0xff]  ;;  %v9374_v31 = vld [vmem:[#allocation78_spill] sm:$0xff] }
 0x76d   :  { %5146 = vpow2.f32 %v3910_v43  ;;  %v9375_v43 = vld [vmem:[#allocation62_spill] sm:$0xff] }
 0x778   :  { %v5145_v59 = vpop.eup %5144 }
 0x779   :  { %v2659_v4 = vadd.f32 1.0, %v5145_v59  ;;  %v9376_v59 = vld [vmem:[#allocation63_spill] sm:$0xff] }
 0x77a   :  { %v5147_v54 = vpop.eup %5146 }
 0x77b   :  { %5148 = vrcp.f32 %v2659_v4  ;;  %v2668_v13 = vadd.f32 1.0, %v5147_v54  ;;  %v9377_v4 = vld [vmem:[#allocation81_spill] sm:$0xff] }
 0x77c   :  { %v9378_v54 = vld [vmem:[#allocation65_spill] sm:$0xff] }
 0x77d   :  { %5150 = vrcp.f32 %v2668_v13  ;;  %v9381_v13 = vld [vmem:[#allocation85_spill] sm:$0xff] }
 0x785   :  { %v2580_v27 = vpop.f32.mrf.mxu0  ;;  %v2651_v25 = vpop.f32.mrf.mxu1 }
 0x786   :  { %v2581_v42 = vadd.f32 %v2580_v27, %v9285_v35  ;;  %v9382_v27 = vld [vmem:[#allocation86_spill] sm:$0xff] }
 0x787   :  { %v2582_v17 = vpop.f32.mrf.mxu0  ;;  %v4862_v11 = vpop.f32.mrf.mxu1 }
 0x788   :  { %v5149_v30 = vpop.eup %5148  ;;  %v2682_v2 = vadd.f32 %v2680_v37, %v2581_v42  ;;  %v2583_v21 = vadd.f32 %v2582_v17, %v6559_v41  ;;  %v9380_v37 = vld [vmem:[#allocation83_spill] sm:$0xff]  ;;  %v9384_v42 = vld [vmem:[#allocation32_spill] sm:$0xff]  ;;  %v9386_v17 = vld [vmem:[#allocation34_spill] sm:$0xff] }
 0x789   :  { %v2671_v47 = vmul.f32 %v5149_v30, %v2511_v18  ;;  %v9387_v11 = vld [vmem:[#allocation35_spill] sm:$0xff]  ;;  %v9388_v30 = vld [vmem:[#allocation46_spill] sm:$0xff] }
 0x78a   :  { %v3911_v9 = vmul.f32 -1.442695, %v2682_v2  ;;  %v2689_v1 = vadd.f32 %v3878_v20, %v2583_v21  ;;  %v5151_v48 = vpop.eup %5150  ;;  %v9389_v2 = vld [vmem:[#allocation36_spill] sm:$0xff] }
 0x78b   :  { %v2674_v28 = vadd.f32 %v2672_v23, %v2671_v47  ;;  %v2676_v0 = vsub.f32 1.0, %v5151_v48  ;;  %v2678_v3 = vmul.f32 %v5151_v48, %v8099_v49  ;;  %v9385_v23 = vld [vmem:[#allocation33_spill] sm:$0xff] }
 0x78c   :  { %5152 = vpow2.f32 %v3911_v9  ;;  %v3912_v16 = vmul.f32 -1.442695, %v2689_v1  ;;  %v9390_v47 = vld [vmem:[#allocation37_spill] sm:$0xff] }
 0x78d   :  { %5154 = vtanh.f32 %v2674_v28  ;;  %v9391_v28 = vld [vmem:[#allocation49_spill] sm:$0xff] }
 0x78e   :  { %5156 = vpow2.f32 %v3912_v16 }
 0x799   :  { %v5153_v46 = vpop.eup %5152 }
 0x79a   :  { %v5155_v62 = vpop.eup %5154  ;;  %v2686_v51 = vadd.f32 1.0, %v5153_v46  ;;  %v3072_v46 = vld [vmem:[#allocation6 + $0xe8] sm:$0xff] }
 0x79b   :  { %v2677_v19 = vmul.f32 %v5155_v62, %v2676_v0  ;;  %v5157_v49 = vpop.eup %5156  ;;  %v3056_v0 = vld [vmem:[#allocation6 + $0x68] sm:$0xff]  ;;  %v3055_v62 = vld [vmem:[#allocation6 + $0x60] sm:$0xff] }
 0x79c   :  { %5158 = vrcp.f32 %v2686_v51  ;;  %v3070_v51 = vld [vmem:[#allocation6 + $0xd8] sm:$0xff] }
 0x79d   :  { %v8494_v5 = vadd.f32 %v2678_v3, %v2677_v19  ;;  %v3054_v19 = vld [vmem:[#allocation6 + $0x58] sm:$0xff]  ;;  %v3069_v3 = vld [vmem:[#allocation6 + $0xd0] sm:$0xff] }
 0x79f   :  { %2771 = vmatmul.mubr.f32.vlgmr.msra.gmra.mxu0 %v8494_v5  ;;  %4896 = vmatmul.mubr.f32.vlgmr.msra.gmra.mxu1 %v8494_v5 }
 0x7a0   :  { %2848 = vmatpush1.msra.mxu0 %v8106_v36  ;;  %4899 = vmatpush3.msra.mxu1 %v8112_v39  ;;  %v2693_v36 = vadd.f32 1.0, %v5157_v49  ;;  %v9361_v39 = vld [vmem:[#allocation44_spill] sm:$0xff] }
 0x7a1   :  { %2849 = vmatprep.subr.mxu0 %v8118_v53  ;;  %4900 = vmatprep.subr.mxu1 %v9042_v63  ;;  %v2652_v53 = vadd.f32 %v2651_v25, %v6573_v24  ;;  %v9383_v25 = vld [vmem:[#allocation88_spill] sm:$0xff] }
 0x7a2   :  { %2850 = vmatpush1.msra.mxu0 %v8125_v22  ;;  %4901 = vmatpush3.msra.mxu1 %v8131_v34  ;;  %v2698_v22 = vrot.slane %v3878_v20, 2  ;;  %v9362_v34 = vld [vmem:[#allocation90_spill] sm:$0xff]  ;;  %5160 = vrcp.f32 %v2693_v36  ;;  %v9392_v20 = vld [vmem:[#allocation79_spill] sm:$0xff]  ;;  %v3053_v49 = vld [vmem:[#allocation6 + $0x50] sm:$0xff] }
 0x7a3   :  { %2851 = vmatprep.subr.mxu0 %v8137_v33  ;;  %4902 = vmatprep.subr.mxu1 %v9042_v63  ;;  %v9363_v33 = vld [vmem:[#allocation74_spill] sm:$0xff]  ;;  %v3068_v36 = vld [vmem:[#allocation6 + $0xc8] sm:$0xff] }
 0x7a4   :  { %2852 = vmatpush1.msra.mxu0 %v8144_v45  ;;  %4903 = vmatpush3.msra.mxu1 %v8150_v14  ;;  %v9364_v14 = vld [vmem:[#allocation91_spill] sm:$0xff] }
 0x7a5   :  { %2853 = vmatprep.subr.mxu0 %v8156_v38  ;;  %4904 = vmatprep.subr.mxu1 %v9042_v63 }
 0x7a6   :  { %2854 = vmatpush1.msra.mxu0 %v8163_v6  ;;  %4905 = vmatpush3.msra.mxu1 %v8169_v10  ;;  %v9365_v6 = vld [vmem:[#allocation77_spill] sm:$0xff] }
 0x7a7   :  { %2855 = vmatprep.subr.mxu0 %v9361_v39  ;;  %4906 = vmatprep.subr.mxu1 %v9042_v63  ;;  %v9366_v10 = vld [vmem:[#allocation69_spill] sm:$0xff]  ;;  %v3052_v39 = vld [vmem:[#allocation6 + $0x48] sm:$0xff] }
 0x7a8   :  { %2856 = vmatpush1.msra.mxu0 %v9362_v34  ;;  %4907 = vmatpush3.msra.mxu1 %v9363_v33  ;;  %v3066_v34 = vld [vmem:[#allocation6 + $0xb8] sm:$0xff] }
 0x7a9   :  { %v5159_v45 = vpop.eup %5158  ;;  %2857 = vmatprep.subr.mxu0 %v9364_v14  ;;  %4908 = vmatprep.subr.mxu1 %v9042_v63  ;;  %v3050_v33 = vld [vmem:[#allocation6 + $0x38] sm:$0xff]  ;;  %v3049_v14 = vld [vmem:[#allocation6 + $0x30] sm:$0xff] }
 0x7aa   :  { %v2696_v38 = vmul.f32 %v5159_v45, %v2652_v53  ;;  %2858 = vmatpush1.msra.mxu0 %v9365_v6  ;;  %4909 = vmatpush3.msra.mxu1 %v9366_v10  ;;  %v3067_v53 = vld [vmem:[#allocation6 + $0xc0] sm:$0xff]  ;;  %v3065_v45 = vld [vmem:[#allocation6 + $0xb0] sm:$0xff]  ;;  %v3048_v6 = vld [vmem:[#allocation6 + $0x28] sm:$0xff] }
 0x7ab   :  { %2859 = vmatprep.subr.mxu0 %v9367_v56  ;;  %4910 = vmatprep.subr.mxu1 %v9042_v63  ;;  %v3063_v10 = vld [vmem:[#allocation6 + $0xa0] sm:$0xff] }
 0x7ac   :  { %v2700_v58 = vadd.f32 %v2698_v22, %v2696_v38  ;;  %2860 = vmatpush1.msra.mxu0 %v9368_v44  ;;  %4911 = vmatpush3.msra.mxu1 %v9369_v50  ;;  %v3051_v22 = vld [vmem:[#allocation6 + $0x40] sm:$0xff]  ;;  %v3064_v38 = vld [vmem:[#allocation6 + $0xa8] sm:$0xff]  ;;  %v3046_v44 = vld [vmem:[#allocation6 + $0x18] sm:$0xff] }
 0x7ad   :  { %2861 = vmatprep.subr.mxu0 %v9370_v57  ;;  %4912 = vmatprep.subr.mxu1 %v9042_v63  ;;  %v3047_v56 = vld [vmem:[#allocation6 + $0x20] sm:$0xff]  ;;  %v3061_v50 = vld [vmem:[#allocation6 + $0x90] sm:$0xff] }
 0x7ae   :  { %5162 = vtanh.f32 %v2700_v58  ;;  %2862 = vmatpush1.msra.mxu0 %v9371_v60  ;;  %4913 = vmatpush3.msra.mxu1 %v9372_v29  ;;  %v3062_v58 = vld [vmem:[#allocation6 + $0x98] sm:$0xff]  ;;  %v3045_v57 = vld [vmem:[#allocation6 + $0x10] sm:$0xff]  ;;  %v3060_v60 = vld [vmem:[#allocation6 + $0x88] sm:$0xff] }
 0x7af   :  { %2863 = vmatprep.subr.mxu0 %v9373_v32  ;;  %4914 = vmatprep.subr.mxu1 %v9042_v63  ;;  %v5161_v18 = vpop.eup %5160  ;;  %v3044_v29 = vld [vmem:[#allocation6 + $0x8] sm:$0xff]  ;;  %v3059_v32 = vld [vmem:[#allocation6 + $0x80] sm:$0xff] }
 0x7b0   :  { %2864 = vmatpush1.msra.mxu0 %v9374_v31  ;;  %4915 = vmatpush3.msra.mxu1 %v9375_v43  ;;  %v2702_v9 = vsub.f32 1.0, %v5161_v18  ;;  %v2704_v16 = vmul.f32 %v5161_v18, %v8398_v61  ;;  %v3073_v61 = vld [vmem:[#allocation6 + $0xf0] sm:$0xff]  ;;  %v3043_v31 = vld [vmem:[#allocation6] sm:$0xff]  ;;  %v3179_v18 = vld [vmem:[#allocation8 + $0xe8] sm:$0xff] }
 0x7b1   :  { %2865 = vmatprep.subr.mxu0 %v9376_v59  ;;  %4916 = vmatprep.subr.mxu1 %v9042_v63  ;;  %v8572_v43 = vld [vmem:[%s9393_s0 + $0x8] sm:$0xff]  ;;  %v3181_v59 = vld [vmem:[#allocation8 + $0xf8] sm:$0xff] }
 0x7b2   :  { %2866 = vmatpush1.msra.mxu0 %v9377_v4  ;;  %4917 = vmatpush3.msra.mxu1 %v9378_v54  ;;  %v3463_v4 = vld [vmem:[#allocation12 + $0xf8] sm:$0xff] }
 0x7b3   :  { %2867 = vmatprep.subr.mxu0 %v9379_v12  ;;  %4918 = vmatprep.subr.mxu1 %v9042_v63  ;;  %v8578_v54 = vld [vmem:[%s9393_s0] sm:$0xff] }
 0x7b4   :  { %2868 = vmatpush1.msra.mxu0 %v9380_v37  ;;  %4919 = vmatpush3.msra.mxu1 %v9381_v13  ;;  %v3165_v12 = vld [vmem:[#allocation8 + $0x78] sm:$0xff]  ;;  %v3180_v13 = vld [vmem:[#allocation8 + $0xf0] sm:$0xff] }
 0x7b5   :  { %2869 = vmatprep.subr.mxu0 %v9382_v27  ;;  %4920 = vmatprep.subr.mxu1 %v9042_v63  ;;  %v3447_v37 = vld [vmem:[#allocation12 + $0x78] sm:$0xff]  ;;  %v3462_v27 = vld [vmem:[#allocation12 + $0xf0] sm:$0xff] }
 0x7b6   :  { %2870 = vmatpush1.msra.mxu0 %v9383_v25  ;;  %4921 = vmatpush3.msra.mxu1 %v9384_v42  ;;  %v3164_v25 = vld [vmem:[#allocation8 + $0x70] sm:$0xff] }
 0x7b7   :  { %2871 = vmatprep.subr.mxu0 %v9385_v23  ;;  %4922 = vmatprep.subr.mxu1 %v9042_v63  ;;  %v3446_v42 = vld [vmem:[#allocation12 + $0x70] sm:$0xff]  ;;  %v3461_v23 = vld [vmem:[#allocation12 + $0xe8] sm:$0xff] }
 0x7b8   :  { %2872 = vmatpush1.msra.mxu0 %v9386_v17  ;;  %4923 = vmatpush3.msra.mxu1 %v9387_v11  ;;  %v3163_v17 = vld [vmem:[#allocation8 + $0x68] sm:$0xff] }
 0x7b9   :  { %2873 = vmatprep.subr.mxu0 %v9388_v30  ;;  %4924 = vmatprep.subr.mxu1 %v9042_v63  ;;  %v3445_v11 = vld [vmem:[#allocation12 + $0x68] sm:$0xff]  ;;  %v3178_v30 = vld [vmem:[#allocation8 + $0xe0] sm:$0xff] }
 0x7ba   :  { %2874 = vmatpush1.msra.mxu0 %v9389_v2  ;;  %4925 = vmatpush3.msra.mxu1 %v9390_v47  ;;  %v3460_v2 = vld [vmem:[#allocation12 + $0xe0] sm:$0xff] }
 0x7bb   :  { %v5163_v21 = vpop.eup %5162  ;;  %2875 = vmatprep.subr.mxu0 %v9391_v28  ;;  %4926 = vmatprep.subr.mxu1 %v9042_v63  ;;  %v3162_v47 = vld [vmem:[#allocation8 + $0x60] sm:$0xff] }
 0x7bc   :  { %2876 = vmatpush1.msra.mxu0 %v9392_v20  ;;  %4927 = vmatpush3.msra.mxu1 %v8380_v52  ;;  %v2703_v1 = vmul.f32 %v5163_v21, %v2702_v9  ;;  %v3074_v52 = vld [vmem:[#allocation6 + $0xf8] sm:$0xff]  ;;  %v3444_v9 = vld [vmem:[#allocation12 + $0x60] sm:$0xff] }
 0x7bd   :  { %2877 = vmatprep.subr.mxu0 %v8387_v7  ;;  %4928 = vmatprep.subr.mxu1 %v9042_v63  ;;  %v3058_v7 = vld [vmem:[#allocation6 + $0x78] sm:$0xff] }
 0x7be   :  { %2878 = vmatpush1.msra.mxu0 %v8394_v15  ;;  %2911 = vmatprep.mubr.f32.mxu0 %v9042_v63  ;;  %v8562_v48 = vadd.f32 %v2704_v16, %v2703_v1  ;;  %v3057_v15 = vld [vmem:[#allocation6 + $0x70] sm:$0xff]  ;;  %v3177_v21 = vld [vmem:[#allocation8 + $0xd8] sm:$0xff] }
 0x7bf   :  { %4929 = vmatpush3.msra.mxu1 %v8403_v40  ;;  %4930 = vmatprep.mubr.msk.f32.mxu1 %vm5679_vm0, %v9042_v63  ;;  %v3071_v40 = vld [vmem:[#allocation6 + $0xe0] sm:$0xff]  ;;  %v3161_v20 = vld [vmem:[#allocation8 + $0x58] sm:$0xff]  ;;  %v3176_v16 = vld [vmem:[#allocation8 + $0xd0] sm:$0xff] }
 0x7c0   :  { %2912 = vmatmul.mubr.f32.vlgmr.msra.gmra.mxu0 %v8562_v48  ;;  %4931 = vmatmul.mubr.f32.vlgmr.msra.gmra.mxu1 %v8562_v48  ;;  %v3459_v28 = vld [vmem:[#allocation12 + $0xd8] sm:$0xff] }
 0x7c1   :  { %4196 = vmatprep.subr.mxu0 %v3074_v52  ;;  %3139 = vmatprep.mubr.f32.mxu0 %v8572_v43  ;;  %v3443_v1 = vld [vmem:[#allocation12 + $0x58] sm:$0xff]  ;;  %v3458_v52 = vld [vmem:[#allocation12 + $0xd0] sm:$0xff] }
 0x7c2   :  { %4197 = vmatpush3.msra.mxu0 %v3058_v7  ;;  %4234 = vmatprep.subr.mxu1 %v3181_v59  ;;  %v3160_v7 = vld [vmem:[#allocation8 + $0x50] sm:$0xff] }
 0x7c3   :  { %4198 = vmatprep.subr.mxu0 %v3073_v61  ;;  %4235 = vmatpush3.msra.mxu1 %v3165_v12  ;;  %v3442_v61 = vld [vmem:[#allocation12 + $0x50] sm:$0xff] }
 0x7c4   :  { %4199 = vmatpush3.msra.mxu0 %v3057_v15  ;;  %4236 = vmatprep.subr.mxu1 %v3180_v13  ;;  %v3175_v15 = vld [vmem:[#allocation8 + $0xc8] sm:$0xff]  ;;  %v3450_v59 = vld [vmem:[#allocation12 + $0x90] sm:$0xff] }
 0x7c5   :  { %4200 = vmatprep.subr.mxu0 %v3072_v46  ;;  %4237 = vmatpush3.msra.mxu1 %v3164_v25  ;;  %v3457_v46 = vld [vmem:[#allocation12 + $0xc8] sm:$0xff] }
 0x7c6   :  { %4201 = vmatpush3.msra.mxu0 %v3056_v0  ;;  %4238 = vmatprep.subr.mxu1 %v3179_v18  ;;  %v3159_v0 = vld [vmem:[#allocation8 + $0x48] sm:$0xff]  ;;  %v3152_v12 = vld [vmem:[#allocation8 + $0x10] sm:$0xff] }
 0x7c7   :  { %4202 = vmatprep.subr.mxu0 %v3071_v40  ;;  %4239 = vmatpush3.msra.mxu1 %v3163_v17  ;;  %v3441_v40 = vld [vmem:[#allocation12 + $0x48] sm:$0xff]  ;;  %v3448_v17 = vld [vmem:[#allocation12 + $0x80] sm:$0xff] }
 0x7c8   :  { %4203 = vmatpush3.msra.mxu0 %v3055_v62  ;;  %4240 = vmatprep.subr.mxu1 %v3178_v30  ;;  %v3174_v62 = vld [vmem:[#allocation8 + $0xc0] sm:$0xff]  ;;  %v3167_v13 = vld [vmem:[#allocation8 + $0x88] sm:$0xff] }
 0x7c9   :  { %4204 = vmatprep.subr.mxu0 %v3070_v51  ;;  %4241 = vmatpush3.msra.mxu1 %v3162_v47  ;;  %v3456_v51 = vld [vmem:[#allocation12 + $0xc0] sm:$0xff]  ;;  %v3449_v25 = vld [vmem:[#allocation12 + $0x88] sm:$0xff] }
 0x7ca   :  { %4205 = vmatpush3.msra.mxu0 %v3054_v19  ;;  %4242 = vmatprep.subr.mxu1 %v3177_v21  ;;  %v3158_v19 = vld [vmem:[#allocation8 + $0x40] sm:$0xff]  ;;  %v3433_v18 = vld [vmem:[#allocation12 + $0x8] sm:$0xff] }
 0x7cb   :  { %4206 = vmatprep.subr.mxu0 %v3069_v3  ;;  %4243 = vmatpush3.msra.mxu1 %v3161_v20  ;;  %v3440_v3 = vld [vmem:[#allocation12 + $0x40] sm:$0xff] }
 0x7cc   :  { %4207 = vmatpush3.msra.mxu0 %v3053_v49  ;;  %4244 = vmatprep.subr.mxu1 %v3176_v16  ;;  %v3173_v49 = vld [vmem:[#allocation8 + $0xb8] sm:$0xff]  ;;  %v3432_v30 = vld [vmem:[#allocation12] sm:$0xff] }
 0x7cd   :  { %4208 = vmatprep.subr.mxu0 %v3068_v36  ;;  %4245 = vmatpush3.msra.mxu1 %v3160_v7  ;;  %v3455_v36 = vld [vmem:[#allocation12 + $0xb8] sm:$0xff] }
 0x7ce   :  { %4209 = vmatpush3.msra.mxu0 %v3052_v39  ;;  %4246 = vmatprep.subr.mxu1 %v3175_v15  ;;  %v3157_v39 = vld [vmem:[#allocation8 + $0x38] sm:$0xff] }
 0x7cf   :  { %4210 = vmatprep.subr.mxu0 %v3067_v53  ;;  %4247 = vmatpush3.msra.mxu1 %v3159_v0  ;;  %v3439_v53 = vld [vmem:[#allocation12 + $0x38] sm:$0xff] }
 0x7d0   :  { %4211 = vmatpush3.msra.mxu0 %v3051_v22  ;;  %4248 = vmatprep.subr.mxu1 %v3174_v62  ;;  %v3172_v22 = vld [vmem:[#allocation8 + $0xb0] sm:$0xff] }
 0x7d1   :  { %4212 = vmatprep.subr.mxu0 %v3066_v34  ;;  %4249 = vmatpush3.msra.mxu1 %v3158_v19  ;;  %v3454_v34 = vld [vmem:[#allocation12 + $0xb0] sm:$0xff] }
 0x7d2   :  { %4213 = vmatpush3.msra.mxu0 %v3050_v33  ;;  %4250 = vmatprep.subr.mxu1 %v3173_v49  ;;  %v3156_v33 = vld [vmem:[#allocation8 + $0x30] sm:$0xff]  ;;  %v627_v49 = vld [vmem:[%s9071_s13 + $0x8] sm:$0xf] }
 0x7d3   :  { %4214 = vmatprep.subr.mxu0 %v3065_v45  ;;  %v3438_v45 = vld [vmem:[#allocation12 + $0x30] sm:$0xff]  ;;  %4251 = vmatpush3.msra.mxu1 %v3157_v39 }
 0x7d4   :  { %4215 = vmatpush3.msra.mxu0 %v3049_v14  ;;  %v3171_v14 = vld [vmem:[#allocation8 + $0xa8] sm:$0xff]  ;;  %4252 = vmatprep.subr.mxu1 %v3172_v22 }
 0x7d5   :  { %4216 = vmatprep.subr.mxu0 %v3064_v38  ;;  %v3453_v38 = vld [vmem:[#allocation12 + $0xa8] sm:$0xff]  ;;  %4253 = vmatpush3.msra.mxu1 %v3156_v33 }
 0x7d6   :  { %4217 = vmatpush3.msra.mxu0 %v3048_v6  ;;  %v3155_v6 = vld [vmem:[#allocation8 + $0x28] sm:$0xff]  ;;  %4254 = vmatprep.subr.mxu1 %v3171_v14 }
 0x7d7   :  { %4218 = vmatprep.subr.mxu0 %v3063_v10  ;;  %v3437_v10 = vld [vmem:[#allocation12 + $0x28] sm:$0xff]  ;;  %4255 = vmatpush3.msra.mxu1 %v3155_v6 }
 0x7d8   :  { %4219 = vmatpush3.msra.mxu0 %v3047_v56  ;;  %v3170_v56 = vld [vmem:[#allocation8 + $0xa0] sm:$0xff] }
 0x7d9   :  { %4220 = vmatprep.subr.mxu0 %v3062_v58  ;;  %v3452_v58 = vld [vmem:[#allocation12 + $0xa0] sm:$0xff]  ;;  %4256 = vmatprep.subr.mxu1 %v3170_v56 }
 0x7da   :  { %4221 = vmatpush3.msra.mxu0 %v3046_v44  ;;  %v3154_v44 = vld [vmem:[#allocation8 + $0x20] sm:$0xff] }
 0x7db   :  { %4222 = vmatprep.subr.mxu0 %v3061_v50  ;;  %v3436_v50 = vld [vmem:[#allocation12 + $0x20] sm:$0xff]  ;;  %4257 = vmatpush3.msra.mxu1 %v3154_v44 }
 0x7dc   :  { %4223 = vmatpush3.msra.mxu0 %v3045_v57  ;;  %v3169_v57 = vld [vmem:[#allocation8 + $0x98] sm:$0xff] }
 0x7dd   :  { %4224 = vmatprep.subr.mxu0 %v3060_v60  ;;  %v3451_v60 = vld [vmem:[#allocation12 + $0x98] sm:$0xff]  ;;  %4258 = vmatprep.subr.mxu1 %v3169_v57  ;;  %v3031_v57 = vrot.slane %v627_v49, 2 }
 0x7de   :  { %4225 = vmatpush3.msra.mxu0 %v3044_v29  ;;  %v3153_v29 = vld [vmem:[#allocation8 + $0x18] sm:$0xff] }
 0x7df   :  { %4226 = vmatprep.subr.mxu0 %v3059_v32  ;;  %v3435_v32 = vld [vmem:[#allocation12 + $0x18] sm:$0xff]  ;;  %4259 = vmatpush3.msra.mxu1 %v3153_v29 }
 0x7e0   :  { %4227 = vmatpush3.msra.mxu0 %v3043_v31  ;;  %v3168_v31 = vld [vmem:[#allocation8 + $0x90] sm:$0xff] }
 0x7e1   :  { %4269 = vmatprep.subr.mxu0 %v3463_v4  ;;  %3140 = vmatmul.mubr.f32.vlgmr.msra.gmra.mxu0 %v8578_v54  ;;  %v8584_v4 = vld [vmem:[%s9393_s0 + $0x18] sm:$0xff] }
 0x7e2   :  { %4270 = vmatpush3.msra.mxu0 %v3447_v37  ;;  %v3434_v37 = vld [vmem:[#allocation12 + $0x10] sm:$0xff]  ;;  %4260 = vmatprep.subr.mxu1 %v3168_v31 }
 0x7e3   :  { %4271 = vmatprep.subr.mxu0 %v3462_v27  ;;  %v8589_v27 = vld [vmem:[%s9393_s0 + $0x10] sm:$0xff]  ;;  %3144 = vmatprep.mubr.f32.mxu0 %v8584_v4 }
 0x7e4   :  { %4272 = vmatpush3.msra.mxu0 %v3446_v42  ;;  %4261 = vmatpush3.msra.mxu1 %v3152_v12  ;;  %v3151_v42 = vld [vmem:[#allocation8 + $0x8] sm:$0xff] }
 0x7e5   :  { %4273 = vmatprep.subr.mxu0 %v3461_v23  ;;  %4262 = vmatprep.subr.mxu1 %v3167_v13  ;;  %v3166_v23 = vld [vmem:[#allocation8 + $0x80] sm:$0xff] }
 0x7e6   :  { %4274 = vmatpush3.msra.mxu0 %v3445_v11  ;;  %v3150_v11 = vld [vmem:[#allocation8] sm:$0xff]  ;;  %4263 = vmatpush3.msra.mxu1 %v3151_v42 }
 0x7e7   :  { %4275 = vmatprep.subr.mxu0 %v3460_v2  ;;  %3145 = vmatmul.mubr.f32.gmra.mxu0 %v8589_v27 }
 0x7e8   :  { %4276 = vmatpush3.msra.mxu0 %v3444_v9  ;;  %4264 = vmatprep.subr.mxu1 %v3166_v23 }
 0x7e9   :  { %4277 = vmatprep.subr.mxu0 %v3459_v28  ;;  %4265 = vmatpush3.msra.mxu1 %v3150_v11  ;;  %v5386_v28 = vld [vmem:[%s9071_s13 + $0x54] sm:$0xff]  ;;  %v3919_v11 = vld [vmem:[#allocation2] ss:$0 sm:$0xff] }
 0x7ea   :  { %4278 = vmatpush3.msra.mxu0 %v3443_v1 }
 0x7eb   :  { %4279 = vmatprep.subr.mxu0 %v3458_v52  ;;  %v5387_v52 = vld [vmem:[%s9071_s13] sm:$0xff] }
 0x7ec   :  { %4280 = vmatpush3.msra.mxu0 %v3442_v61  ;;  %v3013_v7 = vrot.slane %v5387_v52, 6 }
 0x7ed   :  { %4281 = vmatprep.subr.mxu0 %v3457_v46 }
 0x7ee   :  { %4282 = vmatpush3.msra.mxu0 %v3441_v40 }
 0x7ef   :  { %4283 = vmatprep.subr.mxu0 %v3456_v51  ;;  %v2995_v51 = vrot.slane %v5386_v28, 2 }
 0x7f0   :  { %4284 = vmatpush3.msra.mxu0 %v3440_v3 }
 0x7f1   :  { %4285 = vmatprep.subr.mxu0 %v3455_v36 }
 0x7f2   :  { %4286 = vmatpush3.msra.mxu0 %v3439_v53 }
 0x7f3   :  { %4287 = vmatprep.subr.mxu0 %v3454_v34 }
 0x7f4   :  { %4288 = vmatpush3.msra.mxu0 %v3438_v45 }
 0x7f5   :  { %4289 = vmatprep.subr.mxu0 %v3453_v38 }
 0x7f6   :  { %4290 = vmatpush3.msra.mxu0 %v3437_v10  ;;  %v3005_v10 = vrot.slane %v5386_v28, 4 }
 0x7f7   :  { %4291 = vmatprep.subr.mxu0 %v3452_v58 }
 0x7f8   :  { %4292 = vmatpush3.msra.mxu0 %v3436_v50 }
 0x7f9   :  { %4293 = vmatprep.subr.mxu0 %v3451_v60 }
 0x7fa   :  { %4294 = vmatpush3.msra.mxu0 %v3435_v32 }
 0x7fb   :  { %4295 = vmatprep.subr.mxu0 %v3450_v59 }
 0x7fc   :  { %4296 = vmatpush3.msra.mxu0 %v3434_v37 }
 0x7fd   :  { %4297 = vmatprep.subr.mxu0 %v3449_v25 }
 0x7fe   :  { %4298 = vmatpush3.msra.mxu0 %v3433_v18 }
 0x7ff   :  { %4299 = vmatprep.subr.mxu0 %v3448_v17 }
 0x800   :  { %4300 = vmatpush3.msra.mxu0 %v3432_v30  ;;  %v5680_v30 = vmov 0  }
 0x801   :  { %4933 = vmatprep.subr.mxu0 %v9042_v63  ;;  %5022 = vset.pattern.permute.xlu1 %v5680_v30 }
 0x802   :  { %5023 = vset.pattern.permute.xlu0 %v5680_v30  ;;  %3318 = vperm.xlu1 %5022, %v3919_v11  }
 0x85f   :  { %v2843_v2 = vpop.f32.mrf.mxu1  ;;  %v2772_v9 = vpop.f32.mrf.mxu0 }
 0x860   :  { %v2773_v21 = vadd.f32 %v2772_v9, %v9359_v55 }
 0x861   :  { %v4897_v47 = vpop.f32.mrf.mxu1  ;;  %v2774_v16 = vpop.f32.mrf.mxu0 }
 0x862   :  { %v2988_v20 = vadd.f32 %v5386_v28, %v2773_v21  ;;  %v2775_v62 = vadd.f32 %v2774_v16, %v9360_v26  ;;  %v9394_v28 = vld [vmem:[#allocation93_spill] sm:$0xff] }
 0x864   :  { %v3913_v1 = vmul.f32 -1.442695, %v2988_v20  ;;  %v2997_v39 = vadd.f32 %v2995_v51, %v2775_v62  ;;  %v9395_v62 = vld [vmem:[#allocation94_spill] sm:$0xff] }
 0x866   :  { %5164 = vpow2.f32 %v3913_v1  ;;  %v3914_v34 = vmul.f32 -1.442695, %v2997_v39 }
 0x873   :  { %v5165_v36 = vpop.eup %5164 }
 0x874   :  { %v2992_v22 = vadd.f32 1.0, %v5165_v36 }
 0x880   :  { %v2913_v61 = vpop.f32.mrf.mxu0  ;;  %v2984_v15 = vpop.f32.mrf.mxu1 }
 0x881   :  { %v2914_v46 = vadd.f32 %v2913_v61, %v9285_v35  ;;  %v2985_v50 = vadd.f32 %v2984_v15, %v6573_v24 }
 0x882   :  { %v2915_v0 = vpop.f32.mrf.mxu0  ;;  %v4932_v40 = vpop.f32.mrf.mxu1 }
 0x883   :  { %v3015_v55 = vadd.f32 %v3013_v7, %v2914_v46  ;;  %v2916_v3 = vadd.f32 %v2915_v0, %v6559_v41  ;;  %v2844_v41 = vadd.f32 %v2843_v2, %v9286_v8  ;;  %v5681_v2 = vmov 1966171168  }
 0x884   :  { %v3254_v47 = vunpack.c.l.s4 %v5681_v2  ;;  %v3573_v2 = vld [vmem:[#allocation15 + $0xf8] sm:$0xff] }
 0x885   :  { %v3915_v19 = vmul.f32 -1.442695, %v3015_v55  ;;  %v3022_v53 = vadd.f32 %v2916_v3, %v627_v49  ;;  %4304 = vmatprep.subr.mxu1 %v3573_v2 }
 0x887   :  { %5166 = vpow2.f32 %v3915_v19  ;;  %v3916_v35 = vmul.f32 -1.442695, %v3022_v53  ;;  %v3917_v19 = vld [vmem:[#allocation9] ss:$0 sm:$0xff]  ;;  %v3918_v53 = vld [vmem:[#allocation11] ss:$0 sm:$0xff] }
 0x888   :  { %5168 = vrcp.f32 %v2992_v22 }
 0x889   :  { %5170 = vpow2.f32 %v3914_v34 }
 0x88a   :  { %5172 = vpow2.f32 %v3916_v35 }
 0x894   :  { %v5167_v33 = vpop.eup %5166 }
 0x895   :  { %v3019_v26 = vadd.f32 1.0, %v5167_v33  ;;  %v5169_v45 = vpop.eup %5168 }
 0x896   :  { %v5171_v14 = vpop.eup %5170  ;;  %v3004_v6 = vmul.f32 %v5169_v45, %v2844_v41  ;;  %v9396_v45 = vlaneseq }
 0x897   :  { %5174 = vrcp.f32 %v3019_v26  ;;  %v5173_v38 = vpop.eup %5172  ;;  %v3001_v56 = vadd.f32 1.0, %v5171_v14  ;;  %v3319_v14 = vpop.permute.xlu1 %3318 }
 0x898   :  { %v3026_v58 = vadd.f32 1.0, %v5173_v38  ;;  %v3007_v44 = vadd.f32 %v3005_v10, %v3004_v6  ;;  %v3326_v41 = vand.u32 127, %v9396_v45  ;;  %v3545_v45 = vld [vmem:[#allocation15 + $0x18] sm:$0xff] }
 0x899   :  { %5176 = vrcp.f32 %v3001_v56 }
 0x89a   :  { %5178 = vrcp.f32 %v3026_v58  ;;  %v3329_v6 = vsub.s32 %v3326_v41, %v9394_v28  ;;  %v3560_v41 = vld [vmem:[#allocation15 + $0x90] sm:$0xff] }
 0x89b   :  { %5180 = vtanh.f32 %v3007_v44 }
 0x8a1   :  { %v4228_v9 = vpop.f32.mrf.mxu0 }
 0x8a3   :  { %v4229_v21 = vpop.f32.mrf.mxu0 }
 0x8a4   :  { %v5175_v60 = vpop.eup %5174  ;;  %v4230_v0 = vadd.f32 %v4229_v21, %v4228_v9  ;;  %v3572_v9 = vld [vmem:[#allocation15 + $0xf0] sm:$0xff]  ;;  %v3571_v21 = vld [vmem:[#allocation15 + $0xe8] sm:$0xff] }
 0x8a5   :  { %v3029_v29 = vmul.f32 %v5175_v60, %v2985_v50 }
 0x8a6   :  { %v5177_v31 = vpop.eup %5176 }
 0x8a7   :  { %v3033_v32 = vadd.f32 %v3031_v57, %v3029_v29  ;;  %v5179_v59 = vpop.eup %5178  ;;  %v3009_v12 = vsub.f32 1.0, %v5177_v31  ;;  %v3011_v24 = vmul.f32 %v5177_v31, %v8494_v5  ;;  %v4231_v52 = vpop.f32.mrf.mxu0  ;;  %v9397_v31 = vld [vmem:[#allocation96_spill] sm:$0xff] }
 0x8a8   :  { %v5181_v8 = vpop.eup %5180  ;;  %v3035_v37 = vsub.f32 1.0, %v5179_v59  ;;  %v3037_v18 = vmul.f32 %v5179_v59, %v8562_v48  ;;  %v3255_v48 = vunpack.c.0.s8 %v3254_v47  ;;  %v3557_v47 = vld [vmem:[#allocation15 + $0x78] sm:$0xff] }
 0x8a9   :  { %5182 = vtanh.f32 %v3033_v32  ;;  %v3010_v25 = vmul.f32 %v5181_v8, %v3009_v12  ;;  %v4232_v46 = vpop.f32.mrf.mxu0 }
 0x8aa   :  { %v3258_v20 = vsub.s32 %v3255_v48, %v9394_v28  ;;  %v4233_v40 = vadd.f32 %v4232_v46, %v4231_v52  ;;  %v3556_v48 = vld [vmem:[#allocation15 + $0x70] sm:$0xff]  ;;  %v3570_v28 = vld [vmem:[#allocation15 + $0xe0] sm:$0xff]  ;;  %v3567_v46 = vld [vmem:[#allocation15 + $0xc8] sm:$0xff] }
 0x8ab   :  { %v3012_v17 = vadd.f32 %v3011_v24, %v3010_v25  ;;  %v3568_v52 = vld [vmem:[#allocation15 + $0xd0] sm:$0xff] }
 0x8b6   :  { %v5183_v13 = vpop.eup %5182 }
 0x8b7   :  { %v3036_v42 = vmul.f32 %v5183_v13, %v3035_v37 }
 0x8b9   :  { %v3038_v23 = vadd.f32 %v3037_v18, %v3036_v42 }
 0x8bb   :  { %3246 = vmatprep.mubr.f32.mxu1 %v3038_v23  ;;  %3535 = vmatprep.mubr.f32.mxu0 %v3038_v23 }
 0x8bc   :  { %3247 = vmatmul.mubr.f32.vlgmr.msra.gmra.mxu1 %v3012_v17  ;;  %3536 = vmatmul.mubr.f32.vlgmr.msra.gmra.mxu0 %v3012_v17 }
 0x8bd   :  { %4965 = vmatprep.mubr.msk.f32.mxu0 %vm5679_vm0, %v9042_v63  ;;  %4305 = vmatpush3.msra.mxu1 %v3557_v47 }
 0x8be   :  { %4306 = vmatprep.subr.mxu1 %v3572_v9 }
 0x8bf   :  { %4307 = vmatpush3.msra.mxu1 %v3556_v48 }
 0x8c0   :  { %4308 = vmatprep.subr.mxu1 %v3571_v21 }
 0x97c   :  { %v4266_v5 = vpop.f32.mrf.mxu1 }
 0x97e   :  { %v4267_v1 = vpop.f32.mrf.mxu1 }
 0x97f   :  { %v4268_v16 = vadd.f32 %v4267_v1, %v4266_v5  ;;  %v3555_v5 = vld [vmem:[#allocation15 + $0x68] sm:$0xff]  ;;  %v3569_v1 = vld [vmem:[#allocation15 + $0xd8] sm:$0xff] }
 0x980   :  { %4309 = vmatpush3.msra.mxu1 %v3555_v5 }
 0x981   :  { %v3259_v7 = vrot.slane %v4268_v16, %v3258_v20  ;;  %4310 = vmatprep.subr.mxu1 %v3570_v28  ;;  %v3553_v16 = vld [vmem:[#allocation15 + $0x58] sm:$0xff] }
 0x983   :  { %v3260_v61 = vcombine.high %v3259_v7, %v3259_v7  ;;  %v3267_v15 = vrot.slane %v3259_v7, %v3258_v20  ;;  %v3552_v7 = vld [vmem:[#allocation15 + $0x50] sm:$0xff] }
 0x985   :  { %v3274_v55 = vrot.slane %v3260_v61, %v3258_v20  ;;  %v3278_v51 = vrot.slane %v3267_v15, %v9395_v62  ;;  %v3554_v20 = vld [vmem:[#allocation15 + $0x60] sm:$0xff] }
 0x986   :  { %4311 = vmatpush3.msra.mxu1 %v3554_v20 }
 0x987   :  { %v3285_v3 = vadd.f32 %v4230_v0, %v3278_v51  ;;  %v3282_v49 = vrot.slane %v3274_v55, %v9395_v62  ;;  %4312 = vmatprep.subr.mxu1 %v3569_v1  ;;  %v3566_v55 = vld [vmem:[#allocation15 + $0xc0] sm:$0xff] }
 0x988   :  { %4313 = vmatpush3.msra.mxu1 %v3553_v16 }
 0x989   :  { %v3294_v36 = vadd.f32 %v3917_v19, %v3285_v3  ;;  %v3286_v39 = vadd.f32 %v4233_v40, %v3282_v49  ;;  %4314 = vmatprep.subr.mxu1 %v3568_v52  ;;  %v3551_v40 = vld [vmem:[#allocation15 + $0x48] sm:$0xff]  ;;  %v3550_v3 = vld [vmem:[#allocation15 + $0x40] sm:$0xff]  ;;  %v3565_v49 = vld [vmem:[#allocation15 + $0xb8] sm:$0xff] }
 0x98a   :  { %4315 = vmatpush3.msra.mxu1 %v3552_v7 }
 0x98b   :  { %v3296_v22 = vmax.f32 %v3294_v36, 0.0  ;;  %v3295_v34 = vadd.f32 %v3917_v19, %v3286_v39  ;;  %4316 = vmatprep.subr.mxu1 %v3567_v46  ;;  %v3549_v36 = vld [vmem:[#allocation15 + $0x38] sm:$0xff]  ;;  %v3564_v39 = vld [vmem:[#allocation15 + $0xb0] sm:$0xff] }
 0x98c   :  { %4317 = vmatpush3.msra.mxu1 %v3551_v40 }
 0x98d   :  { %v3305_v35 = vmul.f32 %v3918_v53, %v3296_v22  ;;  %v3297_v33 = vmax.f32 %v3295_v34, 0.0  ;;  %4318 = vmatprep.subr.mxu1 %v3566_v55  ;;  %v3548_v22 = vld [vmem:[#allocation15 + $0x30] sm:$0xff]  ;;  %v3547_v34 = vld [vmem:[#allocation15 + $0x28] sm:$0xff] }
 0x98e   :  { %4319 = vmatpush3.msra.mxu1 %v3550_v3  ;;  %v3666_v55 = vld [vmem:[#allocation18 + $0x28] sm:$0xff]  ;;  %v3663_v3 = vld [vmem:[#allocation18 + $0x10] sm:$0xff] }
 0x98f   :  { %3307 = vadd.xlane.f32.xlu0 %v3305_v35  ;;  %v3306_v26 = vmul.f32 %v3918_v53, %v3297_v33  ;;  %4320 = vmatprep.subr.mxu1 %v3565_v49  ;;  %v3562_v35 = vld [vmem:[#allocation15 + $0xa0] sm:$0xff]  ;;  %v3662_v49 = vld [vmem:[#allocation18 + $0x8] sm:$0xff] }
 0x990   :  { %4321 = vmatpush3.msra.mxu1 %v3549_v36  ;;  %v3546_v33 = vld [vmem:[#allocation15 + $0x20] sm:$0xff] }
 0x991   :  { %4322 = vmatprep.subr.mxu1 %v3564_v39  ;;  %v3661_v36 = vld [vmem:[#allocation18] sm:$0xff]  ;;  %v3770_v39 = vld [vmem:[%s8733_s17 + $0x78] sm:$0xff] }
 0x992   :  { %4323 = vmatpush3.msra.mxu1 %v3548_v22  ;;  %v3768_v22 = vld [vmem:[%s8733_s17 + $0x68] sm:$0xff] }
 0x993   :  { %3309 = vadd.xlane.f32.xlu0 %v3306_v26  ;;  %v3561_v26 = vld [vmem:[#allocation15 + $0x98] sm:$0xff] }
 0xa18   :  { %v3308_v38 = vpop.xlane.xlu0 %3307 }
 0xa19   :  { %v3321_v10 = vadd.f32 %v3319_v14, %v3308_v38  ;;  %v3559_v38 = vld [vmem:[#allocation15 + $0x88] sm:$0xff] }
 0xa1b   :  { %v3330_v44 = vrot.slane %v3321_v10, %v3329_v6 }
 0xa1c   :  { %v3310_v56 = vpop.xlane.xlu0 %3309 }
 0xa1d   :  { %v3322_v58 = vadd.f32 %v3319_v14, %v3310_v56  ;;  %v3544_v14 = vld [vmem:[#allocation15 + $0x10] sm:$0xff]  ;;  %v3542_v56 = vld [vmem:[#allocation15] sm:$0xff] }
 0xa1f   :  { %v3334_v50 = vrot.slane %v3322_v58, %v3329_v6 }
 0xa21   :  { %v3336_v57 = vsel %vm3335_vm1, %v3334_v50, %v3330_v44  ;;  %v3675_v44 = vld [vmem:[#allocation18 + $0x70] sm:$0xff]  ;;  %v3674_v50 = vld [vmem:[#allocation18 + $0x68] sm:$0xff] }
 0xa22   :  { %v3339_v60 = vsel %vm3338_vm2, %v3336_v57, -inf  ;;  %v3673_v57 = vld [vmem:[#allocation18 + $0x60] sm:$0xff] }
 0xa23   :  { %3340 = vmax.xlane.f32.xlu1 %v3339_v60  ;;  %v3672_v60 = vld [vmem:[#allocation18 + $0x58] sm:$0xff] }
 0xaac   :  { %v3341_v29 = vpop.xlane.xlu1 %3340 }
 0xaad   :  { %v3346_v32 = vrot.slane %v3341_v29, %v9395_v62  ;;  %v3350_v59 = vrot.slane %v3341_v29, %v9397_v31  ;;  %v3671_v29 = vld [vmem:[#allocation18 + $0x50] sm:$0xff] }
 0xaaf   :  { %v3353_v8 = vsub.f32 %v3321_v10, %v3346_v32  ;;  %v3354_v12 = vsub.f32 %v3322_v58, %v3350_v59  ;;  %v3558_v10 = vld [vmem:[#allocation15 + $0x80] sm:$0xff]  ;;  %v3670_v32 = vld [vmem:[#allocation18 + $0x48] sm:$0xff] }
 0xab0   :  { %v3676_v58 = vld [vmem:[#allocation18 + $0x78] sm:$0xff] }
 0xab1   :  { %v3355_v37 = vmul.f32 1.442695, %v3353_v8  ;;  %v3357_v13 = vmul.f32 1.442695, %v3354_v12  ;;  %4934 = vmatpush3.msra.mxu0 %v3676_v58  ;;  %v3668_v59 = vld [vmem:[#allocation18 + $0x38] sm:$0xff]  ;;  %v3667_v8 = vld [vmem:[#allocation18 + $0x30] sm:$0xff] }
 0xab2   :  { %4935 = vmatprep.subr.mxu0 %v9042_v63 }
 0xab3   :  { %5184 = vpow2.f32 %v3355_v37  ;;  %4936 = vmatpush3.msra.mxu0 %v3675_v44  ;;  %v3920_v44 = vld [vmem:[#allocation14] ss:$0 sm:$0xff] }
 0xab4   :  { %5186 = vpow2.f32 %v3357_v13  ;;  %4937 = vmatprep.subr.mxu0 %v9042_v63 }
 0xab5   :  { %4938 = vmatpush3.msra.mxu0 %v3674_v50 }
 0xab6   :  { %4939 = vmatprep.subr.mxu0 %v9042_v63 }
 0xab7   :  { %4940 = vmatpush3.msra.mxu0 %v3673_v57  ;;  %v3921_v57 = vld [vmem:[#allocation17] ss:$0 sm:$0xff] }
 0xab8   :  { %4941 = vmatprep.subr.mxu0 %v9042_v63 }
 0xab9   :  { %4942 = vmatpush3.msra.mxu0 %v3672_v60 }
 0xaba   :  { %4943 = vmatprep.subr.mxu0 %v9042_v63 }
 0xabb   :  { %4944 = vmatpush3.msra.mxu0 %v3671_v29 }
 0xabc   :  { %4945 = vmatprep.subr.mxu0 %v9042_v63 }
 0xabd   :  { %4946 = vmatpush3.msra.mxu0 %v3670_v32 }
 0xabe   :  { %4947 = vmatprep.subr.mxu0 %v9042_v63 }
 0xac0   :  { %v5185_v25 = vpop.eup %5184 }
 0xac1   :  { %v5187_v42 = vpop.eup %5186  ;;  %3362 = vperm.xlu0 %5023, %v5185_v25  }
 0xac2   :  { %3365 = vperm.xlu1 %5022, %v5187_v42  }
 0xb3c   :  { %v3363_v18 = vpop.permute.xlu0 %3362 }
 0xb3d   :  { %v3366_v24 = vpop.permute.xlu1 %3365  ;;  %v3370_v23 = vrot.slane %v3363_v18, %v3329_v6 }
 0xb3e   :  { %v3374_v17 = vrot.slane %v3366_v24, %v3329_v6  ;;  %v3543_v6 = vld [vmem:[#allocation15 + $0x8] sm:$0xff] }
 0xb40   :  { %v3375_v11 = vsel %vm3335_vm1, %v3374_v17, %v3370_v23 }
 0xb41   :  { %v3377_v30 = vsel %vm3338_vm2, %v3375_v11, 0.0 }
 0xb42   :  { %3378 = vadd.xlane.f32.xlu0 %v3377_v30 }
 0xbcb   :  { %v3379_v61 = vpop.xlane.xlu0 %3378 }
 0xbcc   :  { %5188 = vrcp.f32 %v3379_v61 }
 0xbd9   :  { %v5189_v15 = vpop.eup %5188 }
 0xbda   :  { %v3385_v0 = vrot.slane %v5189_v15, %v9395_v62  ;;  %v3389_v19 = vrot.slane %v5189_v15, %v9397_v31  ;;  %v3563_v62 = vld [vmem:[#allocation15 + $0xa8] sm:$0xff] }
 0xbdb   :  { %4324 = vmatprep.subr.mxu1 %v3563_v62  ;;  %v3669_v31 = vld [vmem:[#allocation18 + $0x40] sm:$0xff]  ;;  %v3767_v62 = vld [vmem:[%s8733_s17 + $0x60] sm:$0xff] }
 0xbdc   :  { %v3392_v51 = vmul.f32 %v5185_v25, %v3385_v0  ;;  %v3393_v53 = vmul.f32 %v5187_v42, %v3389_v19  ;;  %4325 = vmatpush3.msra.mxu1 %v3547_v34  ;;  %4948 = vmatpush3.msra.mxu0 %v3669_v31  ;;  %v3664_v19 = vld [vmem:[#allocation18 + $0x18] sm:$0xff]  ;;  %v3766_v34 = vld [vmem:[%s8733_s17 + $0x58] sm:$0xff] }
 0xbdd   :  { %4326 = vmatprep.subr.mxu1 %v3562_v35  ;;  %4949 = vmatprep.subr.mxu0 %v9042_v63  ;;  %v3765_v35 = vld [vmem:[%s8733_s17 + $0x50] sm:$0xff] }
 0xbde   :  { %3396 = vperm.xlu1 %5022, %v3392_v51   ;;  %4327 = vmatpush3.msra.mxu1 %v3546_v33  ;;  %v3665_v51 = vld [vmem:[#allocation18 + $0x20] sm:$0xff] }
 0xbdf   :  { %4328 = vmatprep.subr.mxu1 %v3561_v26  ;;  %4950 = vmatpush3.msra.mxu0 %v3668_v59  ;;  %v3764_v33 = vld [vmem:[%s8733_s17 + $0x48] sm:$0xff]  ;;  %v3763_v26 = vld [vmem:[%s8733_s17 + $0x40] sm:$0xff] }
 0xbe0   :  { %4329 = vmatpush3.msra.mxu1 %v3545_v45  ;;  %4951 = vmatprep.subr.mxu0 %v9042_v63  ;;  %v3762_v45 = vld [vmem:[%s8733_s17 + $0x38] sm:$0xff] }
 0xbe1   :  { %4330 = vmatprep.subr.mxu1 %v3560_v41  ;;  %4952 = vmatpush3.msra.mxu0 %v3667_v8  ;;  %v3761_v41 = vld [vmem:[%s8733_s17 + $0x30] sm:$0xff] }
 0xbe2   :  { %3401 = vperm.xlu1 %5022, %v3393_v53   ;;  %4331 = vmatpush3.msra.mxu1 %v3544_v14  ;;  %v3769_v53 = vld [vmem:[%s8733_s17 + $0x70] sm:$0xff]  ;;  %v3760_v14 = vld [vmem:[%s8733_s17 + $0x28] sm:$0xff] }
 0xbe3   :  { %4332 = vmatprep.subr.mxu1 %v3559_v38  ;;  %4953 = vmatprep.subr.mxu0 %v9042_v63  ;;  %v3759_v38 = vld [vmem:[%s8733_s17 + $0x20] sm:$0xff] }
 0xbe4   :  { %4333 = vmatpush3.msra.mxu1 %v3543_v6  ;;  %4954 = vmatpush3.msra.mxu0 %v3666_v55  ;;  %v3758_v6 = vld [vmem:[%s8733_s17 + $0x18] sm:$0xff] }
 0xbe5   :  { %4334 = vmatprep.subr.mxu1 %v3558_v10  ;;  %4955 = vmatprep.subr.mxu0 %v9042_v63  ;;  %v4301_v10 = vpop.f32.mrf.mxu0 }
 0xbe6   :  { %4335 = vmatpush3.msra.mxu1 %v3542_v56  ;;  %4956 = vmatpush3.msra.mxu0 %v3665_v51 }
 0xbe7   :  { %4968 = vmatprep.subr.mxu1 %v9042_v63  ;;  %4957 = vmatprep.subr.mxu0 %v9042_v63  ;;  %v4302_v56 = vpop.f32.mrf.mxu0 }
 0xbe8   :  { %4958 = vmatpush3.msra.mxu0 %v3664_v19  ;;  %v4303_v58 = vadd.f32 %v4302_v56, %v4301_v10 }
 0xbe9   :  { %4959 = vmatprep.subr.mxu0 %v9042_v63 }
 0xbea   :  { %4960 = vmatpush3.msra.mxu0 %v3663_v3  ;;  %v3538_v29 = vadd.f32 %v4303_v58, %v3920_v44 }
 0xbeb   :  { %4961 = vmatprep.subr.mxu0 %v9042_v63 }
 0xbec   :  { %4962 = vmatpush3.msra.mxu0 %v3662_v49  ;;  %v3541_v59 = vmax.f32 %v3538_v29, 0.0 }
 0xbed   :  { %4963 = vmatprep.subr.mxu0 %v9042_v63 }
 0xbee   :  { %4964 = vmatpush3.msra.mxu0 %v3661_v36 }
 0xc59   :  { %v3397_v12 = vpop.permute.xlu1 %3396 }
 0xc5a   :  { %v3404_v37 = vmul.f32 %v3397_v12, %v8578_v54  ;;  %v3405_v13 = vmul.f32 %v3397_v12, %v8572_v43 }
 0xc5c   :  { %v3408_v25 = vrot.slane %v3404_v37, 4  ;;  %v3414_v42 = vrot.slane %v3405_v13, 4 }
 0xc5d   :  { %v3402_v18 = vpop.permute.xlu1 %3401 }
 0xc5e   :  { %v3409_v24 = vadd.f32 %v3408_v25, %v3404_v37  ;;  %v3415_v23 = vadd.f32 %v3414_v42, %v3405_v13  ;;  %v3406_v17 = vmul.f32 %v3402_v18, %v8589_v27  ;;  %v3407_v11 = vmul.f32 %v3402_v18, %v8584_v4  ;;  %v3757_v37 = vld [vmem:[%s8733_s17 + $0x10] sm:$0xff]  ;;  %v3756_v13 = vld [vmem:[%s8733_s17 + $0x8] sm:$0xff]  ;;  %v3755_v25 = vld [vmem:[%s8733_s17] sm:$0xff] }
 0xc5f   :  { %v3922_v42 = vld [vmem:[#allocation20] ss:$0 sm:$0xff] }
 0xc60   :  { %v3410_v30 = vrot.slane %v3409_v24, 2  ;;  %v3416_v2 = vrot.slane %v3415_v23, 2  ;;  %v3420_v47 = vrot.slane %v3406_v17, 4  ;;  %v3426_v9 = vrot.slane %v3407_v11, 4 }
 0xc62   :  { %v3411_v48 = vadd.f32 %v3410_v30, %v3409_v24  ;;  %v3417_v21 = vadd.f32 %v3416_v2, %v3415_v23  ;;  %v3421_v5 = vadd.f32 %v3420_v47, %v3406_v17  ;;  %v3427_v28 = vadd.f32 %v3426_v9, %v3407_v11  ;;  %v3923_v11 = vld [vmem:[#allocation21] ss:$0 sm:$0xff] }
 0xc64   :  { %v3422_v54 = vrot.slane %v3421_v5, 2  ;;  %v3428_v20 = vrot.slane %v3427_v28, 2  ;;  %v3412_v43 = vrot.slane %v3411_v48, 1  ;;  %v3418_v1 = vrot.slane %v3417_v21, 1 }
 0xc66   :  { %v3423_v16 = vadd.f32 %v3422_v54, %v3421_v5  ;;  %v3429_v52 = vadd.f32 %v3428_v20, %v3427_v28  ;;  %v3413_v15 = vadd.f32 %v3412_v43, %v3411_v48  ;;  %v3419_v46 = vadd.f32 %v3418_v1, %v3417_v21 }
 0xc68   :  { %v3424_v7 = vrot.slane %v3423_v16, 1  ;;  %v3430_v61 = vrot.slane %v3429_v52, 1 }
 0xc6a   :  { %v3425_v27 = vadd.f32 %v3424_v7, %v3423_v16  ;;  %v3431_v4 = vadd.f32 %v3430_v61, %v3429_v52 }
 0xc6c   :  { %v3586_v0 = vsel %vm3335_vm1, %v3431_v4, %v3419_v46  ;;  %v3585_v40 = vsel %vm3335_vm1, %v3425_v27, %v3413_v15 }
 0xc6d   :  { %3653 = vmatprep.mubr.f32.mxu1 %v3586_v0 }
 0xc6e   :  { %3654 = vmatmul.mubr.f32.vlgmr.msra.gmra.mxu1 %v3585_v40 }
 0xc6f   :  { %5000 = vmatprep.mubr.msk.f32.mxu1 %vm5679_vm0, %v9042_v63  ;;  %4969 = vmatpush3.msra.mxu1 %v3770_v39 }
 0xc70   :  { %4970 = vmatprep.subr.mxu1 %v9042_v63 }
 0xc71   :  { %4971 = vmatpush3.msra.mxu1 %v3769_v53 }
 0xc72   :  { %4972 = vmatprep.subr.mxu1 %v9042_v63 }
 0xc73   :  { %4973 = vmatpush3.msra.mxu1 %v3768_v22 }
 0xc74   :  { %4974 = vmatprep.subr.mxu1 %v9042_v63 }
 0xc75   :  { %4975 = vmatpush3.msra.mxu1 %v3767_v62 }
 0xc76   :  { %4976 = vmatprep.subr.mxu1 %v9042_v63 }
 0xc77   :  { %4977 = vmatpush3.msra.mxu1 %v3766_v34 }
 0xc78   :  { %4978 = vmatprep.subr.mxu1 %v9042_v63 }
 0xc79   :  { %4979 = vmatpush3.msra.mxu1 %v3765_v35 }
 0xc7a   :  { %4980 = vmatprep.subr.mxu1 %v9042_v63 }
 0xc7b   :  { %4981 = vmatpush3.msra.mxu1 %v3764_v33 }
 0xc7c   :  { %4982 = vmatprep.subr.mxu1 %v9042_v63 }
 0xc7d   :  { %4983 = vmatpush3.msra.mxu1 %v3763_v26 }
 0xc7e   :  { %4984 = vmatprep.subr.mxu1 %v9042_v63 }
 0xc7f   :  { %4985 = vmatpush3.msra.mxu1 %v3762_v45 }
 0xc80   :  { %4986 = vmatprep.subr.mxu1 %v9042_v63 }
 0xc81   :  { %4987 = vmatpush3.msra.mxu1 %v3761_v41 }
 0xc82   :  { %4988 = vmatprep.subr.mxu1 %v9042_v63 }
 0xc83   :  { %4989 = vmatpush3.msra.mxu1 %v3760_v14 }
 0xc84   :  { %4990 = vmatprep.subr.mxu1 %v9042_v63 }
 0xc85   :  { %4991 = vmatpush3.msra.mxu1 %v3759_v38 }
 0xc86   :  { %4992 = vmatprep.subr.mxu1 %v9042_v63 }
 0xc87   :  { %4993 = vmatpush3.msra.mxu1 %v3758_v6 }
 0xc88   :  { %4994 = vmatprep.subr.mxu1 %v9042_v63 }
 0xc89   :  { %4995 = vmatpush3.msra.mxu1 %v3757_v37 }
 0xc8a   :  { %4996 = vmatprep.subr.mxu1 %v9042_v63 }
 0xc8b   :  { %4997 = vmatpush3.msra.mxu1 %v3756_v13 }
 0xc8c   :  { %4998 = vmatprep.subr.mxu1 %v9042_v63 }
 0xc8d   :  { %4999 = vmatpush3.msra.mxu1 %v3755_v25 }
 0xd2e   :  { %v4336_v50 = vpop.f32.mrf.mxu1 }
 0xd30   :  { %v4337_v60 = vpop.f32.mrf.mxu1 }
 0xd31   :  { %v4338_v32 = vadd.f32 %v4337_v60, %v4336_v50 }
 0xd33   :  { %v3656_v31 = vadd.f32 %v4338_v32, %v3921_v57 }
 0xd35   :  { %v3659_v8 = vmax.f32 %v3656_v31, 0.0 }
 0xd37   :  { %v3660_v12 = vmul.f32 %v3659_v8, %v3541_v59 }
 0xd39   :  { %4966 = vmatmul.mubr.f32.vlgmr.msra.gmra.mxu0 %v3660_v12 }
 0xdf9   :  { %v3750_v18 = vpop.f32.mrf.mxu0 }
 0xdfa   :  { %v3751_v24 = vadd.f32 %v3922_v42, %v3750_v18 }
 0xdfb   :  { %v4967_v23 = vpop.f32.mrf.mxu0 }
 0xdfc   :  { %v3754_v17 = vmax.f32 %v3751_v24, 0.0 }
 0xdfe   :  { %5001 = vmatmul.mubr.f32.vlgmr.msra.gmra.mxu1 %v3754_v17 }
 0xebe   :  { %v3844_v30 = vpop.f32.mrf.mxu1 }
 0xebf   :  { %v3845_v2 = vadd.f32 %v3923_v11, %v3844_v30 }
 0xec0   :  { %v5002_v47 = vpop.f32.mrf.mxu1 }
 0xec1   :  { %3849 = vst.msk [vmem:[#allocation23] sm:$0x3] %vm3848_vm3, %v3845_v2 }
 0xec2   :  { %5639 = shalt.err (!%p5636_p8)
}
 0xec3   :  { %3859 = dma.vmem_to_hbm [thread:$0]  %s3857_s18, 32, %s8735_s19, [#allocation5]  }
 0xec4   :  { %5662 = dma.done.wait [#allocation5], 32  }
 0xec5   :  { %5663 = vsyncadd [#allocation5], 4294967264 }
 0xec6   :  { %3863 = vsyncpa [#allocation4], 1 }
 0xec7   :  { %3864 = vsyncpa [#allocation7], 1 }
 0xec8   :  { %3865 = vsyncpa [#allocation10], 1 }
 0xec9   :  { %3866 = vsyncpa [#allocation13], 1 }
 0xeca   :  { %3867 = vsyncpa [#allocation16], 1 }
 0xecb   :  { %3868 = vsyncpa [#allocation19], 1 }
 0xecc   :  { %3869 = vsyncpa [#allocation22], 1 }
 0xecd   :  { %3870 = vsyncpa [#allocation5], 1 }

</bundles_post_ra>
